<compile_context>
chip_gen: v7x
topology: tpu7x:2x2x1
jax: 0.10.0
libtpu: 0.0.40
codegen_flags: <defaults>
</compile_context>

<pallas_src>
import functools

import jax
import jax.numpy as jnp
from jax import lax
from jax.experimental import pallas as pl
from jax.experimental.pallas import tpu as pltpu


# Row indices into the packed (16, d_model) bias / LayerNorm table.
(R_E_BO, R_E_LN1G, R_E_LN1B, R_E_B2, R_E_LN2G, R_E_LN2B,
 R_DS_BO, R_D_LN1G, R_D_LN1B, R_DC_BQ, R_DC_BO, R_D_LN2G, R_D_LN2B,
 R_D_B2, R_D_LN3G, R_D_LN3B) = range(16)


# ---------------------------------------------------------------------------
# Fused kernel: encoder layer + decoder layer + final projection, one block of
# `bb` batch elements per grid point.  All weights are full-array VMEM blocks.
# ---------------------------------------------------------------------------

def _fused_seq2seq_kernel(
    src_ref, tgt_ref,
    # matmul weights (compute dtype, typically bf16)
    e_wqkv, e_wo, e_w1, e_w2,
    ds_wqkv, ds_wo,
    dc_wq, dc_wkv, dc_wo,
    d_w1, d_w2,
    fc_w,
    # packed f32 bias / LayerNorm rows
    rows_d, rows_ff, rows_qkvb, row_kvb, row_fcb,
    # output
    o_ref,
    *, nhead, d_model, bb, s_src, s_tgt):

    f32 = jnp.float32
    dh = d_model // nhead

    def wdot(a, w_ref):
        # Weight matmul: activations cast to the weight dtype (bf16 path),
        # accumulate in f32 on the MXU.
        w = w_ref[...]
        return jnp.dot(a.astype(w.dtype), w, preferred_element_type=f32)

    def drow(i):
        return rows_d[i:i + 1, :]                                  # (1, D) f32

    def layernorm(x, gi, bi):
        mean = jnp.mean(x, axis=-1, keepdims=True)
        var = jnp.mean(jnp.square(x - mean), axis=-1, keepdims=True)
        return (x - mean) * lax.rsqrt(var + 1e-5) * drow(gi) + drow(bi)

    def mha(q, k, v, wo_ref, bo_i, sq, sk):
        # q: (bb*sq, D), k/v: (bb*sk, D), f32; 1/sqrt(dh) folded into q-proj.
        # Tiny per-sample / per-head score+PV matmuls (kept f32), then ONE
        # batched-M, full-K output projection on the MXU.
        outs = []
        for s in range(bb):
            qs = q[s * sq:(s + 1) * sq, :]
            ks = k[s * sk:(s + 1) * sk, :]
            vs = v[s * sk:(s + 1) * sk, :]
            heads = []
            for h in range(nhead):
                sl = slice(h * dh, (h + 1) * dh)
                sc = lax.dot_general(qs[:, sl], ks[:, sl],
                                     (((1,), (1,)), ((), ())),
                                     preferred_element_type=f32)   # (sq, sk)
                sc = sc - jnp.max(sc, axis=-1, keepdims=True)
                p = jnp.exp(sc)
                p = p * pl.reciprocal(jnp.sum(p, axis=-1, keepdims=True),
                                      approx=True)
                heads.append(jnp.dot(p, vs[:, sl],
                                     preferred_element_type=f32))  # (sq, dh)
            outs.append(jnp.concatenate(heads, axis=-1))           # (sq, D)
        o = jnp.concatenate(outs, axis=0)                          # (bb*sq, D)
        return wdot(o, wo_ref) + drow(bo_i)

    def self_attn(x, wqkv_ref, bqkv_row, wo_ref, bo_i, s_len):
        qkv = wdot(x, wqkv_ref) + bqkv_row                         # (bb*s, 3D pad)
        return mha(qkv[:, 0:d_model], qkv[:, d_model:2 * d_model],
                   qkv[:, 2 * d_model:3 * d_model], wo_ref, bo_i, s_len, s_len)

    def ffn(x, w1_ref, b1_row, w2_ref, b2_i):
        # TODO(synk): tile d_ff in 512-1024 column chunks (lax.fori_loop) if
        # the bundle dump shows spills here or if weights outgrow v7x's
        # 64 MiB VMEM at production d_model/d_ff.
        h = jnp.maximum(wdot(x, w1_ref) + b1_row, 0.0)             # ReLU
        return wdot(h, w2_ref) + drow(b2_i)

    # ---------------- encoder layer (post-norm) ----------------
    x = src_ref[...]                                               # (bb*Ss, D)
    x = layernorm(x + self_attn(x, e_wqkv, rows_qkvb[0:1, :], e_wo,
                                R_E_BO, s_src),
                  R_E_LN1G, R_E_LN1B)
    x = layernorm(x + ffn(x, e_w1, rows_ff[0:1, :], e_w2, R_E_B2),
                  R_E_LN2G, R_E_LN2B)
    mem = x

    # ---------------- decoder layer (post-norm) ----------------
    # Reference forward calls the decoder without masks -> no causal mask.
    y = tgt_ref[...]                                               # (bb*St, D)
    y = layernorm(y + self_attn(y, ds_wqkv, rows_qkvb[1:2, :], ds_wo,
                                R_DS_BO, s_tgt),
                  R_D_LN1G, R_D_LN1B)
    q = wdot(y, dc_wq) + drow(R_DC_BQ)                             # (bb*St, D)
    kv = wdot(mem, dc_wkv) + row_kvb[...]                          # (bb*Ss, 2D pad)
    ca = mha(q, kv[:, 0:d_model], kv[:, d_model:2 * d_model],
             dc_wo, R_DC_BO, s_tgt, s_src)
    y = layernorm(y + ca, R_D_LN2G, R_D_LN2B)
    y = layernorm(y + ffn(y, d_w1, rows_ff[1:2, :], d_w2, R_D_B2),
                  R_D_LN3G, R_D_LN3B)

    # ---------------- output projection (lane-dense padded vocab) ----------
    o_ref[...] = wdot(y, fc_w) + row_fcb[...]


# ---------------------------------------------------------------------------
# Wrapper: embedding lookup in XLA (tiny gather), everything else in Pallas.
# ---------------------------------------------------------------------------

def _const_spec(shape):
    """Full-array weight block, constant across the grid -> single-buffered."""
    zeros = (0,) * len(shape)
    idx = lambda g: zeros
    try:
        # Constant index_map: one buffer is enough; avoids doubling the
        # resident weight footprint (matters most on v7x's 64 MiB VMEM).
        return pl.BlockSpec(shape, idx, pipeline_mode=pl.Buffered(1))
    except (TypeError, AttributeError):
        return pl.BlockSpec(shape, idx)


def seq2seq_transformer_forward(prepared, src, tgt, *, nhead, d_model, tgt_vocab,
                                batch_blocks=None):
    B, Ss = src.shape
    _, St = tgt.shape
    pos = prepared["pos_embed"]                                    # (max_len, D)
    src_emb = jnp.take(prepared["src_embed"], src, axis=0) + pos[None, :Ss, :]
    tgt_emb = jnp.take(prepared["tgt_embed"], tgt, axis=0) + pos[None, :St, :]

    # grid of >=2 "parallel" steps keeps both v7x TensorCores busy; each step
    # handles bb batch elements flattened into the matmul M dimension.
    if batch_blocks is None:
        batch_blocks = 2 if (B % 2 == 0 and B >= 2) else 1
        bb_try = B // batch_blocks
        if (bb_try * Ss) % 8 or (bb_try * St) % 8:   # keep (8,128) block rule
            batch_blocks = 1
    assert B % batch_blocks == 0, (B, batch_blocks)
    bb = B // batch_blocks

    src_flat = src_emb.reshape(B * Ss, d_model).astype(jnp.float32)
    tgt_flat = tgt_emb.reshape(B * St, d_model).astype(jnp.float32)

    mats, rows = prepared["mats"], prepared["rows"]
    vpad = mats[-1].shape[-1]                                      # padded vocab

    in_specs = ([pl.BlockSpec((bb * Ss, d_model), lambda g: (g, 0)),
                 pl.BlockSpec((bb * St, d_model), lambda g: (g, 0))]
                + [_const_spec(w.shape) for w in (*mats, *rows)])
    out_specs = pl.BlockSpec((bb * St, vpad), lambda g: (g, 0))

    # Explicit scoped-VMEM budget: weights (x2 headroom) + generous slack for
    # activation blocks / intermediates.  TODO(synk): re-derive for v7x when
    # scaling d_model/d_ff (64 MiB physical, 32 MiB scoped default).
    vmem_bytes = 2 * sum(int(w.size) * w.dtype.itemsize for w in (*mats, *rows))
    vmem_bytes = min(vmem_bytes + (16 << 20), 64 << 20)

    kernel = functools.partial(_fused_seq2seq_kernel, nhead=nhead,
                               d_model=d_model, bb=bb, s_src=Ss, s_tgt=St)
    logits = pl.pallas_call(
        kernel,
        out_shape=jax.ShapeDtypeStruct((B * St, vpad), jnp.float32),
        grid=(batch_blocks,),
        in_specs=in_specs,
        out_specs=out_specs,
        compiler_params=pltpu.CompilerParams(
            dimension_semantics=("parallel",),
            vmem_limit_bytes=int(vmem_bytes)),
    )(src_flat, tgt_flat, *mats, *rows)

    return logits.reshape(B, St, vpad)[:, :, :tgt_vocab]           # (B, St, V)


# ---------------------------------------------------------------------------
# Parameter init (PyTorch-structured) + packing for the fused kernel.
# ---------------------------------------------------------------------------

def init_params(key, src_vocab, tgt_vocab, d_model, max_len, d_ff):
    ks = iter(jax.random.split(key, 64))

    def rnd(shape, scale=0.02):
        return (scale * jax.random.normal(next(ks), shape)).astype(jnp.float32)

    def mha_params():
        z = lambda: jnp.zeros((d_model,), jnp.float32)
        return {"wq": rnd((d_model, d_model)), "bq": z(),
                "wk": rnd((d_model, d_model)), "bk": z(),
                "wv": rnd((d_model, d_model)), "bv": z(),
                "wo": rnd((d_model, d_model)), "bo": z()}

    def ln():
        return (jnp.ones((d_model,), jnp.float32),
                jnp.zeros((d_model,), jnp.float32))

    e1g, e1b = ln(); e2g, e2b = ln()
    d1g, d1b = ln(); d2g, d2b = ln(); d3g, d3b = ln()

    return {
        "src_embed": rnd((src_vocab, d_model), 1.0),
        "tgt_embed": rnd((tgt_vocab, d_model), 1.0),
        "pos_embed": jnp.zeros((1, max_len, d_model), jnp.float32),  # torch.zeros
        "encoder": {
            "self_attn": mha_params(),
            "ln1_g": e1g, "ln1_b": e1b, "ln2_g": e2g, "ln2_b": e2b,
            "w1": rnd((d_model, d_ff)), "b1": jnp.zeros((d_ff,), jnp.float32),
            "w2": rnd((d_ff, d_model)), "b2": jnp.zeros((d_model,), jnp.float32),
        },
        "decoder": {
            "self_attn": mha_params(),
            "cross_attn": mha_params(),
            "ln1_g": d1g, "ln1_b": d1b, "ln2_g": d2g, "ln2_b": d2b,
            "ln3_g": d3g, "ln3_b": d3b,
            "w1": rnd((d_model, d_ff)), "b1": jnp.zeros((d_ff,), jnp.float32),
            "w2": rnd((d_ff, d_model)), "b2": jnp.zeros((d_model,), jnp.float32),
        },
        "fc_w": rnd((d_model, tgt_vocab)),
        "fc_b": jnp.zeros((tgt_vocab,), jnp.float32),
    }


def prepare_params(params, nhead, d_model, compute_dtype=jnp.bfloat16):
    """Pack QKV, fold 1/sqrt(dh) into the q-projection, pad lane dims to 128,
    cast matmul weights to the compute dtype (bf16 default; pass jnp.float32
    for tight parity with the fp32 reference), and stack the tiny per-feature
    bias / LayerNorm rows into a few consolidated tables."""
    dh = d_model // nhead
    scale = 1.0 / (dh ** 0.5)
    f32 = jnp.float32

    def pad_lanes(x, mult=128):
        pad = (-x.shape[-1]) % mult
        if pad:
            x = jnp.concatenate(
                [x, jnp.zeros(x.shape[:-1] + (pad,), x.dtype)], axis=-1)
        return x

    enc, dec = params["encoder"], params["decoder"]
    esa, dsa, dca = enc["self_attn"], dec["self_attn"], dec["cross_attn"]

    def pack_qkv(p):
        w = pad_lanes(jnp.concatenate([p["wq"] * scale, p["wk"], p["wv"]], axis=1))
        b = pad_lanes(jnp.concatenate([p["bq"] * scale, p["bk"], p["bv"]])
                      .reshape(1, -1))
        return w, b

    e_wqkv, e_bqkv = pack_qkv(esa)
    ds_wqkv, ds_bqkv = pack_qkv(dsa)
    dc_wkv = pad_lanes(jnp.concatenate([dca["wk"], dca["wv"]], axis=1))
    dc_bkv = pad_lanes(jnp.concatenate([dca["bk"], dca["bv"]]).reshape(1, -1))
    fc_w = pad_lanes(params["fc_w"])
    fc_b = pad_lanes(params["fc_b"].reshape(1, -1))

    # Matmul operands in the compute dtype (bf16 halves HBM weight bytes and
    # runs at the full MXU rate on v5e/v6e/v7x).
    mats = tuple(m.astype(compute_dtype) for m in (
        e_wqkv, esa["wo"], enc["w1"], enc["w2"],
        ds_wqkv, dsa["wo"],
        dca["wq"] * scale, dc_wkv, dca["wo"],
        dec["w1"], dec["w2"],
        fc_w,
    ))

    # One (16, D) f32 table for all D-wide bias / LayerNorm rows (order must
    # match the R_* constants) -> one DMA instead of ~16 tiny ones.
    rows_d = jnp.stack([
        esa["bo"], enc["ln1_g"], enc["ln1_b"], enc["b2"], enc["ln2_g"],
        enc["ln2_b"], dsa["bo"], dec["ln1_g"], dec["ln1_b"], dca["bq"] * scale,
        dca["bo"], dec["ln2_g"], dec["ln2_b"], dec["b2"], dec["ln3_g"],
        dec["ln3_b"],
    ], axis=0).astype(f32)
    rows_ff = jnp.stack([enc["b1"], dec["b1"]], axis=0).astype(f32)   # (2, d_ff)
    rows_qkvb = jnp.concatenate([e_bqkv, ds_bqkv], axis=0).astype(f32)
    rows = (rows_d, rows_ff, rows_qkvb, dc_bkv.astype(f32), fc_b.astype(f32))

    return {
        "src_embed": params["src_embed"],
        "tgt_embed": params["tgt_embed"],
        "pos_embed": params["pos_embed"][0],          # (max_len, D)
        "mats": mats,
        "rows": rows,
    }


# ---------------------------------------------------------------------------

if __name__ == "__main__":
    SRC_VOCAB, TGT_VOCAB = 50, 60
    D_MODEL, NHEAD, MAX_LEN, D_FF = 32, 4, 16, 2048   # d_ff = PyTorch default
    B, S_SRC, S_TGT = 4, 8, 8                         # grid=(2,), bb=2 per step

    root = jax.random.PRNGKey(0)
    k_param, k_src, k_tgt = jax.random.split(root, 3)

    params = init_params(k_param, SRC_VOCAB, TGT_VOCAB, D_MODEL, MAX_LEN, D_FF)
    prepared = prepare_params(params, NHEAD, D_MODEL)  # bf16 matmul weights

    src = jax.random.randint(k_src, (B, S_SRC), 0, SRC_VOCAB, dtype=jnp.int32)
    tgt = jax.random.randint(k_tgt, (B, S_TGT), 0, TGT_VOCAB, dtype=jnp.int32)

    fwd = jax.jit(functools.partial(
        seq2seq_transformer_forward,
        nhead=NHEAD, d_model=D_MODEL, tgt_vocab=TGT_VOCAB))
    logits = fwd(prepared, src, tgt)
    jax.block_until_ready(logits)

    assert logits.shape == (B, S_TGT, TGT_VOCAB), logits.shape
    assert logits.dtype == jnp.float32
    assert bool(jnp.all(jnp.isfinite(logits)))
    print("KERNEL_OK")
</pallas_src>

<mosaic_0001>
module attributes {stable_mosaic.version = 11 : i64} {
  func.func @_fused_seq2seq_kernel(%arg0: i32, %arg1: memref<16x32xf32, #tpu.memory_space<vmem>>, %arg2: memref<16x32xf32, #tpu.memory_space<vmem>>, %arg3: memref<32x128xbf16, #tpu.memory_space<vmem>>, %arg4: memref<32x32xbf16, #tpu.memory_space<vmem>>, %arg5: memref<32x2048xbf16, #tpu.memory_space<vmem>>, %arg6: memref<2048x32xbf16, #tpu.memory_space<vmem>>, %arg7: memref<32x128xbf16, #tpu.memory_space<vmem>>, %arg8: memref<32x32xbf16, #tpu.memory_space<vmem>>, %arg9: memref<32x32xbf16, #tpu.memory_space<vmem>>, %arg10: memref<32x128xbf16, #tpu.memory_space<vmem>>, %arg11: memref<32x32xbf16, #tpu.memory_space<vmem>>, %arg12: memref<32x2048xbf16, #tpu.memory_space<vmem>>, %arg13: memref<2048x32xbf16, #tpu.memory_space<vmem>>, %arg14: memref<32x128xbf16, #tpu.memory_space<vmem>>, %arg15: memref<16x32xf32, #tpu.memory_space<vmem>>, %arg16: memref<2x2048xf32, #tpu.memory_space<vmem>>, %arg17: memref<2x128xf32, #tpu.memory_space<vmem>>, %arg18: memref<1x128xf32, #tpu.memory_space<vmem>>, %arg19: memref<1x128xf32, #tpu.memory_space<vmem>>, %arg20: memref<16x128xf32, #tpu.memory_space<vmem>>) attributes {dimension_semantics = [#tpu.dimension_semantics<parallel>], iteration_bounds = array<i64: 2>, scalar_prefetch = 0 : i64, scratch_operands = 0 : i64, tpu.core_type = #tpu.core_type<tc>, window_params = [{transform_indices = @transform_0, window_bounds = array<i64: 16, 32>}, {transform_indices = @transform_1, window_bounds = array<i64: 16, 32>}, {pipeline_mode = #tpu.pipeline_mode<synchronous>, transform_indices = @transform_2, window_bounds = array<i64: 32, 128>}, {pipeline_mode = #tpu.pipeline_mode<synchronous>, transform_indices = @transform_3, window_bounds = array<i64: 32, 32>}, {pipeline_mode = #tpu.pipeline_mode<synchronous>, transform_indices = @transform_4, window_bounds = array<i64: 32, 2048>}, {pipeline_mode = #tpu.pipeline_mode<synchronous>, transform_indices = @transform_5, window_bounds = array<i64: 2048, 32>}, {pipeline_mode = #tpu.pipeline_mode<synchronous>, transform_indices = @transform_6, window_bounds = array<i64: 32, 128>}, {pipeline_mode = #tpu.pipeline_mode<synchronous>, transform_indices = @transform_7, window_bounds = array<i64: 32, 32>}, {pipeline_mode = #tpu.pipeline_mode<synchronous>, transform_indices = @transform_8, window_bounds = array<i64: 32, 32>}, {pipeline_mode = #tpu.pipeline_mode<synchronous>, transform_indices = @transform_9, window_bounds = array<i64: 32, 128>}, {pipeline_mode = #tpu.pipeline_mode<synchronous>, transform_indices = @transform_10, window_bounds = array<i64: 32, 32>}, {pipeline_mode = #tpu.pipeline_mode<synchronous>, transform_indices = @transform_11, window_bounds = array<i64: 32, 2048>}, {pipeline_mode = #tpu.pipeline_mode<synchronous>, transform_indices = @transform_12, window_bounds = array<i64: 2048, 32>}, {pipeline_mode = #tpu.pipeline_mode<synchronous>, transform_indices = @transform_13, window_bounds = array<i64: 32, 128>}, {pipeline_mode = #tpu.pipeline_mode<synchronous>, transform_indices = @transform_14, window_bounds = array<i64: 16, 32>}, {pipeline_mode = #tpu.pipeline_mode<synchronous>, transform_indices = @transform_15, window_bounds = array<i64: 2, 2048>}, {pipeline_mode = #tpu.pipeline_mode<synchronous>, transform_indices = @transform_16, window_bounds = array<i64: 2, 128>}, {pipeline_mode = #tpu.pipeline_mode<synchronous>, transform_indices = @transform_17, window_bounds = array<i64: 1, 128>}, {pipeline_mode = #tpu.pipeline_mode<synchronous>, transform_indices = @transform_18, window_bounds = array<i64: 1, 128>}, {transform_indices = @transform_19, window_bounds = array<i64: 16, 128>}]} {
    %c0 = arith.constant 0 : index
    %c0_0 = arith.constant 0 : index
    %0 = vector.load %arg1[%c0, %c0_0] : memref<16x32xf32, #tpu.memory_space<vmem>>, vector<16x32xf32>
    %c0_1 = arith.constant 0 : index
    %c0_2 = arith.constant 0 : index
    %1 = vector.load %arg17[%c0_1, %c0_2] : memref<2x128xf32, #tpu.memory_space<vmem>>, vector<1x128xf32>
    %c0_3 = arith.constant 0 : index
    %c0_4 = arith.constant 0 : index
    %2 = vector.load %arg3[%c0_3, %c0_4] : memref<32x128xbf16, #tpu.memory_space<vmem>>, vector<32x128xbf16>
    %3 = arith.truncf %0 : vector<16x32xf32> to vector<16x32xbf16>
    %cst = arith.constant dense<0.000000e+00> : vector<16x128xf32>
    %4 = tpu.matmul %3, %2, %cst {dimension_numbers = #tpu.dot_dimension_numbers<[1], [0], [0], [1], [0, 0, 1, 1], [], []>} : vector<16x32xbf16>, vector<32x128xbf16>, vector<16x128xf32> -> vector<16x128xf32>
    %5 = vector.broadcast %1 : vector<1x128xf32> to vector<16x128xf32>
    %6 = arith.addf %4, %5 : vector<16x128xf32>
    %7 = vector.extract_strided_slice %6 {offsets = [0, 0], sizes = [16, 32], strides = [1, 1]} : vector<16x128xf32> to vector<16x32xf32>
    %8 = vector.extract_strided_slice %6 {offsets = [0, 32], sizes = [16, 32], strides = [1, 1]} : vector<16x128xf32> to vector<16x32xf32>
    %9 = vector.extract_strided_slice %6 {offsets = [0, 64], sizes = [16, 32], strides = [1, 1]} : vector<16x128xf32> to vector<16x32xf32>
    %10 = vector.extract_strided_slice %7 {offsets = [0, 0], sizes = [8, 32], strides = [1, 1]} : vector<16x32xf32> to vector<8x32xf32>
    %11 = vector.extract_strided_slice %8 {offsets = [0, 0], sizes = [8, 32], strides = [1, 1]} : vector<16x32xf32> to vector<8x32xf32>
    %12 = vector.extract_strided_slice %9 {offsets = [0, 0], sizes = [8, 32], strides = [1, 1]} : vector<16x32xf32> to vector<8x32xf32>
    %13 = vector.extract_strided_slice %10 {offsets = [0, 0], sizes = [8, 8], strides = [1, 1]} : vector<8x32xf32> to vector<8x8xf32>
    %14 = vector.extract_strided_slice %11 {offsets = [0, 0], sizes = [8, 8], strides = [1, 1]} : vector<8x32xf32> to vector<8x8xf32>
    %cst_5 = arith.constant dense<0.000000e+00> : vector<8x8xf32>
    %15 = tpu.matmul %13, %14, %cst_5 {dimension_numbers = #tpu.dot_dimension_numbers<[1], [1], [0], [0], [0, 0, 1, 0], [], []>} : vector<8x8xf32>, vector<8x8xf32>, vector<8x8xf32> -> vector<8x8xf32>
    %cst_6 = arith.constant dense<0xFF800000> : vector<8xf32>
    %16 = vector.multi_reduction <maximumf>, %15, %cst_6 [1] : vector<8x8xf32> to vector<8xf32>
    %17 = vector.shape_cast %16 : vector<8xf32> to vector<8x1xf32>
    %18 = vector.broadcast %17 : vector<8x1xf32> to vector<8x8xf32>
    %19 = arith.subf %15, %18 : vector<8x8xf32>
    %20 = math.exp %19 : vector<8x8xf32>
    %cst_7 = arith.constant dense<0.000000e+00> : vector<8xf32>
    %21 = vector.multi_reduction <add>, %20, %cst_7 [1] : vector<8x8xf32> to vector<8xf32>
    %22 = vector.shape_cast %21 : vector<8xf32> to vector<8x1xf32>
    %23 = tpu.reciprocal %22 {approx = true} : vector<8x1xf32> -> vector<8x1xf32>
    %24 = vector.broadcast %23 : vector<8x1xf32> to vector<8x8xf32>
    %25 = arith.mulf %20, %24 : vector<8x8xf32>
    %26 = vector.extract_strided_slice %12 {offsets = [0, 0], sizes = [8, 8], strides = [1, 1]} : vector<8x32xf32> to vector<8x8xf32>
    %cst_8 = arith.constant dense<0.000000e+00> : vector<8x8xf32>
    %27 = tpu.matmul %25, %26, %cst_8 {dimension_numbers = #tpu.dot_dimension_numbers<[1], [0], [0], [1], [0, 0, 1, 1], [], []>} : vector<8x8xf32>, vector<8x8xf32>, vector<8x8xf32> -> vector<8x8xf32>
    %28 = vector.extract_strided_slice %10 {offsets = [0, 8], sizes = [8, 8], strides = [1, 1]} : vector<8x32xf32> to vector<8x8xf32>
    %29 = vector.extract_strided_slice %11 {offsets = [0, 8], sizes = [8, 8], strides = [1, 1]} : vector<8x32xf32> to vector<8x8xf32>
    %cst_9 = arith.constant dense<0.000000e+00> : vector<8x8xf32>
    %30 = tpu.matmul %28, %29, %cst_9 {dimension_numbers = #tpu.dot_dimension_numbers<[1], [1], [0], [0], [0, 0, 1, 0], [], []>} : vector<8x8xf32>, vector<8x8xf32>, vector<8x8xf32> -> vector<8x8xf32>
    %cst_10 = arith.constant dense<0xFF800000> : vector<8xf32>
    %31 = vector.multi_reduction <maximumf>, %30, %cst_10 [1] : vector<8x8xf32> to vector<8xf32>
    %32 = vector.shape_cast %31 : vector<8xf32> to vector<8x1xf32>
    %33 = vector.broadcast %32 : vector<8x1xf32> to vector<8x8xf32>
    %34 = arith.subf %30, %33 : vector<8x8xf32>
    %35 = math.exp %34 : vector<8x8xf32>
    %cst_11 = arith.constant dense<0.000000e+00> : vector<8xf32>
    %36 = vector.multi_reduction <add>, %35, %cst_11 [1] : vector<8x8xf32> to vector<8xf32>
    %37 = vector.shape_cast %36 : vector<8xf32> to vector<8x1xf32>
    %38 = tpu.reciprocal %37 {approx = true} : vector<8x1xf32> -> vector<8x1xf32>
    %39 = vector.broadcast %38 : vector<8x1xf32> to vector<8x8xf32>
    %40 = arith.mulf %35, %39 : vector<8x8xf32>
    %41 = vector.extract_strided_slice %12 {offsets = [0, 8], sizes = [8, 8], strides = [1, 1]} : vector<8x32xf32> to vector<8x8xf32>
    %cst_12 = arith.constant dense<0.000000e+00> : vector<8x8xf32>
    %42 = tpu.matmul %40, %41, %cst_12 {dimension_numbers = #tpu.dot_dimension_numbers<[1], [0], [0], [1], [0, 0, 1, 1], [], []>} : vector<8x8xf32>, vector<8x8xf32>, vector<8x8xf32> -> vector<8x8xf32>
    %43 = vector.extract_strided_slice %10 {offsets = [0, 16], sizes = [8, 8], strides = [1, 1]} : vector<8x32xf32> to vector<8x8xf32>
    %44 = vector.extract_strided_slice %11 {offsets = [0, 16], sizes = [8, 8], strides = [1, 1]} : vector<8x32xf32> to vector<8x8xf32>
    %cst_13 = arith.constant dense<0.000000e+00> : vector<8x8xf32>
    %45 = tpu.matmul %43, %44, %cst_13 {dimension_numbers = #tpu.dot_dimension_numbers<[1], [1], [0], [0], [0, 0, 1, 0], [], []>} : vector<8x8xf32>, vector<8x8xf32>, vector<8x8xf32> -> vector<8x8xf32>
    %cst_14 = arith.constant dense<0xFF800000> : vector<8xf32>
    %46 = vector.multi_reduction <maximumf>, %45, %cst_14 [1] : vector<8x8xf32> to vector<8xf32>
    %47 = vector.shape_cast %46 : vector<8xf32> to vector<8x1xf32>
    %48 = vector.broadcast %47 : vector<8x1xf32> to vector<8x8xf32>
    %49 = arith.subf %45, %48 : vector<8x8xf32>
    %50 = math.exp %49 : vector<8x8xf32>
    %cst_15 = arith.constant dense<0.000000e+00> : vector<8xf32>
    %51 = vector.multi_reduction <add>, %50, %cst_15 [1] : vector<8x8xf32> to vector<8xf32>
    %52 = vector.shape_cast %51 : vector<8xf32> to vector<8x1xf32>
    %53 = tpu.reciprocal %52 {approx = true} : vector<8x1xf32> -> vector<8x1xf32>
    %54 = vector.broadcast %53 : vector<8x1xf32> to vector<8x8xf32>
    %55 = arith.mulf %50, %54 : vector<8x8xf32>
    %56 = vector.extract_strided_slice %12 {offsets = [0, 16], sizes = [8, 8], strides = [1, 1]} : vector<8x32xf32> to vector<8x8xf32>
    %cst_16 = arith.constant dense<0.000000e+00> : vector<8x8xf32>
    %57 = tpu.matmul %55, %56, %cst_16 {dimension_numbers = #tpu.dot_dimension_numbers<[1], [0], [0], [1], [0, 0, 1, 1], [], []>} : vector<8x8xf32>, vector<8x8xf32>, vector<8x8xf32> -> vector<8x8xf32>
    %58 = vector.extract_strided_slice %10 {offsets = [0, 24], sizes = [8, 8], strides = [1, 1]} : vector<8x32xf32> to vector<8x8xf32>
    %59 = vector.extract_strided_slice %11 {offsets = [0, 24], sizes = [8, 8], strides = [1, 1]} : vector<8x32xf32> to vector<8x8xf32>
    %cst_17 = arith.constant dense<0.000000e+00> : vector<8x8xf32>
    %60 = tpu.matmul %58, %59, %cst_17 {dimension_numbers = #tpu.dot_dimension_numbers<[1], [1], [0], [0], [0, 0, 1, 0], [], []>} : vector<8x8xf32>, vector<8x8xf32>, vector<8x8xf32> -> vector<8x8xf32>
    %cst_18 = arith.constant dense<0xFF800000> : vector<8xf32>
    %61 = vector.multi_reduction <maximumf>, %60, %cst_18 [1] : vector<8x8xf32> to vector<8xf32>
    %62 = vector.shape_cast %61 : vector<8xf32> to vector<8x1xf32>
    %63 = vector.broadcast %62 : vector<8x1xf32> to vector<8x8xf32>
    %64 = arith.subf %60, %63 : vector<8x8xf32>
    %65 = math.exp %64 : vector<8x8xf32>
    %cst_19 = arith.constant dense<0.000000e+00> : vector<8xf32>
    %66 = vector.multi_reduction <add>, %65, %cst_19 [1] : vector<8x8xf32> to vector<8xf32>
    %67 = vector.shape_cast %66 : vector<8xf32> to vector<8x1xf32>
    %68 = tpu.reciprocal %67 {approx = true} : vector<8x1xf32> -> vector<8x1xf32>
    %69 = vector.broadcast %68 : vector<8x1xf32> to vector<8x8xf32>
    %70 = arith.mulf %65, %69 : vector<8x8xf32>
    %71 = vector.extract_strided_slice %12 {offsets = [0, 24], sizes = [8, 8], strides = [1, 1]} : vector<8x32xf32> to vector<8x8xf32>
    %cst_20 = arith.constant dense<0.000000e+00> : vector<8x8xf32>
    %72 = tpu.matmul %70, %71, %cst_20 {dimension_numbers = #tpu.dot_dimension_numbers<[1], [0], [0], [1], [0, 0, 1, 1], [], []>} : vector<8x8xf32>, vector<8x8xf32>, vector<8x8xf32> -> vector<8x8xf32>
    %73 = tpu.concatenate %27, %42, %57, %72 in 1 : vector<8x8xf32>, vector<8x8xf32>, vector<8x8xf32>, vector<8x8xf32> -> vector<8x32xf32>
    %74 = vector.extract_strided_slice %7 {offsets = [8, 0], sizes = [8, 32], strides = [1, 1]} : vector<16x32xf32> to vector<8x32xf32>
    %75 = vector.extract_strided_slice %8 {offsets = [8, 0], sizes = [8, 32], strides = [1, 1]} : vector<16x32xf32> to vector<8x32xf32>
    %76 = vector.extract_strided_slice %9 {offsets = [8, 0], sizes = [8, 32], strides = [1, 1]} : vector<16x32xf32> to vector<8x32xf32>
    %77 = vector.extract_strided_slice %74 {offsets = [0, 0], sizes = [8, 8], strides = [1, 1]} : vector<8x32xf32> to vector<8x8xf32>
    %78 = vector.extract_strided_slice %75 {offsets = [0, 0], sizes = [8, 8], strides = [1, 1]} : vector<8x32xf32> to vector<8x8xf32>
    %cst_21 = arith.constant dense<0.000000e+00> : vector<8x8xf32>
    %79 = tpu.matmul %77, %78, %cst_21 {dimension_numbers = #tpu.dot_dimension_numbers<[1], [1], [0], [0], [0, 0, 1, 0], [], []>} : vector<8x8xf32>, vector<8x8xf32>, vector<8x8xf32> -> vector<8x8xf32>
    %cst_22 = arith.constant dense<0xFF800000> : vector<8xf32>
    %80 = vector.multi_reduction <maximumf>, %79, %cst_22 [1] : vector<8x8xf32> to vector<8xf32>
    %81 = vector.shape_cast %80 : vector<8xf32> to vector<8x1xf32>
    %82 = vector.broadcast %81 : vector<8x1xf32> to vector<8x8xf32>
    %83 = arith.subf %79, %82 : vector<8x8xf32>
    %84 = math.exp %83 : vector<8x8xf32>
    %cst_23 = arith.constant dense<0.000000e+00> : vector<8xf32>
    %85 = vector.multi_reduction <add>, %84, %cst_23 [1] : vector<8x8xf32> to vector<8xf32>
    %86 = vector.shape_cast %85 : vector<8xf32> to vector<8x1xf32>
    %87 = tpu.reciprocal %86 {approx = true} : vector<8x1xf32> -> vector<8x1xf32>
    %88 = vector.broadcast %87 : vector<8x1xf32> to vector<8x8xf32>
    %89 = arith.mulf %84, %88 : vector<8x8xf32>
    %90 = vector.extract_strided_slice %76 {offsets = [0, 0], sizes = [8, 8], strides = [1, 1]} : vector<8x32xf32> to vector<8x8xf32>
    %cst_24 = arith.constant dense<0.000000e+00> : vector<8x8xf32>
    %91 = tpu.matmul %89, %90, %cst_24 {dimension_numbers = #tpu.dot_dimension_numbers<[1], [0], [0], [1], [0, 0, 1, 1], [], []>} : vector<8x8xf32>, vector<8x8xf32>, vector<8x8xf32> -> vector<8x8xf32>
    %92 = vector.extract_strided_slice %74 {offsets = [0, 8], sizes = [8, 8], strides = [1, 1]} : vector<8x32xf32> to vector<8x8xf32>
    %93 = vector.extract_strided_slice %75 {offsets = [0, 8], sizes = [8, 8], strides = [1, 1]} : vector<8x32xf32> to vector<8x8xf32>
    %cst_25 = arith.constant dense<0.000000e+00> : vector<8x8xf32>
    %94 = tpu.matmul %92, %93, %cst_25 {dimension_numbers = #tpu.dot_dimension_numbers<[1], [1], [0], [0], [0, 0, 1, 0], [], []>} : vector<8x8xf32>, vector<8x8xf32>, vector<8x8xf32> -> vector<8x8xf32>
    %cst_26 = arith.constant dense<0xFF800000> : vector<8xf32>
    %95 = vector.multi_reduction <maximumf>, %94, %cst_26 [1] : vector<8x8xf32> to vector<8xf32>
    %96 = vector.shape_cast %95 : vector<8xf32> to vector<8x1xf32>
    %97 = vector.broadcast %96 : vector<8x1xf32> to vector<8x8xf32>
    %98 = arith.subf %94, %97 : vector<8x8xf32>
    %99 = math.exp %98 : vector<8x8xf32>
    %cst_27 = arith.constant dense<0.000000e+00> : vector<8xf32>
    %100 = vector.multi_reduction <add>, %99, %cst_27 [1] : vector<8x8xf32> to vector<8xf32>
    %101 = vector.shape_cast %100 : vector<8xf32> to vector<8x1xf32>
    %102 = tpu.reciprocal %101 {approx = true} : vector<8x1xf32> -> vector<8x1xf32>
    %103 = vector.broadcast %102 : vector<8x1xf32> to vector<8x8xf32>
    %104 = arith.mulf %99, %103 : vector<8x8xf32>
    %105 = vector.extract_strided_slice %76 {offsets = [0, 8], sizes = [8, 8], strides = [1, 1]} : vector<8x32xf32> to vector<8x8xf32>
    %cst_28 = arith.constant dense<0.000000e+00> : vector<8x8xf32>
    %106 = tpu.matmul %104, %105, %cst_28 {dimension_numbers = #tpu.dot_dimension_numbers<[1], [0], [0], [1], [0, 0, 1, 1], [], []>} : vector<8x8xf32>, vector<8x8xf32>, vector<8x8xf32> -> vector<8x8xf32>
    %107 = vector.extract_strided_slice %74 {offsets = [0, 16], sizes = [8, 8], strides = [1, 1]} : vector<8x32xf32> to vector<8x8xf32>
    %108 = vector.extract_strided_slice %75 {offsets = [0, 16], sizes = [8, 8], strides = [1, 1]} : vector<8x32xf32> to vector<8x8xf32>
    %cst_29 = arith.constant dense<0.000000e+00> : vector<8x8xf32>
    %109 = tpu.matmul %107, %108, %cst_29 {dimension_numbers = #tpu.dot_dimension_numbers<[1], [1], [0], [0], [0, 0, 1, 0], [], []>} : vector<8x8xf32>, vector<8x8xf32>, vector<8x8xf32> -> vector<8x8xf32>
    %cst_30 = arith.constant dense<0xFF800000> : vector<8xf32>
    %110 = vector.multi_reduction <maximumf>, %109, %cst_30 [1] : vector<8x8xf32> to vector<8xf32>
    %111 = vector.shape_cast %110 : vector<8xf32> to vector<8x1xf32>
    %112 = vector.broadcast %111 : vector<8x1xf32> to vector<8x8xf32>
    %113 = arith.subf %109, %112 : vector<8x8xf32>
    %114 = math.exp %113 : vector<8x8xf32>
    %cst_31 = arith.constant dense<0.000000e+00> : vector<8xf32>
    %115 = vector.multi_reduction <add>, %114, %cst_31 [1] : vector<8x8xf32> to vector<8xf32>
    %116 = vector.shape_cast %115 : vector<8xf32> to vector<8x1xf32>
    %117 = tpu.reciprocal %116 {approx = true} : vector<8x1xf32> -> vector<8x1xf32>
    %118 = vector.broadcast %117 : vector<8x1xf32> to vector<8x8xf32>
    %119 = arith.mulf %114, %118 : vector<8x8xf32>
    %120 = vector.extract_strided_slice %76 {offsets = [0, 16], sizes = [8, 8], strides = [1, 1]} : vector<8x32xf32> to vector<8x8xf32>
    %cst_32 = arith.constant dense<0.000000e+00> : vector<8x8xf32>
    %121 = tpu.matmul %119, %120, %cst_32 {dimension_numbers = #tpu.dot_dimension_numbers<[1], [0], [0], [1], [0, 0, 1, 1], [], []>} : vector<8x8xf32>, vector<8x8xf32>, vector<8x8xf32> -> vector<8x8xf32>
    %122 = vector.extract_strided_slice %74 {offsets = [0, 24], sizes = [8, 8], strides = [1, 1]} : vector<8x32xf32> to vector<8x8xf32>
    %123 = vector.extract_strided_slice %75 {offsets = [0, 24], sizes = [8, 8], strides = [1, 1]} : vector<8x32xf32> to vector<8x8xf32>
    %cst_33 = arith.constant dense<0.000000e+00> : vector<8x8xf32>
    %124 = tpu.matmul %122, %123, %cst_33 {dimension_numbers = #tpu.dot_dimension_numbers<[1], [1], [0], [0], [0, 0, 1, 0], [], []>} : vector<8x8xf32>, vector<8x8xf32>, vector<8x8xf32> -> vector<8x8xf32>
    %cst_34 = arith.constant dense<0xFF800000> : vector<8xf32>
    %125 = vector.multi_reduction <maximumf>, %124, %cst_34 [1] : vector<8x8xf32> to vector<8xf32>
    %126 = vector.shape_cast %125 : vector<8xf32> to vector<8x1xf32>
    %127 = vector.broadcast %126 : vector<8x1xf32> to vector<8x8xf32>
    %128 = arith.subf %124, %127 : vector<8x8xf32>
    %129 = math.exp %128 : vector<8x8xf32>
    %cst_35 = arith.constant dense<0.000000e+00> : vector<8xf32>
    %130 = vector.multi_reduction <add>, %129, %cst_35 [1] : vector<8x8xf32> to vector<8xf32>
    %131 = vector.shape_cast %130 : vector<8xf32> to vector<8x1xf32>
    %132 = tpu.reciprocal %131 {approx = true} : vector<8x1xf32> -> vector<8x1xf32>
    %133 = vector.broadcast %132 : vector<8x1xf32> to vector<8x8xf32>
    %134 = arith.mulf %129, %133 : vector<8x8xf32>
    %135 = vector.extract_strided_slice %76 {offsets = [0, 24], sizes = [8, 8], strides = [1, 1]} : vector<8x32xf32> to vector<8x8xf32>
    %cst_36 = arith.constant dense<0.000000e+00> : vector<8x8xf32>
    %136 = tpu.matmul %134, %135, %cst_36 {dimension_numbers = #tpu.dot_dimension_numbers<[1], [0], [0], [1], [0, 0, 1, 1], [], []>} : vector<8x8xf32>, vector<8x8xf32>, vector<8x8xf32> -> vector<8x8xf32>
    %137 = tpu.concatenate %91, %106, %121, %136 in 1 : vector<8x8xf32>, vector<8x8xf32>, vector<8x8xf32>, vector<8x8xf32> -> vector<8x32xf32>
    %138 = tpu.concatenate %73, %137 in 0 : vector<8x32xf32>, vector<8x32xf32> -> vector<16x32xf32>
    %c0_37 = arith.constant 0 : index
    %c0_38 = arith.constant 0 : index
    %139 = vector.load %arg4[%c0_37, %c0_38] : memref<32x32xbf16, #tpu.memory_space<vmem>>, vector<32x32xbf16>
    %140 = arith.truncf %138 : vector<16x32xf32> to vector<16x32xbf16>
    %cst_39 = arith.constant dense<0.000000e+00> : vector<16x32xf32>
    %141 = tpu.matmul %140, %139, %cst_39 {dimension_numbers = #tpu.dot_dimension_numbers<[1], [0], [0], [1], [0, 0, 1, 1], [], []>} : vector<16x32xbf16>, vector<32x32xbf16>, vector<16x32xf32> -> vector<16x32xf32>
    %c0_40 = arith.constant 0 : index
    %c0_41 = arith.constant 0 : index
    %142 = vector.load %arg15[%c0_40, %c0_41] : memref<16x32xf32, #tpu.memory_space<vmem>>, vector<1x32xf32>
    %143 = vector.broadcast %142 : vector<1x32xf32> to vector<16x32xf32>
    %144 = arith.addf %141, %143 : vector<16x32xf32>
    %145 = arith.addf %0, %144 : vector<16x32xf32>
    %cst_42 = arith.constant dense<0.000000e+00> : vector<16xf32>
    %146 = vector.multi_reduction <add>, %145, %cst_42 [1] : vector<16x32xf32> to vector<16xf32>
    %147 = vector.shape_cast %146 : vector<16xf32> to vector<16x1xf32>
    %cst_43 = arith.constant 3.200000e+01 : f32
    %148 = vector.broadcast %cst_43 : f32 to vector<16x1xf32>
    %149 = arith.divf %147, %148 : vector<16x1xf32>
    %150 = vector.broadcast %149 : vector<16x1xf32> to vector<16x32xf32>
    %151 = arith.subf %145, %150 : vector<16x32xf32>
    %152 = arith.mulf %151, %151 : vector<16x32xf32>
    %cst_44 = arith.constant dense<0.000000e+00> : vector<16xf32>
    %153 = vector.multi_reduction <add>, %152, %cst_44 [1] : vector<16x32xf32> to vector<16xf32>
    %154 = vector.shape_cast %153 : vector<16xf32> to vector<16x1xf32>
    %cst_45 = arith.constant 3.200000e+01 : f32
    %155 = vector.broadcast %cst_45 : f32 to vector<16x1xf32>
    %156 = arith.divf %154, %155 : vector<16x1xf32>
    %157 = vector.broadcast %149 : vector<16x1xf32> to vector<16x32xf32>
    %158 = arith.subf %145, %157 : vector<16x32xf32>
    %cst_46 = arith.constant 9.99999974E-6 : f32
    %159 = vector.broadcast %cst_46 : f32 to vector<16x1xf32>
    %160 = arith.addf %156, %159 : vector<16x1xf32>
    %161 = math.rsqrt %160 : vector<16x1xf32>
    %162 = vector.broadcast %161 : vector<16x1xf32> to vector<16x32xf32>
    %163 = arith.mulf %158, %162 : vector<16x32xf32>
    %c1 = arith.constant 1 : index
    %c0_47 = arith.constant 0 : index
    %164 = vector.load %arg15[%c1, %c0_47] : memref<16x32xf32, #tpu.memory_space<vmem>>, vector<1x32xf32>
    %165 = vector.broadcast %164 : vector<1x32xf32> to vector<16x32xf32>
    %166 = arith.mulf %163, %165 : vector<16x32xf32>
    %c2 = arith.constant 2 : index
    %c0_48 = arith.constant 0 : index
    %167 = vector.load %arg15[%c2, %c0_48] : memref<16x32xf32, #tpu.memory_space<vmem>>, vector<1x32xf32>
    %168 = vector.broadcast %167 : vector<1x32xf32> to vector<16x32xf32>
    %169 = arith.addf %166, %168 : vector<16x32xf32>
    %c0_49 = arith.constant 0 : index
    %c0_50 = arith.constant 0 : index
    %170 = vector.load %arg16[%c0_49, %c0_50] : memref<2x2048xf32, #tpu.memory_space<vmem>>, vector<1x2048xf32>
    %c0_51 = arith.constant 0 : index
    %c0_52 = arith.constant 0 : index
    %171 = vector.load %arg5[%c0_51, %c0_52] : memref<32x2048xbf16, #tpu.memory_space<vmem>>, vector<32x2048xbf16>
    %172 = arith.truncf %169 : vector<16x32xf32> to vector<16x32xbf16>
    %cst_53 = arith.constant dense<0.000000e+00> : vector<16x2048xf32>
    %173 = tpu.matmul %172, %171, %cst_53 {dimension_numbers = #tpu.dot_dimension_numbers<[1], [0], [0], [1], [0, 0, 1, 1], [], []>} : vector<16x32xbf16>, vector<32x2048xbf16>, vector<16x2048xf32> -> vector<16x2048xf32>
    %174 = vector.broadcast %170 : vector<1x2048xf32> to vector<16x2048xf32>
    %175 = arith.addf %173, %174 : vector<16x2048xf32>
    %cst_54 = arith.constant 0.000000e+00 : f32
    %176 = vector.broadcast %cst_54 : f32 to vector<16x2048xf32>
    %177 = arith.maximumf %175, %176 : vector<16x2048xf32>
    %c0_55 = arith.constant 0 : index
    %c0_56 = arith.constant 0 : index
    %178 = vector.load %arg6[%c0_55, %c0_56] : memref<2048x32xbf16, #tpu.memory_space<vmem>>, vector<2048x32xbf16>
    %179 = arith.truncf %177 : vector<16x2048xf32> to vector<16x2048xbf16>
    %cst_57 = arith.constant dense<0.000000e+00> : vector<16x32xf32>
    %180 = tpu.matmul %179, %178, %cst_57 {dimension_numbers = #tpu.dot_dimension_numbers<[1], [0], [0], [1], [0, 0, 1, 1], [], []>} : vector<16x2048xbf16>, vector<2048x32xbf16>, vector<16x32xf32> -> vector<16x32xf32>
    %c3 = arith.constant 3 : index
    %c0_58 = arith.constant 0 : index
    %181 = vector.load %arg15[%c3, %c0_58] : memref<16x32xf32, #tpu.memory_space<vmem>>, vector<1x32xf32>
    %182 = vector.broadcast %181 : vector<1x32xf32> to vector<16x32xf32>
    %183 = arith.addf %180, %182 : vector<16x32xf32>
    %184 = arith.addf %169, %183 : vector<16x32xf32>
    %cst_59 = arith.constant dense<0.000000e+00> : vector<16xf32>
    %185 = vector.multi_reduction <add>, %184, %cst_59 [1] : vector<16x32xf32> to vector<16xf32>
    %186 = vector.shape_cast %185 : vector<16xf32> to vector<16x1xf32>
    %cst_60 = arith.constant 3.200000e+01 : f32
    %187 = vector.broadcast %cst_60 : f32 to vector<16x1xf32>
    %188 = arith.divf %186, %187 : vector<16x1xf32>
    %189 = vector.broadcast %188 : vector<16x1xf32> to vector<16x32xf32>
    %190 = arith.subf %184, %189 : vector<16x32xf32>
    %191 = arith.mulf %190, %190 : vector<16x32xf32>
    %cst_61 = arith.constant dense<0.000000e+00> : vector<16xf32>
    %192 = vector.multi_reduction <add>, %191, %cst_61 [1] : vector<16x32xf32> to vector<16xf32>
    %193 = vector.shape_cast %192 : vector<16xf32> to vector<16x1xf32>
    %cst_62 = arith.constant 3.200000e+01 : f32
    %194 = vector.broadcast %cst_62 : f32 to vector<16x1xf32>
    %195 = arith.divf %193, %194 : vector<16x1xf32>
    %196 = vector.broadcast %188 : vector<16x1xf32> to vector<16x32xf32>
    %197 = arith.subf %184, %196 : vector<16x32xf32>
    %cst_63 = arith.constant 9.99999974E-6 : f32
    %198 = vector.broadcast %cst_63 : f32 to vector<16x1xf32>
    %199 = arith.addf %195, %198 : vector<16x1xf32>
    %200 = math.rsqrt %199 : vector<16x1xf32>
    %201 = vector.broadcast %200 : vector<16x1xf32> to vector<16x32xf32>
    %202 = arith.mulf %197, %201 : vector<16x32xf32>
    %c4 = arith.constant 4 : index
    %c0_64 = arith.constant 0 : index
    %203 = vector.load %arg15[%c4, %c0_64] : memref<16x32xf32, #tpu.memory_space<vmem>>, vector<1x32xf32>
    %204 = vector.broadcast %203 : vector<1x32xf32> to vector<16x32xf32>
    %205 = arith.mulf %202, %204 : vector<16x32xf32>
    %c5 = arith.constant 5 : index
    %c0_65 = arith.constant 0 : index
    %206 = vector.load %arg15[%c5, %c0_65] : memref<16x32xf32, #tpu.memory_space<vmem>>, vector<1x32xf32>
    %207 = vector.broadcast %206 : vector<1x32xf32> to vector<16x32xf32>
    %208 = arith.addf %205, %207 : vector<16x32xf32>
    %c0_66 = arith.constant 0 : index
    %c0_67 = arith.constant 0 : index
    %209 = vector.load %arg2[%c0_66, %c0_67] : memref<16x32xf32, #tpu.memory_space<vmem>>, vector<16x32xf32>
    %c1_68 = arith.constant 1 : index
    %c0_69 = arith.constant 0 : index
    %210 = vector.load %arg17[%c1_68, %c0_69] : memref<2x128xf32, #tpu.memory_space<vmem>>, vector<1x128xf32>
    %c0_70 = arith.constant 0 : index
    %c0_71 = arith.constant 0 : index
    %211 = vector.load %arg7[%c0_70, %c0_71] : memref<32x128xbf16, #tpu.memory_space<vmem>>, vector<32x128xbf16>
    %212 = arith.truncf %209 : vector<16x32xf32> to vector<16x32xbf16>
    %cst_72 = arith.constant dense<0.000000e+00> : vector<16x128xf32>
    %213 = tpu.matmul %212, %211, %cst_72 {dimension_numbers = #tpu.dot_dimension_numbers<[1], [0], [0], [1], [0, 0, 1, 1], [], []>} : vector<16x32xbf16>, vector<32x128xbf16>, vector<16x128xf32> -> vector<16x128xf32>
    %214 = vector.broadcast %210 : vector<1x128xf32> to vector<16x128xf32>
    %215 = arith.addf %213, %214 : vector<16x128xf32>
    %216 = vector.extract_strided_slice %215 {offsets = [0, 0], sizes = [16, 32], strides = [1, 1]} : vector<16x128xf32> to vector<16x32xf32>
    %217 = vector.extract_strided_slice %215 {offsets = [0, 32], sizes = [16, 32], strides = [1, 1]} : vector<16x128xf32> to vector<16x32xf32>
    %218 = vector.extract_strided_slice %215 {offsets = [0, 64], sizes = [16, 32], strides = [1, 1]} : vector<16x128xf32> to vector<16x32xf32>
    %219 = vector.extract_strided_slice %216 {offsets = [0, 0], sizes = [8, 32], strides = [1, 1]} : vector<16x32xf32> to vector<8x32xf32>
    %220 = vector.extract_strided_slice %217 {offsets = [0, 0], sizes = [8, 32], strides = [1, 1]} : vector<16x32xf32> to vector<8x32xf32>
    %221 = vector.extract_strided_slice %218 {offsets = [0, 0], sizes = [8, 32], strides = [1, 1]} : vector<16x32xf32> to vector<8x32xf32>
    %222 = vector.extract_strided_slice %219 {offsets = [0, 0], sizes = [8, 8], strides = [1, 1]} : vector<8x32xf32> to vector<8x8xf32>
    %223 = vector.extract_strided_slice %220 {offsets = [0, 0], sizes = [8, 8], strides = [1, 1]} : vector<8x32xf32> to vector<8x8xf32>
    %cst_73 = arith.constant dense<0.000000e+00> : vector<8x8xf32>
    %224 = tpu.matmul %222, %223, %cst_73 {dimension_numbers = #tpu.dot_dimension_numbers<[1], [1], [0], [0], [0, 0, 1, 0], [], []>} : vector<8x8xf32>, vector<8x8xf32>, vector<8x8xf32> -> vector<8x8xf32>
    %cst_74 = arith.constant dense<0xFF800000> : vector<8xf32>
    %225 = vector.multi_reduction <maximumf>, %224, %cst_74 [1] : vector<8x8xf32> to vector<8xf32>
    %226 = vector.shape_cast %225 : vector<8xf32> to vector<8x1xf32>
    %227 = vector.broadcast %226 : vector<8x1xf32> to vector<8x8xf32>
    %228 = arith.subf %224, %227 : vector<8x8xf32>
    %229 = math.exp %228 : vector<8x8xf32>
    %cst_75 = arith.constant dense<0.000000e+00> : vector<8xf32>
    %230 = vector.multi_reduction <add>, %229, %cst_75 [1] : vector<8x8xf32> to vector<8xf32>
    %231 = vector.shape_cast %230 : vector<8xf32> to vector<8x1xf32>
    %232 = tpu.reciprocal %231 {approx = true} : vector<8x1xf32> -> vector<8x1xf32>
    %233 = vector.broadcast %232 : vector<8x1xf32> to vector<8x8xf32>
    %234 = arith.mulf %229, %233 : vector<8x8xf32>
    %235 = vector.extract_strided_slice %221 {offsets = [0, 0], sizes = [8, 8], strides = [1, 1]} : vector<8x32xf32> to vector<8x8xf32>
    %cst_76 = arith.constant dense<0.000000e+00> : vector<8x8xf32>
    %236 = tpu.matmul %234, %235, %cst_76 {dimension_numbers = #tpu.dot_dimension_numbers<[1], [0], [0], [1], [0, 0, 1, 1], [], []>} : vector<8x8xf32>, vector<8x8xf32>, vector<8x8xf32> -> vector<8x8xf32>
    %237 = vector.extract_strided_slice %219 {offsets = [0, 8], sizes = [8, 8], strides = [1, 1]} : vector<8x32xf32> to vector<8x8xf32>
    %238 = vector.extract_strided_slice %220 {offsets = [0, 8], sizes = [8, 8], strides = [1, 1]} : vector<8x32xf32> to vector<8x8xf32>
    %cst_77 = arith.constant dense<0.000000e+00> : vector<8x8xf32>
    %239 = tpu.matmul %237, %238, %cst_77 {dimension_numbers = #tpu.dot_dimension_numbers<[1], [1], [0], [0], [0, 0, 1, 0], [], []>} : vector<8x8xf32>, vector<8x8xf32>, vector<8x8xf32> -> vector<8x8xf32>
    %cst_78 = arith.constant dense<0xFF800000> : vector<8xf32>
    %240 = vector.multi_reduction <maximumf>, %239, %cst_78 [1] : vector<8x8xf32> to vector<8xf32>
    %241 = vector.shape_cast %240 : vector<8xf32> to vector<8x1xf32>
    %242 = vector.broadcast %241 : vector<8x1xf32> to vector<8x8xf32>
    %243 = arith.subf %239, %242 : vector<8x8xf32>
    %244 = math.exp %243 : vector<8x8xf32>
    %cst_79 = arith.constant dense<0.000000e+00> : vector<8xf32>
    %245 = vector.multi_reduction <add>, %244, %cst_79 [1] : vector<8x8xf32> to vector<8xf32>
    %246 = vector.shape_cast %245 : vector<8xf32> to vector<8x1xf32>
    %247 = tpu.reciprocal %246 {approx = true} : vector<8x1xf32> -> vector<8x1xf32>
    %248 = vector.broadcast %247 : vector<8x1xf32> to vector<8x8xf32>
    %249 = arith.mulf %244, %248 : vector<8x8xf32>
    %250 = vector.extract_strided_slice %221 {offsets = [0, 8], sizes = [8, 8], strides = [1, 1]} : vector<8x32xf32> to vector<8x8xf32>
    %cst_80 = arith.constant dense<0.000000e+00> : vector<8x8xf32>
    %251 = tpu.matmul %249, %250, %cst_80 {dimension_numbers = #tpu.dot_dimension_numbers<[1], [0], [0], [1], [0, 0, 1, 1], [], []>} : vector<8x8xf32>, vector<8x8xf32>, vector<8x8xf32> -> vector<8x8xf32>
    %252 = vector.extract_strided_slice %219 {offsets = [0, 16], sizes = [8, 8], strides = [1, 1]} : vector<8x32xf32> to vector<8x8xf32>
    %253 = vector.extract_strided_slice %220 {offsets = [0, 16], sizes = [8, 8], strides = [1, 1]} : vector<8x32xf32> to vector<8x8xf32>
    %cst_81 = arith.constant dense<0.000000e+00> : vector<8x8xf32>
    %254 = tpu.matmul %252, %253, %cst_81 {dimension_numbers = #tpu.dot_dimension_numbers<[1], [1], [0], [0], [0, 0, 1, 0], [], []>} : vector<8x8xf32>, vector<8x8xf32>, vector<8x8xf32> -> vector<8x8xf32>
    %cst_82 = arith.constant dense<0xFF800000> : vector<8xf32>
    %255 = vector.multi_reduction <maximumf>, %254, %cst_82 [1] : vector<8x8xf32> to vector<8xf32>
    %256 = vector.shape_cast %255 : vector<8xf32> to vector<8x1xf32>
    %257 = vector.broadcast %256 : vector<8x1xf32> to vector<8x8xf32>
    %258 = arith.subf %254, %257 : vector<8x8xf32>
    %259 = math.exp %258 : vector<8x8xf32>
    %cst_83 = arith.constant dense<0.000000e+00> : vector<8xf32>
    %260 = vector.multi_reduction <add>, %259, %cst_83 [1] : vector<8x8xf32> to vector<8xf32>
    %261 = vector.shape_cast %260 : vector<8xf32> to vector<8x1xf32>
    %262 = tpu.reciprocal %261 {approx = true} : vector<8x1xf32> -> vector<8x1xf32>
    %263 = vector.broadcast %262 : vector<8x1xf32> to vector<8x8xf32>
    %264 = arith.mulf %259, %263 : vector<8x8xf32>
    %265 = vector.extract_strided_slice %221 {offsets = [0, 16], sizes = [8, 8], strides = [1, 1]} : vector<8x32xf32> to vector<8x8xf32>
    %cst_84 = arith.constant dense<0.000000e+00> : vector<8x8xf32>
    %266 = tpu.matmul %264, %265, %cst_84 {dimension_numbers = #tpu.dot_dimension_numbers<[1], [0], [0], [1], [0, 0, 1, 1], [], []>} : vector<8x8xf32>, vector<8x8xf32>, vector<8x8xf32> -> vector<8x8xf32>
    %267 = vector.extract_strided_slice %219 {offsets = [0, 24], sizes = [8, 8], strides = [1, 1]} : vector<8x32xf32> to vector<8x8xf32>
    %268 = vector.extract_strided_slice %220 {offsets = [0, 24], sizes = [8, 8], strides = [1, 1]} : vector<8x32xf32> to vector<8x8xf32>
    %cst_85 = arith.constant dense<0.000000e+00> : vector<8x8xf32>
    %269 = tpu.matmul %267, %268, %cst_85 {dimension_numbers = #tpu.dot_dimension_numbers<[1], [1], [0], [0], [0, 0, 1, 0], [], []>} : vector<8x8xf32>, vector<8x8xf32>, vector<8x8xf32> -> vector<8x8xf32>
    %cst_86 = arith.constant dense<0xFF800000> : vector<8xf32>
    %270 = vector.multi_reduction <maximumf>, %269, %cst_86 [1] : vector<8x8xf32> to vector<8xf32>
    %271 = vector.shape_cast %270 : vector<8xf32> to vector<8x1xf32>
    %272 = vector.broadcast %271 : vector<8x1xf32> to vector<8x8xf32>
    %273 = arith.subf %269, %272 : vector<8x8xf32>
    %274 = math.exp %273 : vector<8x8xf32>
    %cst_87 = arith.constant dense<0.000000e+00> : vector<8xf32>
    %275 = vector.multi_reduction <add>, %274, %cst_87 [1] : vector<8x8xf32> to vector<8xf32>
    %276 = vector.shape_cast %275 : vector<8xf32> to vector<8x1xf32>
    %277 = tpu.reciprocal %276 {approx = true} : vector<8x1xf32> -> vector<8x1xf32>
    %278 = vector.broadcast %277 : vector<8x1xf32> to vector<8x8xf32>
    %279 = arith.mulf %274, %278 : vector<8x8xf32>
    %280 = vector.extract_strided_slice %221 {offsets = [0, 24], sizes = [8, 8], strides = [1, 1]} : vector<8x32xf32> to vector<8x8xf32>
    %cst_88 = arith.constant dense<0.000000e+00> : vector<8x8xf32>
    %281 = tpu.matmul %279, %280, %cst_88 {dimension_numbers = #tpu.dot_dimension_numbers<[1], [0], [0], [1], [0, 0, 1, 1], [], []>} : vector<8x8xf32>, vector<8x8xf32>, vector<8x8xf32> -> vector<8x8xf32>
    %282 = tpu.concatenate %236, %251, %266, %281 in 1 : vector<8x8xf32>, vector<8x8xf32>, vector<8x8xf32>, vector<8x8xf32> -> vector<8x32xf32>
    %283 = vector.extract_strided_slice %216 {offsets = [8, 0], sizes = [8, 32], strides = [1, 1]} : vector<16x32xf32> to vector<8x32xf32>
    %284 = vector.extract_strided_slice %217 {offsets = [8, 0], sizes = [8, 32], strides = [1, 1]} : vector<16x32xf32> to vector<8x32xf32>
    %285 = vector.extract_strided_slice %218 {offsets = [8, 0], sizes = [8, 32], strides = [1, 1]} : vector<16x32xf32> to vector<8x32xf32>
    %286 = vector.extract_strided_slice %283 {offsets = [0, 0], sizes = [8, 8], strides = [1, 1]} : vector<8x32xf32> to vector<8x8xf32>
    %287 = vector.extract_strided_slice %284 {offsets = [0, 0], sizes = [8, 8], strides = [1, 1]} : vector<8x32xf32> to vector<8x8xf32>
    %cst_89 = arith.constant dense<0.000000e+00> : vector<8x8xf32>
    %288 = tpu.matmul %286, %287, %cst_89 {dimension_numbers = #tpu.dot_dimension_numbers<[1], [1], [0], [0], [0, 0, 1, 0], [], []>} : vector<8x8xf32>, vector<8x8xf32>, vector<8x8xf32> -> vector<8x8xf32>
    %cst_90 = arith.constant dense<0xFF800000> : vector<8xf32>
    %289 = vector.multi_reduction <maximumf>, %288, %cst_90 [1] : vector<8x8xf32> to vector<8xf32>
    %290 = vector.shape_cast %289 : vector<8xf32> to vector<8x1xf32>
    %291 = vector.broadcast %290 : vector<8x1xf32> to vector<8x8xf32>
    %292 = arith.subf %288, %291 : vector<8x8xf32>
    %293 = math.exp %292 : vector<8x8xf32>
    %cst_91 = arith.constant dense<0.000000e+00> : vector<8xf32>
    %294 = vector.multi_reduction <add>, %293, %cst_91 [1] : vector<8x8xf32> to vector<8xf32>
    %295 = vector.shape_cast %294 : vector<8xf32> to vector<8x1xf32>
    %296 = tpu.reciprocal %295 {approx = true} : vector<8x1xf32> -> vector<8x1xf32>
    %297 = vector.broadcast %296 : vector<8x1xf32> to vector<8x8xf32>
    %298 = arith.mulf %293, %297 : vector<8x8xf32>
    %299 = vector.extract_strided_slice %285 {offsets = [0, 0], sizes = [8, 8], strides = [1, 1]} : vector<8x32xf32> to vector<8x8xf32>
    %cst_92 = arith.constant dense<0.000000e+00> : vector<8x8xf32>
    %300 = tpu.matmul %298, %299, %cst_92 {dimension_numbers = #tpu.dot_dimension_numbers<[1], [0], [0], [1], [0, 0, 1, 1], [], []>} : vector<8x8xf32>, vector<8x8xf32>, vector<8x8xf32> -> vector<8x8xf32>
    %301 = vector.extract_strided_slice %283 {offsets = [0, 8], sizes = [8, 8], strides = [1, 1]} : vector<8x32xf32> to vector<8x8xf32>
    %302 = vector.extract_strided_slice %284 {offsets = [0, 8], sizes = [8, 8], strides = [1, 1]} : vector<8x32xf32> to vector<8x8xf32>
    %cst_93 = arith.constant dense<0.000000e+00> : vector<8x8xf32>
    %303 = tpu.matmul %301, %302, %cst_93 {dimension_numbers = #tpu.dot_dimension_numbers<[1], [1], [0], [0], [0, 0, 1, 0], [], []>} : vector<8x8xf32>, vector<8x8xf32>, vector<8x8xf32> -> vector<8x8xf32>
    %cst_94 = arith.constant dense<0xFF800000> : vector<8xf32>
    %304 = vector.multi_reduction <maximumf>, %303, %cst_94 [1] : vector<8x8xf32> to vector<8xf32>
    %305 = vector.shape_cast %304 : vector<8xf32> to vector<8x1xf32>
    %306 = vector.broadcast %305 : vector<8x1xf32> to vector<8x8xf32>
    %307 = arith.subf %303, %306 : vector<8x8xf32>
    %308 = math.exp %307 : vector<8x8xf32>
    %cst_95 = arith.constant dense<0.000000e+00> : vector<8xf32>
    %309 = vector.multi_reduction <add>, %308, %cst_95 [1] : vector<8x8xf32> to vector<8xf32>
    %310 = vector.shape_cast %309 : vector<8xf32> to vector<8x1xf32>
    %311 = tpu.reciprocal %310 {approx = true} : vector<8x1xf32> -> vector<8x1xf32>
    %312 = vector.broadcast %311 : vector<8x1xf32> to vector<8x8xf32>
    %313 = arith.mulf %308, %312 : vector<8x8xf32>
    %314 = vector.extract_strided_slice %285 {offsets = [0, 8], sizes = [8, 8], strides = [1, 1]} : vector<8x32xf32> to vector<8x8xf32>
    %cst_96 = arith.constant dense<0.000000e+00> : vector<8x8xf32>
    %315 = tpu.matmul %313, %314, %cst_96 {dimension_numbers = #tpu.dot_dimension_numbers<[1], [0], [0], [1], [0, 0, 1, 1], [], []>} : vector<8x8xf32>, vector<8x8xf32>, vector<8x8xf32> -> vector<8x8xf32>
    %316 = vector.extract_strided_slice %283 {offsets = [0, 16], sizes = [8, 8], strides = [1, 1]} : vector<8x32xf32> to vector<8x8xf32>
    %317 = vector.extract_strided_slice %284 {offsets = [0, 16], sizes = [8, 8], strides = [1, 1]} : vector<8x32xf32> to vector<8x8xf32>
    %cst_97 = arith.constant dense<0.000000e+00> : vector<8x8xf32>
    %318 = tpu.matmul %316, %317, %cst_97 {dimension_numbers = #tpu.dot_dimension_numbers<[1], [1], [0], [0], [0, 0, 1, 0], [], []>} : vector<8x8xf32>, vector<8x8xf32>, vector<8x8xf32> -> vector<8x8xf32>
    %cst_98 = arith.constant dense<0xFF800000> : vector<8xf32>
    %319 = vector.multi_reduction <maximumf>, %318, %cst_98 [1] : vector<8x8xf32> to vector<8xf32>
    %320 = vector.shape_cast %319 : vector<8xf32> to vector<8x1xf32>
    %321 = vector.broadcast %320 : vector<8x1xf32> to vector<8x8xf32>
    %322 = arith.subf %318, %321 : vector<8x8xf32>
    %323 = math.exp %322 : vector<8x8xf32>
    %cst_99 = arith.constant dense<0.000000e+00> : vector<8xf32>
    %324 = vector.multi_reduction <add>, %323, %cst_99 [1] : vector<8x8xf32> to vector<8xf32>
    %325 = vector.shape_cast %324 : vector<8xf32> to vector<8x1xf32>
    %326 = tpu.reciprocal %325 {approx = true} : vector<8x1xf32> -> vector<8x1xf32>
    %327 = vector.broadcast %326 : vector<8x1xf32> to vector<8x8xf32>
    %328 = arith.mulf %323, %327 : vector<8x8xf32>
    %329 = vector.extract_strided_slice %285 {offsets = [0, 16], sizes = [8, 8], strides = [1, 1]} : vector<8x32xf32> to vector<8x8xf32>
    %cst_100 = arith.constant dense<0.000000e+00> : vector<8x8xf32>
    %330 = tpu.matmul %328, %329, %cst_100 {dimension_numbers = #tpu.dot_dimension_numbers<[1], [0], [0], [1], [0, 0, 1, 1], [], []>} : vector<8x8xf32>, vector<8x8xf32>, vector<8x8xf32> -> vector<8x8xf32>
    %331 = vector.extract_strided_slice %283 {offsets = [0, 24], sizes = [8, 8], strides = [1, 1]} : vector<8x32xf32> to vector<8x8xf32>
    %332 = vector.extract_strided_slice %284 {offsets = [0, 24], sizes = [8, 8], strides = [1, 1]} : vector<8x32xf32> to vector<8x8xf32>
    %cst_101 = arith.constant dense<0.000000e+00> : vector<8x8xf32>
    %333 = tpu.matmul %331, %332, %cst_101 {dimension_numbers = #tpu.dot_dimension_numbers<[1], [1], [0], [0], [0, 0, 1, 0], [], []>} : vector<8x8xf32>, vector<8x8xf32>, vector<8x8xf32> -> vector<8x8xf32>
    %cst_102 = arith.constant dense<0xFF800000> : vector<8xf32>
    %334 = vector.multi_reduction <maximumf>, %333, %cst_102 [1] : vector<8x8xf32> to vector<8xf32>
    %335 = vector.shape_cast %334 : vector<8xf32> to vector<8x1xf32>
    %336 = vector.broadcast %335 : vector<8x1xf32> to vector<8x8xf32>
    %337 = arith.subf %333, %336 : vector<8x8xf32>
    %338 = math.exp %337 : vector<8x8xf32>
    %cst_103 = arith.constant dense<0.000000e+00> : vector<8xf32>
    %339 = vector.multi_reduction <add>, %338, %cst_103 [1] : vector<8x8xf32> to vector<8xf32>
    %340 = vector.shape_cast %339 : vector<8xf32> to vector<8x1xf32>
    %341 = tpu.reciprocal %340 {approx = true} : vector<8x1xf32> -> vector<8x1xf32>
    %342 = vector.broadcast %341 : vector<8x1xf32> to vector<8x8xf32>
    %343 = arith.mulf %338, %342 : vector<8x8xf32>
    %344 = vector.extract_strided_slice %285 {offsets = [0, 24], sizes = [8, 8], strides = [1, 1]} : vector<8x32xf32> to vector<8x8xf32>
    %cst_104 = arith.constant dense<0.000000e+00> : vector<8x8xf32>
    %345 = tpu.matmul %343, %344, %cst_104 {dimension_numbers = #tpu.dot_dimension_numbers<[1], [0], [0], [1], [0, 0, 1, 1], [], []>} : vector<8x8xf32>, vector<8x8xf32>, vector<8x8xf32> -> vector<8x8xf32>
    %346 = tpu.concatenate %300, %315, %330, %345 in 1 : vector<8x8xf32>, vector<8x8xf32>, vector<8x8xf32>, vector<8x8xf32> -> vector<8x32xf32>
    %347 = tpu.concatenate %282, %346 in 0 : vector<8x32xf32>, vector<8x32xf32> -> vector<16x32xf32>
    %c0_105 = arith.constant 0 : index
    %c0_106 = arith.constant 0 : index
    %348 = vector.load %arg8[%c0_105, %c0_106] : memref<32x32xbf16, #tpu.memory_space<vmem>>, vector<32x32xbf16>
    %349 = arith.truncf %347 : vector<16x32xf32> to vector<16x32xbf16>
    %cst_107 = arith.constant dense<0.000000e+00> : vector<16x32xf32>
    %350 = tpu.matmul %349, %348, %cst_107 {dimension_numbers = #tpu.dot_dimension_numbers<[1], [0], [0], [1], [0, 0, 1, 1], [], []>} : vector<16x32xbf16>, vector<32x32xbf16>, vector<16x32xf32> -> vector<16x32xf32>
    %c6 = arith.constant 6 : index
    %c0_108 = arith.constant 0 : index
    %351 = vector.load %arg15[%c6, %c0_108] : memref<16x32xf32, #tpu.memory_space<vmem>>, vector<1x32xf32>
    %352 = vector.broadcast %351 : vector<1x32xf32> to vector<16x32xf32>
    %353 = arith.addf %350, %352 : vector<16x32xf32>
    %354 = arith.addf %209, %353 : vector<16x32xf32>
    %cst_109 = arith.constant dense<0.000000e+00> : vector<16xf32>
    %355 = vector.multi_reduction <add>, %354, %cst_109 [1] : vector<16x32xf32> to vector<16xf32>
    %356 = vector.shape_cast %355 : vector<16xf32> to vector<16x1xf32>
    %cst_110 = arith.constant 3.200000e+01 : f32
    %357 = vector.broadcast %cst_110 : f32 to vector<16x1xf32>
    %358 = arith.divf %356, %357 : vector<16x1xf32>
    %359 = vector.broadcast %358 : vector<16x1xf32> to vector<16x32xf32>
    %360 = arith.subf %354, %359 : vector<16x32xf32>
    %361 = arith.mulf %360, %360 : vector<16x32xf32>
    %cst_111 = arith.constant dense<0.000000e+00> : vector<16xf32>
    %362 = vector.multi_reduction <add>, %361, %cst_111 [1] : vector<16x32xf32> to vector<16xf32>
    %363 = vector.shape_cast %362 : vector<16xf32> to vector<16x1xf32>
    %cst_112 = arith.constant 3.200000e+01 : f32
    %364 = vector.broadcast %cst_112 : f32 to vector<16x1xf32>
    %365 = arith.divf %363, %364 : vector<16x1xf32>
    %366 = vector.broadcast %358 : vector<16x1xf32> to vector<16x32xf32>
    %367 = arith.subf %354, %366 : vector<16x32xf32>
    %cst_113 = arith.constant 9.99999974E-6 : f32
    %368 = vector.broadcast %cst_113 : f32 to vector<16x1xf32>
    %369 = arith.addf %365, %368 : vector<16x1xf32>
    %370 = math.rsqrt %369 : vector<16x1xf32>
    %371 = vector.broadcast %370 : vector<16x1xf32> to vector<16x32xf32>
    %372 = arith.mulf %367, %371 : vector<16x32xf32>
    %c7 = arith.constant 7 : index
    %c0_114 = arith.constant 0 : index
    %373 = vector.load %arg15[%c7, %c0_114] : memref<16x32xf32, #tpu.memory_space<vmem>>, vector<1x32xf32>
    %374 = vector.broadcast %373 : vector<1x32xf32> to vector<16x32xf32>
    %375 = arith.mulf %372, %374 : vector<16x32xf32>
    %c8 = arith.constant 8 : index
    %c0_115 = arith.constant 0 : index
    %376 = vector.load %arg15[%c8, %c0_115] : memref<16x32xf32, #tpu.memory_space<vmem>>, vector<1x32xf32>
    %377 = vector.broadcast %376 : vector<1x32xf32> to vector<16x32xf32>
    %378 = arith.addf %375, %377 : vector<16x32xf32>
    %c0_116 = arith.constant 0 : index
    %c0_117 = arith.constant 0 : index
    %379 = vector.load %arg9[%c0_116, %c0_117] : memref<32x32xbf16, #tpu.memory_space<vmem>>, vector<32x32xbf16>
    %380 = arith.truncf %378 : vector<16x32xf32> to vector<16x32xbf16>
    %cst_118 = arith.constant dense<0.000000e+00> : vector<16x32xf32>
    %381 = tpu.matmul %380, %379, %cst_118 {dimension_numbers = #tpu.dot_dimension_numbers<[1], [0], [0], [1], [0, 0, 1, 1], [], []>} : vector<16x32xbf16>, vector<32x32xbf16>, vector<16x32xf32> -> vector<16x32xf32>
    %c9 = arith.constant 9 : index
    %c0_119 = arith.constant 0 : index
    %382 = vector.load %arg15[%c9, %c0_119] : memref<16x32xf32, #tpu.memory_space<vmem>>, vector<1x32xf32>
    %383 = vector.broadcast %382 : vector<1x32xf32> to vector<16x32xf32>
    %384 = arith.addf %381, %383 : vector<16x32xf32>
    %c0_120 = arith.constant 0 : index
    %c0_121 = arith.constant 0 : index
    %385 = vector.load %arg10[%c0_120, %c0_121] : memref<32x128xbf16, #tpu.memory_space<vmem>>, vector<32x128xbf16>
    %386 = arith.truncf %208 : vector<16x32xf32> to vector<16x32xbf16>
    %cst_122 = arith.constant dense<0.000000e+00> : vector<16x128xf32>
    %387 = tpu.matmul %386, %385, %cst_122 {dimension_numbers = #tpu.dot_dimension_numbers<[1], [0], [0], [1], [0, 0, 1, 1], [], []>} : vector<16x32xbf16>, vector<32x128xbf16>, vector<16x128xf32> -> vector<16x128xf32>
    %c0_123 = arith.constant 0 : index
    %c0_124 = arith.constant 0 : index
    %388 = vector.load %arg18[%c0_123, %c0_124] : memref<1x128xf32, #tpu.memory_space<vmem>>, vector<1x128xf32>
    %389 = vector.broadcast %388 : vector<1x128xf32> to vector<16x128xf32>
    %390 = arith.addf %387, %389 : vector<16x128xf32>
    %391 = vector.extract_strided_slice %390 {offsets = [0, 0], sizes = [16, 32], strides = [1, 1]} : vector<16x128xf32> to vector<16x32xf32>
    %392 = vector.extract_strided_slice %390 {offsets = [0, 32], sizes = [16, 32], strides = [1, 1]} : vector<16x128xf32> to vector<16x32xf32>
    %393 = vector.extract_strided_slice %384 {offsets = [0, 0], sizes = [8, 32], strides = [1, 1]} : vector<16x32xf32> to vector<8x32xf32>
    %394 = vector.extract_strided_slice %391 {offsets = [0, 0], sizes = [8, 32], strides = [1, 1]} : vector<16x32xf32> to vector<8x32xf32>
    %395 = vector.extract_strided_slice %392 {offsets = [0, 0], sizes = [8, 32], strides = [1, 1]} : vector<16x32xf32> to vector<8x32xf32>
    %396 = vector.extract_strided_slice %393 {offsets = [0, 0], sizes = [8, 8], strides = [1, 1]} : vector<8x32xf32> to vector<8x8xf32>
    %397 = vector.extract_strided_slice %394 {offsets = [0, 0], sizes = [8, 8], strides = [1, 1]} : vector<8x32xf32> to vector<8x8xf32>
    %cst_125 = arith.constant dense<0.000000e+00> : vector<8x8xf32>
    %398 = tpu.matmul %396, %397, %cst_125 {dimension_numbers = #tpu.dot_dimension_numbers<[1], [1], [0], [0], [0, 0, 1, 0], [], []>} : vector<8x8xf32>, vector<8x8xf32>, vector<8x8xf32> -> vector<8x8xf32>
    %cst_126 = arith.constant dense<0xFF800000> : vector<8xf32>
    %399 = vector.multi_reduction <maximumf>, %398, %cst_126 [1] : vector<8x8xf32> to vector<8xf32>
    %400 = vector.shape_cast %399 : vector<8xf32> to vector<8x1xf32>
    %401 = vector.broadcast %400 : vector<8x1xf32> to vector<8x8xf32>
    %402 = arith.subf %398, %401 : vector<8x8xf32>
    %403 = math.exp %402 : vector<8x8xf32>
    %cst_127 = arith.constant dense<0.000000e+00> : vector<8xf32>
    %404 = vector.multi_reduction <add>, %403, %cst_127 [1] : vector<8x8xf32> to vector<8xf32>
    %405 = vector.shape_cast %404 : vector<8xf32> to vector<8x1xf32>
    %406 = tpu.reciprocal %405 {approx = true} : vector<8x1xf32> -> vector<8x1xf32>
    %407 = vector.broadcast %406 : vector<8x1xf32> to vector<8x8xf32>
    %408 = arith.mulf %403, %407 : vector<8x8xf32>
    %409 = vector.extract_strided_slice %395 {offsets = [0, 0], sizes = [8, 8], strides = [1, 1]} : vector<8x32xf32> to vector<8x8xf32>
    %cst_128 = arith.constant dense<0.000000e+00> : vector<8x8xf32>
    %410 = tpu.matmul %408, %409, %cst_128 {dimension_numbers = #tpu.dot_dimension_numbers<[1], [0], [0], [1], [0, 0, 1, 1], [], []>} : vector<8x8xf32>, vector<8x8xf32>, vector<8x8xf32> -> vector<8x8xf32>
    %411 = vector.extract_strided_slice %393 {offsets = [0, 8], sizes = [8, 8], strides = [1, 1]} : vector<8x32xf32> to vector<8x8xf32>
    %412 = vector.extract_strided_slice %394 {offsets = [0, 8], sizes = [8, 8], strides = [1, 1]} : vector<8x32xf32> to vector<8x8xf32>
    %cst_129 = arith.constant dense<0.000000e+00> : vector<8x8xf32>
    %413 = tpu.matmul %411, %412, %cst_129 {dimension_numbers = #tpu.dot_dimension_numbers<[1], [1], [0], [0], [0, 0, 1, 0], [], []>} : vector<8x8xf32>, vector<8x8xf32>, vector<8x8xf32> -> vector<8x8xf32>
    %cst_130 = arith.constant dense<0xFF800000> : vector<8xf32>
    %414 = vector.multi_reduction <maximumf>, %413, %cst_130 [1] : vector<8x8xf32> to vector<8xf32>
    %415 = vector.shape_cast %414 : vector<8xf32> to vector<8x1xf32>
    %416 = vector.broadcast %415 : vector<8x1xf32> to vector<8x8xf32>
    %417 = arith.subf %413, %416 : vector<8x8xf32>
    %418 = math.exp %417 : vector<8x8xf32>
    %cst_131 = arith.constant dense<0.000000e+00> : vector<8xf32>
    %419 = vector.multi_reduction <add>, %418, %cst_131 [1] : vector<8x8xf32> to vector<8xf32>
    %420 = vector.shape_cast %419 : vector<8xf32> to vector<8x1xf32>
    %421 = tpu.reciprocal %420 {approx = true} : vector<8x1xf32> -> vector<8x1xf32>
    %422 = vector.broadcast %421 : vector<8x1xf32> to vector<8x8xf32>
    %423 = arith.mulf %418, %422 : vector<8x8xf32>
    %424 = vector.extract_strided_slice %395 {offsets = [0, 8], sizes = [8, 8], strides = [1, 1]} : vector<8x32xf32> to vector<8x8xf32>
    %cst_132 = arith.constant dense<0.000000e+00> : vector<8x8xf32>
    %425 = tpu.matmul %423, %424, %cst_132 {dimension_numbers = #tpu.dot_dimension_numbers<[1], [0], [0], [1], [0, 0, 1, 1], [], []>} : vector<8x8xf32>, vector<8x8xf32>, vector<8x8xf32> -> vector<8x8xf32>
    %426 = vector.extract_strided_slice %393 {offsets = [0, 16], sizes = [8, 8], strides = [1, 1]} : vector<8x32xf32> to vector<8x8xf32>
    %427 = vector.extract_strided_slice %394 {offsets = [0, 16], sizes = [8, 8], strides = [1, 1]} : vector<8x32xf32> to vector<8x8xf32>
    %cst_133 = arith.constant dense<0.000000e+00> : vector<8x8xf32>
    %428 = tpu.matmul %426, %427, %cst_133 {dimension_numbers = #tpu.dot_dimension_numbers<[1], [1], [0], [0], [0, 0, 1, 0], [], []>} : vector<8x8xf32>, vector<8x8xf32>, vector<8x8xf32> -> vector<8x8xf32>
    %cst_134 = arith.constant dense<0xFF800000> : vector<8xf32>
    %429 = vector.multi_reduction <maximumf>, %428, %cst_134 [1] : vector<8x8xf32> to vector<8xf32>
    %430 = vector.shape_cast %429 : vector<8xf32> to vector<8x1xf32>
    %431 = vector.broadcast %430 : vector<8x1xf32> to vector<8x8xf32>
    %432 = arith.subf %428, %431 : vector<8x8xf32>
    %433 = math.exp %432 : vector<8x8xf32>
    %cst_135 = arith.constant dense<0.000000e+00> : vector<8xf32>
    %434 = vector.multi_reduction <add>, %433, %cst_135 [1] : vector<8x8xf32> to vector<8xf32>
    %435 = vector.shape_cast %434 : vector<8xf32> to vector<8x1xf32>
    %436 = tpu.reciprocal %435 {approx = true} : vector<8x1xf32> -> vector<8x1xf32>
    %437 = vector.broadcast %436 : vector<8x1xf32> to vector<8x8xf32>
    %438 = arith.mulf %433, %437 : vector<8x8xf32>
    %439 = vector.extract_strided_slice %395 {offsets = [0, 16], sizes = [8, 8], strides = [1, 1]} : vector<8x32xf32> to vector<8x8xf32>
    %cst_136 = arith.constant dense<0.000000e+00> : vector<8x8xf32>
    %440 = tpu.matmul %438, %439, %cst_136 {dimension_numbers = #tpu.dot_dimension_numbers<[1], [0], [0], [1], [0, 0, 1, 1], [], []>} : vector<8x8xf32>, vector<8x8xf32>, vector<8x8xf32> -> vector<8x8xf32>
    %441 = vector.extract_strided_slice %393 {offsets = [0, 24], sizes = [8, 8], strides = [1, 1]} : vector<8x32xf32> to vector<8x8xf32>
    %442 = vector.extract_strided_slice %394 {offsets = [0, 24], sizes = [8, 8], strides = [1, 1]} : vector<8x32xf32> to vector<8x8xf32>
    %cst_137 = arith.constant dense<0.000000e+00> : vector<8x8xf32>
    %443 = tpu.matmul %441, %442, %cst_137 {dimension_numbers = #tpu.dot_dimension_numbers<[1], [1], [0], [0], [0, 0, 1, 0], [], []>} : vector<8x8xf32>, vector<8x8xf32>, vector<8x8xf32> -> vector<8x8xf32>
    %cst_138 = arith.constant dense<0xFF800000> : vector<8xf32>
    %444 = vector.multi_reduction <maximumf>, %443, %cst_138 [1] : vector<8x8xf32> to vector<8xf32>
    %445 = vector.shape_cast %444 : vector<8xf32> to vector<8x1xf32>
    %446 = vector.broadcast %445 : vector<8x1xf32> to vector<8x8xf32>
    %447 = arith.subf %443, %446 : vector<8x8xf32>
    %448 = math.exp %447 : vector<8x8xf32>
    %cst_139 = arith.constant dense<0.000000e+00> : vector<8xf32>
    %449 = vector.multi_reduction <add>, %448, %cst_139 [1] : vector<8x8xf32> to vector<8xf32>
    %450 = vector.shape_cast %449 : vector<8xf32> to vector<8x1xf32>
    %451 = tpu.reciprocal %450 {approx = true} : vector<8x1xf32> -> vector<8x1xf32>
    %452 = vector.broadcast %451 : vector<8x1xf32> to vector<8x8xf32>
    %453 = arith.mulf %448, %452 : vector<8x8xf32>
    %454 = vector.extract_strided_slice %395 {offsets = [0, 24], sizes = [8, 8], strides = [1, 1]} : vector<8x32xf32> to vector<8x8xf32>
    %cst_140 = arith.constant dense<0.000000e+00> : vector<8x8xf32>
    %455 = tpu.matmul %453, %454, %cst_140 {dimension_numbers = #tpu.dot_dimension_numbers<[1], [0], [0], [1], [0, 0, 1, 1], [], []>} : vector<8x8xf32>, vector<8x8xf32>, vector<8x8xf32> -> vector<8x8xf32>
    %456 = tpu.concatenate %410, %425, %440, %455 in 1 : vector<8x8xf32>, vector<8x8xf32>, vector<8x8xf32>, vector<8x8xf32> -> vector<8x32xf32>
    %457 = vector.extract_strided_slice %384 {offsets = [8, 0], sizes = [8, 32], strides = [1, 1]} : vector<16x32xf32> to vector<8x32xf32>
    %458 = vector.extract_strided_slice %391 {offsets = [8, 0], sizes = [8, 32], strides = [1, 1]} : vector<16x32xf32> to vector<8x32xf32>
    %459 = vector.extract_strided_slice %392 {offsets = [8, 0], sizes = [8, 32], strides = [1, 1]} : vector<16x32xf32> to vector<8x32xf32>
    %460 = vector.extract_strided_slice %457 {offsets = [0, 0], sizes = [8, 8], strides = [1, 1]} : vector<8x32xf32> to vector<8x8xf32>
    %461 = vector.extract_strided_slice %458 {offsets = [0, 0], sizes = [8, 8], strides = [1, 1]} : vector<8x32xf32> to vector<8x8xf32>
    %cst_141 = arith.constant dense<0.000000e+00> : vector<8x8xf32>
    %462 = tpu.matmul %460, %461, %cst_141 {dimension_numbers = #tpu.dot_dimension_numbers<[1], [1], [0], [0], [0, 0, 1, 0], [], []>} : vector<8x8xf32>, vector<8x8xf32>, vector<8x8xf32> -> vector<8x8xf32>
    %cst_142 = arith.constant dense<0xFF800000> : vector<8xf32>
    %463 = vector.multi_reduction <maximumf>, %462, %cst_142 [1] : vector<8x8xf32> to vector<8xf32>
    %464 = vector.shape_cast %463 : vector<8xf32> to vector<8x1xf32>
    %465 = vector.broadcast %464 : vector<8x1xf32> to vector<8x8xf32>
    %466 = arith.subf %462, %465 : vector<8x8xf32>
    %467 = math.exp %466 : vector<8x8xf32>
    %cst_143 = arith.constant dense<0.000000e+00> : vector<8xf32>
    %468 = vector.multi_reduction <add>, %467, %cst_143 [1] : vector<8x8xf32> to vector<8xf32>
    %469 = vector.shape_cast %468 : vector<8xf32> to vector<8x1xf32>
    %470 = tpu.reciprocal %469 {approx = true} : vector<8x1xf32> -> vector<8x1xf32>
    %471 = vector.broadcast %470 : vector<8x1xf32> to vector<8x8xf32>
    %472 = arith.mulf %467, %471 : vector<8x8xf32>
    %473 = vector.extract_strided_slice %459 {offsets = [0, 0], sizes = [8, 8], strides = [1, 1]} : vector<8x32xf32> to vector<8x8xf32>
    %cst_144 = arith.constant dense<0.000000e+00> : vector<8x8xf32>
    %474 = tpu.matmul %472, %473, %cst_144 {dimension_numbers = #tpu.dot_dimension_numbers<[1], [0], [0], [1], [0, 0, 1, 1], [], []>} : vector<8x8xf32>, vector<8x8xf32>, vector<8x8xf32> -> vector<8x8xf32>
    %475 = vector.extract_strided_slice %457 {offsets = [0, 8], sizes = [8, 8], strides = [1, 1]} : vector<8x32xf32> to vector<8x8xf32>
    %476 = vector.extract_strided_slice %458 {offsets = [0, 8], sizes = [8, 8], strides = [1, 1]} : vector<8x32xf32> to vector<8x8xf32>
    %cst_145 = arith.constant dense<0.000000e+00> : vector<8x8xf32>
    %477 = tpu.matmul %475, %476, %cst_145 {dimension_numbers = #tpu.dot_dimension_numbers<[1], [1], [0], [0], [0, 0, 1, 0], [], []>} : vector<8x8xf32>, vector<8x8xf32>, vector<8x8xf32> -> vector<8x8xf32>
    %cst_146 = arith.constant dense<0xFF800000> : vector<8xf32>
    %478 = vector.multi_reduction <maximumf>, %477, %cst_146 [1] : vector<8x8xf32> to vector<8xf32>
    %479 = vector.shape_cast %478 : vector<8xf32> to vector<8x1xf32>
    %480 = vector.broadcast %479 : vector<8x1xf32> to vector<8x8xf32>
    %481 = arith.subf %477, %480 : vector<8x8xf32>
    %482 = math.exp %481 : vector<8x8xf32>
    %cst_147 = arith.constant dense<0.000000e+00> : vector<8xf32>
    %483 = vector.multi_reduction <add>, %482, %cst_147 [1] : vector<8x8xf32> to vector<8xf32>
    %484 = vector.shape_cast %483 : vector<8xf32> to vector<8x1xf32>
    %485 = tpu.reciprocal %484 {approx = true} : vector<8x1xf32> -> vector<8x1xf32>
    %486 = vector.broadcast %485 : vector<8x1xf32> to vector<8x8xf32>
    %487 = arith.mulf %482, %486 : vector<8x8xf32>
    %488 = vector.extract_strided_slice %459 {offsets = [0, 8], sizes = [8, 8], strides = [1, 1]} : vector<8x32xf32> to vector<8x8xf32>
    %cst_148 = arith.constant dense<0.000000e+00> : vector<8x8xf32>
    %489 = tpu.matmul %487, %488, %cst_148 {dimension_numbers = #tpu.dot_dimension_numbers<[1], [0], [0], [1], [0, 0, 1, 1], [], []>} : vector<8x8xf32>, vector<8x8xf32>, vector<8x8xf32> -> vector<8x8xf32>
    %490 = vector.extract_strided_slice %457 {offsets = [0, 16], sizes = [8, 8], strides = [1, 1]} : vector<8x32xf32> to vector<8x8xf32>
    %491 = vector.extract_strided_slice %458 {offsets = [0, 16], sizes = [8, 8], strides = [1, 1]} : vector<8x32xf32> to vector<8x8xf32>
    %cst_149 = arith.constant dense<0.000000e+00> : vector<8x8xf32>
    %492 = tpu.matmul %490, %491, %cst_149 {dimension_numbers = #tpu.dot_dimension_numbers<[1], [1], [0], [0], [0, 0, 1, 0], [], []>} : vector<8x8xf32>, vector<8x8xf32>, vector<8x8xf32> -> vector<8x8xf32>
    %cst_150 = arith.constant dense<0xFF800000> : vector<8xf32>
    %493 = vector.multi_reduction <maximumf>, %492, %cst_150 [1] : vector<8x8xf32> to vector<8xf32>
    %494 = vector.shape_cast %493 : vector<8xf32> to vector<8x1xf32>
    %495 = vector.broadcast %494 : vector<8x1xf32> to vector<8x8xf32>
    %496 = arith.subf %492, %495 : vector<8x8xf32>
    %497 = math.exp %496 : vector<8x8xf32>
    %cst_151 = arith.constant dense<0.000000e+00> : vector<8xf32>
    %498 = vector.multi_reduction <add>, %497, %cst_151 [1] : vector<8x8xf32> to vector<8xf32>
    %499 = vector.shape_cast %498 : vector<8xf32> to vector<8x1xf32>
    %500 = tpu.reciprocal %499 {approx = true} : vector<8x1xf32> -> vector<8x1xf32>
    %501 = vector.broadcast %500 : vector<8x1xf32> to vector<8x8xf32>
    %502 = arith.mulf %497, %501 : vector<8x8xf32>
    %503 = vector.extract_strided_slice %459 {offsets = [0, 16], sizes = [8, 8], strides = [1, 1]} : vector<8x32xf32> to vector<8x8xf32>
    %cst_152 = arith.constant dense<0.000000e+00> : vector<8x8xf32>
    %504 = tpu.matmul %502, %503, %cst_152 {dimension_numbers = #tpu.dot_dimension_numbers<[1], [0], [0], [1], [0, 0, 1, 1], [], []>} : vector<8x8xf32>, vector<8x8xf32>, vector<8x8xf32> -> vector<8x8xf32>
    %505 = vector.extract_strided_slice %457 {offsets = [0, 24], sizes = [8, 8], strides = [1, 1]} : vector<8x32xf32> to vector<8x8xf32>
    %506 = vector.extract_strided_slice %458 {offsets = [0, 24], sizes = [8, 8], strides = [1, 1]} : vector<8x32xf32> to vector<8x8xf32>
    %cst_153 = arith.constant dense<0.000000e+00> : vector<8x8xf32>
    %507 = tpu.matmul %505, %506, %cst_153 {dimension_numbers = #tpu.dot_dimension_numbers<[1], [1], [0], [0], [0, 0, 1, 0], [], []>} : vector<8x8xf32>, vector<8x8xf32>, vector<8x8xf32> -> vector<8x8xf32>
    %cst_154 = arith.constant dense<0xFF800000> : vector<8xf32>
    %508 = vector.multi_reduction <maximumf>, %507, %cst_154 [1] : vector<8x8xf32> to vector<8xf32>
    %509 = vector.shape_cast %508 : vector<8xf32> to vector<8x1xf32>
    %510 = vector.broadcast %509 : vector<8x1xf32> to vector<8x8xf32>
    %511 = arith.subf %507, %510 : vector<8x8xf32>
    %512 = math.exp %511 : vector<8x8xf32>
    %cst_155 = arith.constant dense<0.000000e+00> : vector<8xf32>
    %513 = vector.multi_reduction <add>, %512, %cst_155 [1] : vector<8x8xf32> to vector<8xf32>
    %514 = vector.shape_cast %513 : vector<8xf32> to vector<8x1xf32>
    %515 = tpu.reciprocal %514 {approx = true} : vector<8x1xf32> -> vector<8x1xf32>
    %516 = vector.broadcast %515 : vector<8x1xf32> to vector<8x8xf32>
    %517 = arith.mulf %512, %516 : vector<8x8xf32>
    %518 = vector.extract_strided_slice %459 {offsets = [0, 24], sizes = [8, 8], strides = [1, 1]} : vector<8x32xf32> to vector<8x8xf32>
    %cst_156 = arith.constant dense<0.000000e+00> : vector<8x8xf32>
    %519 = tpu.matmul %517, %518, %cst_156 {dimension_numbers = #tpu.dot_dimension_numbers<[1], [0], [0], [1], [0, 0, 1, 1], [], []>} : vector<8x8xf32>, vector<8x8xf32>, vector<8x8xf32> -> vector<8x8xf32>
    %520 = tpu.concatenate %474, %489, %504, %519 in 1 : vector<8x8xf32>, vector<8x8xf32>, vector<8x8xf32>, vector<8x8xf32> -> vector<8x32xf32>
    %521 = tpu.concatenate %456, %520 in 0 : vector<8x32xf32>, vector<8x32xf32> -> vector<16x32xf32>
    %c0_157 = arith.constant 0 : index
    %c0_158 = arith.constant 0 : index
    %522 = vector.load %arg11[%c0_157, %c0_158] : memref<32x32xbf16, #tpu.memory_space<vmem>>, vector<32x32xbf16>
    %523 = arith.truncf %521 : vector<16x32xf32> to vector<16x32xbf16>
    %cst_159 = arith.constant dense<0.000000e+00> : vector<16x32xf32>
    %524 = tpu.matmul %523, %522, %cst_159 {dimension_numbers = #tpu.dot_dimension_numbers<[1], [0], [0], [1], [0, 0, 1, 1], [], []>} : vector<16x32xbf16>, vector<32x32xbf16>, vector<16x32xf32> -> vector<16x32xf32>
    %c10 = arith.constant 10 : index
    %c0_160 = arith.constant 0 : index
    %525 = vector.load %arg15[%c10, %c0_160] : memref<16x32xf32, #tpu.memory_space<vmem>>, vector<1x32xf32>
    %526 = vector.broadcast %525 : vector<1x32xf32> to vector<16x32xf32>
    %527 = arith.addf %524, %526 : vector<16x32xf32>
    %528 = arith.addf %378, %527 : vector<16x32xf32>
    %cst_161 = arith.constant dense<0.000000e+00> : vector<16xf32>
    %529 = vector.multi_reduction <add>, %528, %cst_161 [1] : vector<16x32xf32> to vector<16xf32>
    %530 = vector.shape_cast %529 : vector<16xf32> to vector<16x1xf32>
    %cst_162 = arith.constant 3.200000e+01 : f32
    %531 = vector.broadcast %cst_162 : f32 to vector<16x1xf32>
    %532 = arith.divf %530, %531 : vector<16x1xf32>
    %533 = vector.broadcast %532 : vector<16x1xf32> to vector<16x32xf32>
    %534 = arith.subf %528, %533 : vector<16x32xf32>
    %535 = arith.mulf %534, %534 : vector<16x32xf32>
    %cst_163 = arith.constant dense<0.000000e+00> : vector<16xf32>
    %536 = vector.multi_reduction <add>, %535, %cst_163 [1] : vector<16x32xf32> to vector<16xf32>
    %537 = vector.shape_cast %536 : vector<16xf32> to vector<16x1xf32>
    %cst_164 = arith.constant 3.200000e+01 : f32
    %538 = vector.broadcast %cst_164 : f32 to vector<16x1xf32>
    %539 = arith.divf %537, %538 : vector<16x1xf32>
    %540 = vector.broadcast %532 : vector<16x1xf32> to vector<16x32xf32>
    %541 = arith.subf %528, %540 : vector<16x32xf32>
    %cst_165 = arith.constant 9.99999974E-6 : f32
    %542 = vector.broadcast %cst_165 : f32 to vector<16x1xf32>
    %543 = arith.addf %539, %542 : vector<16x1xf32>
    %544 = math.rsqrt %543 : vector<16x1xf32>
    %545 = vector.broadcast %544 : vector<16x1xf32> to vector<16x32xf32>
    %546 = arith.mulf %541, %545 : vector<16x32xf32>
    %c11 = arith.constant 11 : index
    %c0_166 = arith.constant 0 : index
    %547 = vector.load %arg15[%c11, %c0_166] : memref<16x32xf32, #tpu.memory_space<vmem>>, vector<1x32xf32>
    %548 = vector.broadcast %547 : vector<1x32xf32> to vector<16x32xf32>
    %549 = arith.mulf %546, %548 : vector<16x32xf32>
    %c12 = arith.constant 12 : index
    %c0_167 = arith.constant 0 : index
    %550 = vector.load %arg15[%c12, %c0_167] : memref<16x32xf32, #tpu.memory_space<vmem>>, vector<1x32xf32>
    %551 = vector.broadcast %550 : vector<1x32xf32> to vector<16x32xf32>
    %552 = arith.addf %549, %551 : vector<16x32xf32>
    %c1_168 = arith.constant 1 : index
    %c0_169 = arith.constant 0 : index
    %553 = vector.load %arg16[%c1_168, %c0_169] : memref<2x2048xf32, #tpu.memory_space<vmem>>, vector<1x2048xf32>
    %c0_170 = arith.constant 0 : index
    %c0_171 = arith.constant 0 : index
    %554 = vector.load %arg12[%c0_170, %c0_171] : memref<32x2048xbf16, #tpu.memory_space<vmem>>, vector<32x2048xbf16>
    %555 = arith.truncf %552 : vector<16x32xf32> to vector<16x32xbf16>
    %cst_172 = arith.constant dense<0.000000e+00> : vector<16x2048xf32>
    %556 = tpu.matmul %555, %554, %cst_172 {dimension_numbers = #tpu.dot_dimension_numbers<[1], [0], [0], [1], [0, 0, 1, 1], [], []>} : vector<16x32xbf16>, vector<32x2048xbf16>, vector<16x2048xf32> -> vector<16x2048xf32>
    %557 = vector.broadcast %553 : vector<1x2048xf32> to vector<16x2048xf32>
    %558 = arith.addf %556, %557 : vector<16x2048xf32>
    %cst_173 = arith.constant 0.000000e+00 : f32
    %559 = vector.broadcast %cst_173 : f32 to vector<16x2048xf32>
    %560 = arith.maximumf %558, %559 : vector<16x2048xf32>
    %c0_174 = arith.constant 0 : index
    %c0_175 = arith.constant 0 : index
    %561 = vector.load %arg13[%c0_174, %c0_175] : memref<2048x32xbf16, #tpu.memory_space<vmem>>, vector<2048x32xbf16>
    %562 = arith.truncf %560 : vector<16x2048xf32> to vector<16x2048xbf16>
    %cst_176 = arith.constant dense<0.000000e+00> : vector<16x32xf32>
    %563 = tpu.matmul %562, %561, %cst_176 {dimension_numbers = #tpu.dot_dimension_numbers<[1], [0], [0], [1], [0, 0, 1, 1], [], []>} : vector<16x2048xbf16>, vector<2048x32xbf16>, vector<16x32xf32> -> vector<16x32xf32>
    %c13 = arith.constant 13 : index
    %c0_177 = arith.constant 0 : index
    %564 = vector.load %arg15[%c13, %c0_177] : memref<16x32xf32, #tpu.memory_space<vmem>>, vector<1x32xf32>
    %565 = vector.broadcast %564 : vector<1x32xf32> to vector<16x32xf32>
    %566 = arith.addf %563, %565 : vector<16x32xf32>
    %567 = arith.addf %552, %566 : vector<16x32xf32>
    %cst_178 = arith.constant dense<0.000000e+00> : vector<16xf32>
    %568 = vector.multi_reduction <add>, %567, %cst_178 [1] : vector<16x32xf32> to vector<16xf32>
    %569 = vector.shape_cast %568 : vector<16xf32> to vector<16x1xf32>
    %cst_179 = arith.constant 3.200000e+01 : f32
    %570 = vector.broadcast %cst_179 : f32 to vector<16x1xf32>
    %571 = arith.divf %569, %570 : vector<16x1xf32>
    %572 = vector.broadcast %571 : vector<16x1xf32> to vector<16x32xf32>
    %573 = arith.subf %567, %572 : vector<16x32xf32>
    %574 = arith.mulf %573, %573 : vector<16x32xf32>
    %cst_180 = arith.constant dense<0.000000e+00> : vector<16xf32>
    %575 = vector.multi_reduction <add>, %574, %cst_180 [1] : vector<16x32xf32> to vector<16xf32>
    %576 = vector.shape_cast %575 : vector<16xf32> to vector<16x1xf32>
    %cst_181 = arith.constant 3.200000e+01 : f32
    %577 = vector.broadcast %cst_181 : f32 to vector<16x1xf32>
    %578 = arith.divf %576, %577 : vector<16x1xf32>
    %579 = vector.broadcast %571 : vector<16x1xf32> to vector<16x32xf32>
    %580 = arith.subf %567, %579 : vector<16x32xf32>
    %cst_182 = arith.constant 9.99999974E-6 : f32
    %581 = vector.broadcast %cst_182 : f32 to vector<16x1xf32>
    %582 = arith.addf %578, %581 : vector<16x1xf32>
    %583 = math.rsqrt %582 : vector<16x1xf32>
    %584 = vector.broadcast %583 : vector<16x1xf32> to vector<16x32xf32>
    %585 = arith.mulf %580, %584 : vector<16x32xf32>
    %c14 = arith.constant 14 : index
    %c0_183 = arith.constant 0 : index
    %586 = vector.load %arg15[%c14, %c0_183] : memref<16x32xf32, #tpu.memory_space<vmem>>, vector<1x32xf32>
    %587 = vector.broadcast %586 : vector<1x32xf32> to vector<16x32xf32>
    %588 = arith.mulf %585, %587 : vector<16x32xf32>
    %c15 = arith.constant 15 : index
    %c0_184 = arith.constant 0 : index
    %589 = vector.load %arg15[%c15, %c0_184] : memref<16x32xf32, #tpu.memory_space<vmem>>, vector<1x32xf32>
    %590 = vector.broadcast %589 : vector<1x32xf32> to vector<16x32xf32>
    %591 = arith.addf %588, %590 : vector<16x32xf32>
    %c0_185 = arith.constant 0 : index
    %c0_186 = arith.constant 0 : index
    %592 = vector.load %arg14[%c0_185, %c0_186] : memref<32x128xbf16, #tpu.memory_space<vmem>>, vector<32x128xbf16>
    %593 = arith.truncf %591 : vector<16x32xf32> to vector<16x32xbf16>
    %cst_187 = arith.constant dense<0.000000e+00> : vector<16x128xf32>
    %594 = tpu.matmul %593, %592, %cst_187 {dimension_numbers = #tpu.dot_dimension_numbers<[1], [0], [0], [1], [0, 0, 1, 1], [], []>} : vector<16x32xbf16>, vector<32x128xbf16>, vector<16x128xf32> -> vector<16x128xf32>
    %c0_188 = arith.constant 0 : index
    %c0_189 = arith.constant 0 : index
    %595 = vector.load %arg19[%c0_188, %c0_189] : memref<1x128xf32, #tpu.memory_space<vmem>>, vector<1x128xf32>
    %596 = vector.broadcast %595 : vector<1x128xf32> to vector<16x128xf32>
    %597 = arith.addf %594, %596 : vector<16x128xf32>
    %c0_190 = arith.constant 0 : index
    %c0_191 = arith.constant 0 : index
    %598 = vector.load %arg20[%c0_190, %c0_191] : memref<16x128xf32, #tpu.memory_space<vmem>>, vector<16x128xf32>
    tpu.vector_store %arg20[%c0_190, %c0_191], %597 {strides = array<i32>} : memref<16x128xf32, #tpu.memory_space<vmem>>, vector<16x128xf32>,
    return
  }
  func.func @transform_0(%arg0: i32) -> (i32, i32) {
    %c0_i32 = arith.constant 0 : i32
    %c0_i32_0 = arith.constant 0 : i32
    return %arg0, %c0_i32 : i32, i32
  }
  func.func @transform_1(%arg0: i32) -> (i32, i32) {
    %c0_i32 = arith.constant 0 : i32
    %c0_i32_0 = arith.constant 0 : i32
    return %arg0, %c0_i32 : i32, i32
  }
  func.func @transform_2(%arg0: i32) -> (i32, i32) {
    %c0_i32 = arith.constant 0 : i32
    %c0_i32_0 = arith.constant 0 : i32
    %c0_i32_1 = arith.constant 0 : i32
    return %c0_i32, %c0_i32_0 : i32, i32
  }
  func.func @transform_3(%arg0: i32) -> (i32, i32) {
    %c0_i32 = arith.constant 0 : i32
    %c0_i32_0 = arith.constant 0 : i32
    %c0_i32_1 = arith.constant 0 : i32
    return %c0_i32, %c0_i32_0 : i32, i32
  }
  func.func @transform_4(%arg0: i32) -> (i32, i32) {
    %c0_i32 = arith.constant 0 : i32
    %c0_i32_0 = arith.constant 0 : i32
    %c0_i32_1 = arith.constant 0 : i32
    return %c0_i32, %c0_i32_0 : i32, i32
  }
  func.func @transform_5(%arg0: i32) -> (i32, i32) {
    %c0_i32 = arith.constant 0 : i32
    %c0_i32_0 = arith.constant 0 : i32
    %c0_i32_1 = arith.constant 0 : i32
    return %c0_i32, %c0_i32_0 : i32, i32
  }
  func.func @transform_6(%arg0: i32) -> (i32, i32) {
    %c0_i32 = arith.constant 0 : i32
    %c0_i32_0 = arith.constant 0 : i32
    %c0_i32_1 = arith.constant 0 : i32
    return %c0_i32, %c0_i32_0 : i32, i32
  }
  func.func @transform_7(%arg0: i32) -> (i32, i32) {
    %c0_i32 = arith.constant 0 : i32
    %c0_i32_0 = arith.constant 0 : i32
    %c0_i32_1 = arith.constant 0 : i32
    return %c0_i32, %c0_i32_0 : i32, i32
  }
  func.func @transform_8(%arg0: i32) -> (i32, i32) {
    %c0_i32 = arith.constant 0 : i32
    %c0_i32_0 = arith.constant 0 : i32
    %c0_i32_1 = arith.constant 0 : i32
    return %c0_i32, %c0_i32_0 : i32, i32
  }
  func.func @transform_9(%arg0: i32) -> (i32, i32) {
    %c0_i32 = arith.constant 0 : i32
    %c0_i32_0 = arith.constant 0 : i32
    %c0_i32_1 = arith.constant 0 : i32
    return %c0_i32, %c0_i32_0 : i32, i32
  }
  func.func @transform_10(%arg0: i32) -> (i32, i32) {
    %c0_i32 = arith.constant 0 : i32
    %c0_i32_0 = arith.constant 0 : i32
    %c0_i32_1 = arith.constant 0 : i32
    return %c0_i32, %c0_i32_0 : i32, i32
  }
  func.func @transform_11(%arg0: i32) -> (i32, i32) {
    %c0_i32 = arith.constant 0 : i32
    %c0_i32_0 = arith.constant 0 : i32
    %c0_i32_1 = arith.constant 0 : i32
    return %c0_i32, %c0_i32_0 : i32, i32
  }
  func.func @transform_12(%arg0: i32) -> (i32, i32) {
    %c0_i32 = arith.constant 0 : i32
    %c0_i32_0 = arith.constant 0 : i32
    %c0_i32_1 = arith.constant 0 : i32
    return %c0_i32, %c0_i32_0 : i32, i32
  }
  func.func @transform_13(%arg0: i32) -> (i32, i32) {
    %c0_i32 = arith.constant 0 : i32
    %c0_i32_0 = arith.constant 0 : i32
    %c0_i32_1 = arith.constant 0 : i32
    return %c0_i32, %c0_i32_0 : i32, i32
  }
  func.func @transform_14(%arg0: i32) -> (i32, i32) {
    %c0_i32 = arith.constant 0 : i32
    %c0_i32_0 = arith.constant 0 : i32
    %c0_i32_1 = arith.constant 0 : i32
    return %c0_i32, %c0_i32_0 : i32, i32
  }
  func.func @transform_15(%arg0: i32) -> (i32, i32) {
    %c0_i32 = arith.constant 0 : i32
    %c0_i32_0 = arith.constant 0 : i32
    %c0_i32_1 = arith.constant 0 : i32
    return %c0_i32, %c0_i32_0 : i32, i32
  }
  func.func @transform_16(%arg0: i32) -> (i32, i32) {
    %c0_i32 = arith.constant 0 : i32
    %c0_i32_0 = arith.constant 0 : i32
    %c0_i32_1 = arith.constant 0 : i32
    return %c0_i32, %c0_i32_0 : i32, i32
  }
  func.func @transform_17(%arg0: i32) -> (i32, i32) {
    %c0_i32 = arith.constant 0 : i32
    %c0_i32_0 = arith.constant 0 : i32
    %c0_i32_1 = arith.constant 0 : i32
    return %c0_i32, %c0_i32_0 : i32, i32
  }
  func.func @transform_18(%arg0: i32) -> (i32, i32) {
    %c0_i32 = arith.constant 0 : i32
    %c0_i32_0 = arith.constant 0 : i32
    %c0_i32_1 = arith.constant 0 : i32
    return %c0_i32, %c0_i32_0 : i32, i32
  }
  func.func @transform_19(%arg0: i32) -> (i32, i32) {
    %c0_i32 = arith.constant 0 : i32
    %c0_i32_0 = arith.constant 0 : i32
    return %arg0, %c0_i32 : i32, i32
  }
}

</mosaic_0001>

<bundles_post_ra>
// kernel: seq2seq_transformer_forward.1
= control target key start
LH: loop header
LB: loop body
LE: loop exit
PB: predicated region body
PF: predicated region fallthrough
CT: control target
= control target key end

     0   :  { %s13443_s0 = inlined_call_operand.vmem [shape: f32[32,32], index: 0, kind: input, shape index: {}]   ;;  %s13444_s1 = inlined_call_operand.vmem [shape: f32[32,32], index: 1, kind: input, shape index: {}]   ;;  %s13445_s2 = inlined_call_operand.vmem [shape: bf16[32,128], index: 2, kind: input, shape index: {}]   ;;  %s13446_s3 = inlined_call_operand.vmem [shape: bf16[32,32], index: 3, kind: input, shape index: {}]   ;;  %s13447_s4 = inlined_call_operand.vmem [shape: bf16[32,2048], index: 4, kind: input, shape index: {}]   ;;  %s13448_s5 = inlined_call_operand.vmem [shape: bf16[2048,32], index: 5, kind: input, shape index: {}]   ;;  %s13449_s6 = inlined_call_operand.vmem [shape: bf16[32,128], index: 6, kind: input, shape index: {}]   ;;  %s13450_s7 = inlined_call_operand.vmem [shape: bf16[32,32], index: 7, kind: input, shape index: {}]   ;;  %s13451_s8 = inlined_call_operand.vmem [shape: bf16[32,32], index: 8, kind: input, shape index: {}]   ;;  %s13452_s9 = inlined_call_operand.vmem [shape: bf16[32,128], index: 9, kind: input, shape index: {}]   ;;  %s13453_s10 = inlined_call_operand.vmem [shape: bf16[32,32], index: 10, kind: input, shape index: {}]   ;;  %s13454_s11 = inlined_call_operand.vmem [shape: bf16[32,2048], index: 11, kind: input, shape index: {}]   ;;  %s13455_s12 = inlined_call_operand.vmem [shape: bf16[2048,32], index: 12, kind: input, shape index: {}]   ;;  %s13456_s13 = inlined_call_operand.vmem [shape: bf16[32,128], index: 13, kind: input, shape index: {}]   ;;  %s13457_s14 = inlined_call_operand.vmem [shape: f32[16,32], index: 14, kind: input, shape index: {}]   ;;  %s13458_s15 = inlined_call_operand.vmem [shape: f32[2,2048], index: 15, kind: input, shape index: {}]   ;;  %s13459_s16 = inlined_call_operand.vmem [shape: f32[2,128], index: 16, kind: input, shape index: {}]   ;;  %s13460_s17 = inlined_call_operand.vmem [shape: f32[1,128], index: 17, kind: input, shape index: {}]   ;;  %s13461_s18 = inlined_call_operand.vmem [shape: f32[1,128], index: 18, kind: input, shape index: {}]   ;;  %s13462_s19 = inlined_call_operand.hbm [shape: f32[32,128], index: 19, kind: output, shape index: {}]  }
   0x1   :  { %13503 = sst [smem:[#allocation11_spill]] %s13443_s0 }
   0x2   :  { %13504 = sst [smem:[#allocation12_spill]] %s13444_s1 }
   0x3   :  { %13505 = sst [smem:[#allocation13_spill]] %s13445_s2 }
   0x4   :  { %13506 = sst [smem:[#allocation14_spill]] %s13446_s3 }
   0x5   :  { %13507 = sst [smem:[#allocation15_spill]] %s13447_s4 }
   0x6   :  { %13508 = sst [smem:[#allocation16_spill]] %s13448_s5 }
   0x7   :  { %13509 = sst [smem:[#allocation17_spill]] %s13449_s6 }
   0x8   :  { %13510 = sst [smem:[#allocation18_spill]] %s13462_s19 }
   0x9   :  { %24 = vsyncpa [#allocation3], 0 }
   0xa   :  { %26 = vsyncpa [#allocation3 + $0x1], 0  ;;  %s11492_s0 = smov 0   ;;  %s11494_s30 = smov 0  }
   0xb   :  { %s11496_s20 = smov 0   ;;  %s11498_s21 = smov 0  }
   0xc LB: > { %13511 = sst [smem:[#allocation5_spill]] %s11359_s0  ;;  %s11513_s1 = sadd.s32 4294967295, %s11371_s21   ;;  %s11371_s21 = sphi %s11498_s21, %s13545_s21   ;;  %s11367_s20 = sphi %s11496_s20, %s13547_s20   ;;  %s11363_s30 = sphi %s11494_s30, %s13549_s30   ;;  %s11359_s0 = sphi %s11492_s0, %s13548_s0  }
   0xd   : > { %13512 = sst [smem:[#allocation6_spill]] %s11367_s20  ;;  %s9571_s22 = sadd.s32 4294967294, %s11371_s21  }
   0xe   : > { %13513 = sst [smem:[#allocation7_spill]] %s11371_s21  ;;  %s11517_s2 = sadd.s32 1, %s11371_s21  }
   0xf   : > { %13514 = sst [smem:[#allocation8_spill]] %s11517_s2  ;;  %s448_s23 = sadd.s32 1, %s11367_s20 }
  0x10   : > { %s445_s24 = ssub.s32 %s11371_s21, %s11517_s2  ;;  %p458_p0 = scmp.ne.s32.totalorder %s11367_s20, %s11363_s30 }
  0x11   : > { %p446_p1 = scmp.eq.s32.totalorder %s445_s24, 0  ;;  %p459_p2 = scmp.eq.s32.totalorder %s11513_s1, 1 }
  0x12   : > { %p464_p3 = scmp.ne.s32.totalorder %s11363_s30, %s11359_s0  ;;  %p465_p4 = scmp.eq.s32.totalorder %s9571_s22, 1 }
  0x13   : > { %s11528_s25 = scalar_select %p446_p1, %s11367_s20, %s448_s23  }
  0x14   : > { %p11530_p5 = por %p459_p2, %p458_p0  ;;  %p11534_p6 = por %p465_p4, %p464_p3 }
  0x15   : > { %13515 = sst [smem:[#allocation9_spill]] %s11528_s25  ;;  %p9574_p7 = scmp.ge.s32.totalorder %s11371_s21, 1 }
  0x16   : > { %s13517_s26 = scalar_select %p11534_p6, 1, 0 }
  0x17   : > { %p552_p8 = scmp.lt.s32.totalorder %s11371_s21, 3 }
  0x18   : > { %13518 = sst [smem:[#allocation10_spill]] %s13517_s26 }
  0x19   : > { %p553_p9 = pnand %p9574_p7, %p552_p8 }
  0x1a   : > { %s13519_s29 = sld [smem:[#allocation13_spill]] (!%p553_p9)  ;;  %v11373_v1 = vmov (!%p553_p9), 0.0   ;;  %vm11374_vm0 = vmmov (!%p553_p9), 0   ;;  %s9576_s24 = sshll.u32 (!%p553_p9), %s11513_s1, 1  ;;  %vm651_vm1 = vcmask (!%p553_p9), 261120   ;;  %vm699_vm2 = vcmask (!%p553_p9), 64512  }
  0x1b   : > { %556 = sbr.rel (%p553_p9) target bundleno = 7368 (0x1cc8), region = 96  ;;  %10513 = vmatprep.subr.bf16.mxu0 (!%p553_p9), %v11373_v1  ;;  %10521 = vmatprep.subr.mxu1 (!%p553_p9), %v11373_v1  ;;  %p614_p10 = scmp.lt.s32.totalorder (!%p553_p9), %s9576_s24, 3  ;;  %v9580_v6 = vld [vmem:[%s13459_s16] ss:$0 sm:$0xff] (!%p553_p9)  ;;  %vm1369_vm3 = vcmask (!%p553_p9), 130048   ;;  %vm1371_vm4 = vcmask (!%p553_p9), 195584  }
  0x1c   : > { %10517 = vmatprep.mubr.msk.bf16.mxu0 (!%p553_p9), %vm11374_vm0, %v11373_v1  ;;  %10523 = vmatprep.mubr.msk.f32.mxu1 (!%p553_p9), %vm11374_vm0, %v11373_v1  ;;  %s13520_s23 = sld [smem:[#allocation11_spill]] (!%p553_p9)  ;;  %s13468_s28 = smov (!%p553_p9), 64  }
  0x1d   : > { %s13480_s22 = smov (!%p553_p9), 96   ;;  %s13478_s20 = smov (!%p553_p9), 120  }
  0x1e   : > { %s13470_s25 = smov (!%p553_p9), 80   ;;  %s13497_s26 = smov (!%p553_p9), 8  }
  0x1f   : > { %s13524_s4 = sld [smem:[#allocation15_spill]] (!%p553_p9)  ;;  %s13525_s5 = sld [smem:[#allocation16_spill]] (!%p553_p9) }
  0x20   : > { %v10919_v0 = vld [vmem:[%s13519_s29] sm:$0xff] (!%p553_p9)   ;;  %v10920_v2 = vld [vmem:[%s13519_s29 + $0x8] sm:$0xff] (!%p553_p9)   ;;  %s13526_s6 = sld [smem:[#allocation17_spill]] (!%p553_p9)  ;;  %s13529_s21 = smov (!%p553_p9), 88  }
  0x21   : > { %10514 = vmatpush3.bf16.msra.mxu0 (!%p553_p9), %v10919_v0  ;;  %s13533_s0 = smov (!%p553_p9), 72  }
  0x22   : > { %10515 = vmatprep.subr.bf16.mxu0 %v11373_v1  ;;  %s13551_s24 = smov (!%p614_p10, %s9576_s24), 3 }
  0x23   : > { %s13467_s27 = sshll.u32 %s13551_s24, 3  ;;  %s13527_s19 = sshll.u32 %s13551_s24, 3 }
  0x24   : > { %s11563_s29 = scalar_lea.vmem %s13520_s23, %s13467_s27  ;;  %s13488_s23 = smov 88  }
  0x25   : > { %10516 = vmatpush3.bf16.msra.mxu0 %v10920_v2  ;;  %v627_v3 = vld [vmem:[%s11563_s29] sm:$0xff]  ;;  %v628_v4 = vld [vmem:[%s11563_s29 + $0x8] sm:$0xff]  ;;  %s13472_s27 = smov 112   ;;  %s13536_s24 = smov 56  }
  0x26   : > { %10536 = vmatprep.subr.mxu0 %v11373_v1  ;;  %v634_v5 = vpack.c.bf16 %v628_v4, %v627_v3 }
  0x28   : > { %10518 = vmatmul.mubr.msk.bf16.vlgmr.msra.gmra.mrb[0].mxu0 %vm651_vm1, %v634_v5 }
  0x29   : > { %10538 = vmatprep.mubr.msk.f32.mxu0 %vm11374_vm0, %v11373_v1 }
  0xfb   : > { %v689_v7 = vpop.f32.mrb[0].mxu0 }
  0xfc   : > { %v11573_v8 = vadd.f32 %v9580_v6, %v689_v7  ;;  %v10519_v9 = vpop.f32.mrb[1].mxu0 }
  0xfd   : > { %v692_v10 = vpop.f32.mrb[2].mxu0 }
  0xfe   : > { %v11575_v11 = vadd.f32 %v9580_v6, %v692_v10  ;;  %785 = vrot.lane.b32.xlu1 %v11573_v8, %s13468_s28  ;;  %697 = vrot.lane.b32.xlu0 %v11573_v8, %s13480_s22  ;;  %v10520_v12 = vpop.f32.mrb[3].mxu0  ;;  %s13474_s28 = smov 104  }
 0x102   : > { %863 = vrot.lane.b32.xlu1 %v11573_v8, %s13488_s23 }
 0x106   : > { %861 = vrot.lane.b32.xlu1 %v11573_v8, %s13478_s20 }
 0x10a   : > { %1028 = vrot.lane.b32.xlu1 %v11573_v8, %s13470_s25  ;;  %s13476_s25 = smov 72  }
 0x10e   : > { %1026 = vrot.lane.b32.xlu1 %v11573_v8, %s13472_s27 }
 0x112   : > { %1191 = vrot.lane.b32.xlu1 %v11573_v8, %s13474_s28 }
 0x170   : > { %v698_v13 = vpop.permute.xlu0 %697  ;;  %v786_v14 = vpop.permute.xlu1 %785 }
 0x171   : > { %10522 = vmatpush3.xpose.msk.msra.mxu1 %vm699_vm2, %v698_v13 }
 0x172   : > { %10526 = vmatprep.subr.mxu1 %v11373_v1 }
 0x174   : > { %10524 = vmatmul.mubr.msk.f32.vlgmr.msra.gmra.mrb[0].mxu1 %vm699_vm2, %v11573_v8  ;;  %v864_v23 = vpop.permute.xlu1 %863 }
 0x175   : > { %10527 = vmatpush3.msra.mxu1 %v786_v14  ;;  %10528 = vmatprep.mubr.msk.f32.mxu1 %vm11374_vm0, %v11373_v1 }
 0x176   : > { %10531 = vmatprep.subr.mxu1 %v11373_v1 }
 0x178   : > { %v862_v24 = vpop.permute.xlu1 %861 }
 0x17c   : > { %v1029_v25 = vpop.permute.xlu1 %1028 }
 0x180   : > { %v1027_v26 = vpop.permute.xlu1 %1026 }
 0x184   : > { %v1192_v27 = vpop.permute.xlu1 %1191 }
 0x247   : > { %v770_v15 = vpop.f32.mrb[0].mxu1 }
 0x248   : > { %v10525_v16 = vpop.f32.mrb[1].mxu1  ;;  %v774_v17 = vsel %vm699_vm2, %v770_v15, -inf }
 0x249   : > { %775 = vmax.xlane.f32.xlu0 %v774_v17 }
 0x25f   : > { %1193 = vrot.lane.b32.xlu0 %v11573_v8, %s13476_s25 }
 0x263   : > { %1702 = vrot.lane.b32.xlu0 %v11575_v11, %s13472_s27  ;;  %s13521_s27 = smov 80  }
 0x267   : > { %1867 = vrot.lane.b32.xlu0 %v11575_v11, %s13474_s28  ;;  %s13486_s28 = smov 48  }
 0x2d6   : > { %v776_v18 = vpop.xlane.xlu0 %775 }
 0x2d7   : > { %v777_v19 = vsub.f32 %v770_v15, %v776_v18 }
 0x2d9   : > { %v778_v20 = vmul.f32 1.442695, %v777_v19 }
 0x2da   : > { %v1194_v33 = vpop.permute.xlu0 %1193 }
 0x2db   : > { %11191 = vpow2.f32 %v778_v20 }
 0x2de   : > { %v1703_v36 = vpop.permute.xlu0 %1702 }
 0x2e2   : > { %v1868_v38 = vpop.permute.xlu0 %1867 }
 0x2e5   : > { %v11192_v21 = vpop.eup %11191 }
 0x2e6   : > { %v780_v22 = vsel %vm699_vm2, %v11192_v21, 0.0 }
 0x2e7   : > { %781 = vadd.xlane.f32.xlu1 %v780_v22 }
 0x2f8   : > { %1374 = vrot.lane.b32.xlu1 %v11575_v11, %s13480_s22  ;;  %s13522_s22 = smov 64  }
 0x2fc   : > { %1539 = vrot.lane.b32.xlu1 %v11575_v11, %s13488_s23 }
 0x300   : > { %1537 = vrot.lane.b32.xlu1 %v11575_v11, %s13478_s20  ;;  %s13484_s20 = smov 56  }
 0x304   : > { %1704 = vrot.lane.b32.xlu1 %v11575_v11, %s13521_s27 }
 0x308   : > { %1869 = vrot.lane.b32.xlu1 %v11575_v11, %s13476_s25  ;;  %s13482_s25 = smov 40  }
 0x374   : > { %v782_v28 = vpop.xlane.xlu1 %781 }
 0x375   : > { %11193 = vrcp.f32 %v782_v28 }
 0x378   : > { %v1375_v31 = vpop.permute.xlu1 %1374 }
 0x37c   : > { %v1540_v32 = vpop.permute.xlu1 %1539 }
 0x37f   : > { %v11194_v29 = vpop.eup %11193 }
 0x380   : > { %v784_v30 = vmul.f32 %v11194_v29, %v11192_v21  ;;  %v1538_v34 = vpop.permute.xlu1 %1537 }
 0x382   : > { %10529 = vmatmul.mubr.msk.f32.vlgmr.msra.gmra.mrb[2].mxu1 %vm699_vm2, %v784_v30 }
 0x383   : > { %10532 = vmatpush3.xpose.msk.msra.mxu1 %vm699_vm2, %v864_v23  ;;  %10533 = vmatprep.mubr.msk.f32.mxu1 %vm11374_vm0, %v11373_v1 }
 0x384   : > { %10541 = vmatprep.subr.mxu1 %v11373_v1  ;;  %v1705_v35 = vpop.permute.xlu1 %1704 }
 0x386   : > { %10534 = vmatmul.mubr.msk.f32.vlgmr.msra.gmra.mrb[4].mxu1 %vm699_vm2, %v862_v24 }
 0x387   : > { %10542 = vmatpush3.xpose.msk.msra.mxu1 %vm699_vm2, %v1029_v25  ;;  %10543 = vmatprep.mubr.msk.f32.mxu1 %vm11374_vm0, %v11373_v1 }
 0x388   : > { %10551 = vmatprep.subr.mxu1 %v11373_v1  ;;  %v1870_v37 = vpop.permute.xlu1 %1869 }
 0x38a   : > { %10544 = vmatmul.mubr.msk.f32.vlgmr.msra.gmra.mrb[6].mxu1 %vm699_vm2, %v1027_v26 }
 0x38b   : > { %10552 = vmatpush3.xpose.msk.msra.mxu1 %vm699_vm2, %v1194_v33  ;;  %10553 = vmatprep.mubr.msk.f32.mxu1 %vm11374_vm0, %v11373_v1 }
 0x38c   : > { %10561 = vmatprep.subr.mxu1 %v11373_v1 }
 0x38e   : > { %10554 = vmatmul.mubr.msk.f32.vlgmr.msra.gmra.mrb[8].mxu1 %vm699_vm2, %v1192_v27 }
 0x38f   : > { %10562 = vmatpush3.xpose.msk.msra.mxu1 %vm699_vm2, %v1375_v31  ;;  %10563 = vmatprep.mubr.msk.f32.mxu1 %vm11374_vm0, %v11373_v1 }
 0x390   : > { %10571 = vmatprep.subr.mxu1 %v11373_v1 }
 0x392   : > { %10564 = vmatmul.mubr.msk.f32.vlgmr.msra.gmra.mrb[10].mxu1 %vm699_vm2, %v11575_v11 }
 0x393   : > { %10572 = vmatpush3.xpose.msk.msra.mxu1 %vm699_vm2, %v1540_v32  ;;  %10573 = vmatprep.mubr.msk.f32.mxu1 %vm11374_vm0, %v11373_v1 }
 0x394   : > { %10581 = vmatprep.subr.mxu1 %v11373_v1 }
 0x396   : > { %10574 = vmatmul.mubr.msk.f32.vlgmr.msra.gmra.mrb[12].mxu1 %vm699_vm2, %v1538_v34 }
 0x397   : > { %10582 = vmatpush3.xpose.msk.msra.mxu1 %vm699_vm2, %v1705_v35  ;;  %10583 = vmatprep.mubr.msk.f32.mxu1 %vm11374_vm0, %v11373_v1 }
 0x398   : > { %10591 = vmatprep.subr.mxu1 %v11373_v1 }
 0x39a   : > { %10584 = vmatmul.mubr.msk.f32.vlgmr.msra.gmra.mrb[14].mxu1 %vm699_vm2, %v1703_v36 }
 0x39b   : > { %10592 = vmatpush3.xpose.msk.msra.mxu1 %vm699_vm2, %v1870_v37  ;;  %10593 = vmatprep.mubr.msk.f32.mxu1 %vm11374_vm0, %v11373_v1 }
 0x39c   : > { %10601 = vmatprep.subr.bf16.mxu1 %v11373_v1 }
 0x39e   : > { %10594 = vmatmul.mubr.msk.f32.vlgmr.msra.gmra.mrb[16].mxu1 %vm699_vm2, %v1868_v38 }
 0x39f   : > { %10605 = vmatprep.mubr.msk.bf16.mxu1 %vm11374_vm0, %v11373_v1 }
 0x455   : > { %v11655_v39 = vpop.f32.mrb[2].mxu1 }
 0x456   : > { %v10530_v40 = vpop.f32.mrb[3].mxu1 }
 0x459   : > { %v935_v41 = vpop.f32.mrb[4].mxu1 }
 0x45a   : > { %v10535_v42 = vpop.f32.mrb[5].mxu1  ;;  %v939_v43 = vsel %vm699_vm2, %v935_v41, -inf }
 0x45b   : > { %940 = vmax.xlane.f32.xlu1 %v939_v43 }
 0x45d   : > { %v1100_v44 = vpop.f32.mrb[6].mxu1 }
 0x45e   : > { %v10545_v45 = vpop.f32.mrb[7].mxu1  ;;  %v1104_v46 = vsel %vm699_vm2, %v1100_v44, -inf }
 0x45f   : > { %1105 = vmax.xlane.f32.xlu0 %v1104_v46 }
 0x461   : > { %v1265_v47 = vpop.f32.mrb[8].mxu1 }
 0x462   : > { %v10555_v48 = vpop.f32.mrb[9].mxu1  ;;  %v1269_v49 = vsel %vm699_vm2, %v1265_v47, -inf }
 0x463   : > { %1270 = vmax.xlane.f32.xlu0 %v1269_v49 }
 0x465   : > { %v1446_v50 = vpop.f32.mrb[10].mxu1 }
 0x466   : > { %v10565_v51 = vpop.f32.mrb[11].mxu1  ;;  %v1450_v52 = vsel %vm699_vm2, %v1446_v50, -inf }
 0x467   : > { %1451 = vmax.xlane.f32.xlu1 %v1450_v52 }
 0x469   : > { %v1611_v53 = vpop.f32.mrb[12].mxu1 }
 0x46a   : > { %v10575_v54 = vpop.f32.mrb[13].mxu1  ;;  %v1615_v55 = vsel %vm699_vm2, %v1611_v53, -inf }
 0x46b   : > { %1616 = vmax.xlane.f32.xlu0 %v1615_v55 }
 0x46d   : > { %v1776_v56 = vpop.f32.mrb[14].mxu1 }
 0x46e   : > { %v10585_v57 = vpop.f32.mrb[15].mxu1  ;;  %v1780_v58 = vsel %vm699_vm2, %v1776_v56, -inf }
 0x46f   : > { %1781 = vmax.xlane.f32.xlu1 %v1780_v58 }
 0x471   : > { %v1941_v59 = vpop.f32.mrb[16].mxu1 }
 0x472   : > { %v10595_v60 = vpop.f32.mrb[17].mxu1  ;;  %v1945_v61 = vsel %vm699_vm2, %v1941_v59, -inf }
 0x473   : > { %1946 = vmax.xlane.f32.xlu0 %v1945_v61 }
 0x480   : > { %1115 = vrot.lane.b32.xlu1 %v11573_v8, %s13486_s28 }
 0x484   : > { %1280 = vrot.lane.b32.xlu1 %v11573_v8, %s13482_s25 }
 0x489   : > { %950 = vrot.lane.b32.xlu0 %v11573_v8, %s13484_s20 }
 0x4e8   : > { %v941_v62 = vpop.xlane.xlu1 %940 }
 0x4e9   : > { %v942_v63 = vsub.f32 %v935_v41, %v941_v62 }
 0x4eb   : > { %v943_v0 = vmul.f32 1.442695, %v942_v63 }
 0x4ec   : > { %v1106_v2 = vpop.xlane.xlu0 %1105 }
 0x4ed   : > { %11195 = vpow2.f32 %v943_v0  ;;  %v1107_v3 = vsub.f32 %v1100_v44, %v1106_v2 }
 0x4ef   : > { %v1108_v4 = vmul.f32 1.442695, %v1107_v3 }
 0x4f0   : > { %v1271_v6 = vpop.xlane.xlu0 %1270 }
 0x4f1   : > { %11197 = vpow2.f32 %v1108_v4  ;;  %v1272_v14 = vsub.f32 %v1265_v47, %v1271_v6 }
 0x4f3   : > { %v1273_v17 = vmul.f32 1.442695, %v1272_v14 }
 0x4f4   : > { %v1452_v15 = vpop.xlane.xlu1 %1451 }
 0x4f5   : > { %v1453_v16 = vsub.f32 %v1446_v50, %v1452_v15  ;;  %11199 = vpow2.f32 %v1273_v17 }
 0x4f7   : > { %v11196_v5 = vpop.eup %11195  ;;  %v1454_v20 = vmul.f32 1.442695, %v1453_v16 }
 0x4f8   : > { %v945_v7 = vsel %vm699_vm2, %v11196_v5, 0.0  ;;  %v1617_v10 = vpop.xlane.xlu0 %1616 }
 0x4f9   : > { %946 = vadd.xlane.f32.xlu1 %v945_v7  ;;  %v1618_v18 = vsub.f32 %v1611_v53, %v1617_v10  ;;  %11201 = vpow2.f32 %v1454_v20 }
 0x4fb   : > { %v11198_v9 = vpop.eup %11197  ;;  %v1619_v22 = vmul.f32 1.442695, %v1618_v18 }
 0x4fc   : > { %v1110_v12 = vsel %vm699_vm2, %v11198_v9, 0.0  ;;  %v1782_v19 = vpop.xlane.xlu1 %1781 }
 0x4fd   : > { %1111 = vadd.xlane.f32.xlu0 %v1110_v12  ;;  %v1783_v21 = vsub.f32 %v1776_v56, %v1782_v19  ;;  %11203 = vpow2.f32 %v1619_v22 }
 0x4ff   : > { %v1784_v24 = vmul.f32 1.442695, %v1783_v21  ;;  %v11200_v26 = vpop.eup %11199 }
 0x500   : > { %v1947_v13 = vpop.xlane.xlu0 %1946  ;;  %v1275_v28 = vsel %vm699_vm2, %v11200_v26, 0.0  ;;  %v1116_v36 = vpop.permute.xlu1 %1115 }
 0x501   : > { %v1948_v23 = vsub.f32 %v1941_v59, %v1947_v13  ;;  %11205 = vpow2.f32 %v1784_v24 }
 0x503   : > { %v1949_v25 = vmul.f32 1.442695, %v1948_v23  ;;  %v11202_v27 = vpop.eup %11201 }
 0x504   : > { %v951_v8 = vpop.permute.xlu0 %950  ;;  %v1456_v32 = vsel %vm699_vm2, %v11202_v27, 0.0  ;;  %v1281_v37 = vpop.permute.xlu1 %1280 }
 0x505   : > { %10537 = vmatpush3.msra.mxu0 %v951_v8  ;;  %11207 = vpow2.f32 %v1949_v25 }
 0x506   : > { %10546 = vmatprep.subr.mxu0 %v11373_v1 }
 0x507   : > { %v11204_v29 = vpop.eup %11203 }
 0x508   : > { %v1621_v31 = vsel %vm699_vm2, %v11204_v29, 0.0 }
 0x50a   : > { %1626 = vrot.lane.b32.xlu1 %v11575_v11, %s13484_s20  ;;  %s13495_s20 = smov 16  }
 0x50b   : > { %v11206_v30 = vpop.eup %11205 }
 0x50c   : > { %v1786_v35 = vsel %vm699_vm2, %v11206_v30, 0.0 }
 0x50f   : > { %v11680_v33 = vpop.eup %11207 }
 0x510   : > { %v1951_v34 = vsel %vm699_vm2, %v11680_v33, 0.0 }
 0x513   : > { %1461 = vrot.lane.b32.xlu0 %v11575_v11, %s13522_s22 }
 0x52e   : > { %1276 = vadd.xlane.f32.xlu1 %v1275_v28 }
 0x532   : > { %1622 = vadd.xlane.f32.xlu1 %v1621_v31  ;;  %1457 = vadd.xlane.f32.xlu0 %v1456_v32 }
 0x536   : > { %1952 = vadd.xlane.f32.xlu1 %v1951_v34  ;;  %1787 = vadd.xlane.f32.xlu0 %v1786_v35 }
 0x547   : > { %1956 = vrot.lane.b32.xlu1 %v11575_v11, %s13482_s25  ;;  %s13493_s25 = smov 24  }
 0x54c   : > { %1791 = vrot.lane.b32.xlu0 %v11575_v11, %s13486_s28  ;;  %s13523_s28 = sld [smem:[#allocation14_spill]] }
 0x552   : > { %v10921_v6 = vld [vmem:[%s13523_s28] sm:$0xff]   ;;  %v10922_v10 = vld [vmem:[%s13523_s28 + $0x8] sm:$0xff]   ;;  %s13528_s28 = sld [smem:[#allocation12_spill]] }
 0x553   : > { %10602 = vmatpush3.bf16.msra.mxu1 %v10921_v6 }
 0x554   : > { %10603 = vmatprep.subr.bf16.mxu1 %v11373_v1 }
 0x557   : > { %10604 = vmatpush3.bf16.msra.mxu1 %v10922_v10 }
 0x586   : > { %v947_v38 = vpop.xlane.xlu1 %946 }
 0x587   : > { %11209 = vrcp.f32 %v947_v38 }
 0x58a   : > { %v1112_v40 = vpop.xlane.xlu0 %1111  ;;  %v1627_v11 = vpop.permute.xlu1 %1626 }
 0x58b   : > { %11211 = vrcp.f32 %v1112_v40 }
 0x58e   : > { %v1462_v45 = vpop.permute.xlu0 %1461 }
 0x591   : > { %v11210_v41 = vpop.eup %11209 }
 0x592   : > { %v949_v42 = vmul.f32 %v11210_v41, %v11196_v5 }
 0x594   : > { %10539 = vmatmul.mubr.msk.f32.vlgmr.msra.gmra.mrb[4].mxu0 %vm699_vm2, %v949_v42 }
 0x595   : > { %v11212_v43 = vpop.eup %11211  ;;  %10547 = vmatpush3.msra.mxu0 %v1116_v36  ;;  %10548 = vmatprep.mubr.msk.f32.mxu0 %vm11374_vm0, %v11373_v1  ;;  %v9608_v36 = vld [vmem:[%s13457_s14] ss:$0 sm:$0xff] }
 0x596   : > { %10556 = vmatprep.subr.mxu0 %v11373_v1  ;;  %v1114_v44 = vmul.f32 %v11212_v43, %v11198_v9  ;;  %v11307_v43 = vld [vmem:[%s11563_s29] sm:$0xff] }
 0x598   : > { %10549 = vmatmul.mubr.msk.f32.vlgmr.msra.gmra.mrb[6].mxu0 %vm699_vm2, %v1114_v44 }
 0x599   : > { %10557 = vmatpush3.msra.mxu0 %v1281_v37  ;;  %10558 = vmatprep.mubr.msk.f32.mxu0 %vm11374_vm0, %v11373_v1 }
 0x59a   : > { %10566 = vmatprep.subr.mxu0 %v11373_v1 }
 0x5bb   : > { %v1277_v46 = vpop.xlane.xlu1 %1276 }
 0x5bc   : > { %11213 = vrcp.f32 %v1277_v46 }
 0x5bf   : > { %v1458_v47 = vpop.xlane.xlu0 %1457  ;;  %v1623_v48 = vpop.xlane.xlu1 %1622 }
 0x5c0   : > { %11215 = vrcp.f32 %v1458_v47 }
 0x5c1   : > { %11217 = vrcp.f32 %v1623_v48 }
 0x5c3   : > { %v1788_v49 = vpop.xlane.xlu0 %1787  ;;  %v1953_v51 = vpop.xlane.xlu1 %1952 }
 0x5c4   : > { %11219 = vrcp.f32 %v1788_v49 }
 0x5c5   : > { %11221 = vrcp.f32 %v1953_v51 }
 0x5c6   : > { %v11214_v50 = vpop.eup %11213 }
 0x5c7   : > { %v1279_v52 = vmul.f32 %v11214_v50, %v11200_v26  ;;  %v1792_v58 = vpop.permute.xlu0 %1791  ;;  %v1957_v61 = vpop.permute.xlu1 %1956 }
 0x5c9   : > { %10559 = vmatmul.mubr.msk.f32.vlgmr.msra.gmra.mrb[8].mxu0 %vm699_vm2, %v1279_v52 }
 0x5ca   : > { %v11216_v53 = vpop.eup %11215  ;;  %10567 = vmatpush3.msra.mxu0 %v1462_v45  ;;  %10568 = vmatprep.mubr.msk.f32.mxu0 %vm11374_vm0, %v11373_v1  ;;  %v11308_v45 = vld [vmem:[%s11563_s29 + $0x8] sm:$0xff]  ;;  %s13535_s29 = smov 48  }
 0x5cb   : > { %10576 = vmatprep.subr.mxu0 %v11373_v1  ;;  %v1460_v54 = vmul.f32 %v11216_v53, %v11202_v27  ;;  %v11218_v55 = vpop.eup %11217 }
 0x5cc   : > { %v1625_v56 = vmul.f32 %v11218_v55, %v11204_v29 }
 0x5cd   : > { %10569 = vmatmul.mubr.msk.f32.vlgmr.msra.gmra.mrb[10].mxu0 %vm699_vm2, %v1460_v54 }
 0x5ce   : > { %10577 = vmatpush3.msra.mxu0 %v1627_v11  ;;  %10578 = vmatprep.mubr.msk.f32.mxu0 %vm11374_vm0, %v11373_v1  ;;  %v11220_v57 = vpop.eup %11219 }
 0x5cf   : > { %10586 = vmatprep.subr.mxu0 %v11373_v1  ;;  %v1790_v59 = vmul.f32 %v11220_v57, %v11206_v30  ;;  %v11222_v60 = vpop.eup %11221 }
 0x5d0   : > { %v1955_v62 = vmul.f32 %v11222_v60, %v11680_v33  ;;  %v2160_v60 = vld [vmem:[%s13524_s4 + $0x8] sm:$0xff] }
 0x5d1   : > { %10579 = vmatmul.mubr.msk.f32.vlgmr.msra.gmra.mrb[12].mxu0 %vm699_vm2, %v1625_v56 }
 0x5d2   : > { %10587 = vmatpush3.msra.mxu0 %v1792_v58  ;;  %10588 = vmatprep.mubr.msk.f32.mxu0 %vm11374_vm0, %v11373_v1  ;;  %v2159_v58 = vld [vmem:[%s13524_s4] sm:$0xff] }
 0x5d3   : > { %10596 = vmatprep.subr.mxu0 %v11373_v1 }
 0x5d5   : > { %10589 = vmatmul.mubr.msk.f32.vlgmr.msra.gmra.mrb[14].mxu0 %vm699_vm2, %v1790_v59  ;;  %v2167_v59 = vld [vmem:[%s13524_s4 + $0x40] sm:$0xff] }
 0x5d6   : > { %10597 = vmatpush3.msra.mxu0 %v1957_v61  ;;  %10598 = vmatprep.mubr.msk.f32.mxu0 %vm11374_vm0, %v11373_v1  ;;  %v9616_v61 = vcombine.high %v2159_v58, %v2167_v59 }
 0x5d8   : > { %2437 = vmatprep.subr.bf16.mxu0 %v9616_v61  ;;  %v2166_v61 = vld [vmem:[%s13524_s4 + $0x38] sm:$0xff] }
 0x5d9   : > { %10599 = vmatmul.mubr.msk.f32.vlgmr.msra.gmra.mrb[16].mxu0 %vm699_vm2, %v1955_v62  ;;  %v2168_v62 = vld [vmem:[%s13524_s4 + $0x48] sm:$0xff] }
 0x667   : > { %v1022_v63 = vpop.f32.mrb[4].mxu0 }
 0x668   : > { %v10540_v0 = vpop.f32.mrb[5].mxu0 }
 0x669   : > { %v9617_v0 = vcombine.low %v2160_v60, %v2168_v62 }
 0x66b   : > { %v1187_v2 = vpop.f32.mrb[6].mxu0 }
 0x66c   : > { %v10550_v3 = vpop.f32.mrb[7].mxu0 }
 0x66d   : > { %v2175_v3 = vld [vmem:[%s13524_s4 + $0x80] sm:$0xff] }
 0x69c   : > { %v1352_v4 = vpop.f32.mrb[8].mxu0 }
 0x69d   : > { %v10560_v5 = vpop.f32.mrb[9].mxu0 }
 0x69e   : > { %v2176_v5 = vld [vmem:[%s13524_s4 + $0x88] sm:$0xff] }
 0x6a0   : > { %v1533_v7 = vpop.f32.mrb[10].mxu0 }
 0x6a1   : > { %v10570_v9 = vpop.f32.mrb[11].mxu0 }
 0x6a4   : > { %v1698_v12 = vpop.f32.mrb[12].mxu0 }
 0x6a5   : > { %v10874_v13 = vpack.i.bf16 %v1698_v12, %v1022_v63  ;;  %v10580_v8 = vpop.f32.mrb[13].mxu0  ;;  %v9615_v63 = vcombine.low %v2159_v58, %v2167_v59  ;;  %v2165_v59 = vld [vmem:[%s13524_s4 + $0x30] sm:$0xff] }
 0x6a6   : > { %v2169_v8 = vld [vmem:[%s13524_s4 + $0x50] sm:$0xff] }
 0x6a7   : > { %10875 = vrot.lane.b32.xlu0 %v10874_v13, %s13497_s26  ;;  %2438 = vmatpush1.bf16.msra.mxu0 %v9615_v63  ;;  %v2161_v13 = vld [vmem:[%s13524_s4 + $0x10] sm:$0xff]  ;;  %s13530_s26 = smov 96  }
 0x6a8   : > { %v1863_v14 = vpop.f32.mrb[14].mxu0 }
 0x6a9   : > { %v10879_v15 = vpack.i.bf16 %v1863_v14, %v1187_v2  ;;  %v10590_v16 = vpop.f32.mrb[15].mxu0  ;;  %v9618_v2 = vcombine.high %v2160_v60, %v2168_v62  ;;  %v2162_v14 = vld [vmem:[%s13524_s4 + $0x18] sm:$0xff]  ;;  %v2173_v60 = vld [vmem:[%s13524_s4 + $0x70] sm:$0xff] }
 0x6aa   : > { %v9620_v16 = vcombine.high %v2161_v13, %v2169_v8  ;;  %v2174_v62 = vld [vmem:[%s13524_s4 + $0x78] sm:$0xff] }
 0x6ab   : > { %10880 = vrot.lane.b32.xlu1 %v10879_v15, %s13495_s20  ;;  %2480 = vmatprep.subr.bf16.mxu1 %v9618_v2  ;;  %v11389_v15 = vmov 0   ;;  %v9628_v2 = vcombine.high %v2165_v59, %v2173_v60  ;;  %s13532_s20 = smov 112  }
 0x6ac   : > { %v2028_v17 = vpop.f32.mrb[16].mxu0  ;;  %2469 = vmatprep.mubr.bf16.mxu0 %v11389_v15 }
 0x6ad   : > { %v10884_v18 = vpack.i.bf16 %v2028_v17, %v1352_v4  ;;  %v10600_v19 = vpop.f32.mrb[17].mxu0  ;;  %v2183_v4 = vld [vmem:[%s13524_s4 + $0xc0] sm:$0xff]  ;;  %v2170_v17 = vld [vmem:[%s13524_s4 + $0x58] sm:$0xff] }
 0x6ae   : > { %v9632_v6 = vcombine.high %v2175_v3, %v2183_v4  ;;  %v9631_v9 = vcombine.low %v2175_v3, %v2183_v4  ;;  %v9621_v19 = vcombine.low %v2162_v14, %v2170_v17  ;;  %v9630_v3 = vcombine.high %v2166_v61, %v2174_v62  ;;  %v2181_v4 = vld [vmem:[%s13524_s4 + $0xb0] sm:$0xff] }
 0x6af   : > { %10885 = vrot.lane.b32.xlu0 %v10884_v18, %s13493_s25  ;;  %v9619_v18 = vcombine.low %v2161_v13, %v2169_v8  ;;  %s11390_s25 = smov [#allocation2]  }
 0x6b0   : > { %2439 = vmatprep.subr.bf16.mxu0 %v9632_v6  ;;  %v2182_v6 = vld [vmem:[%s13524_s4 + $0xb8] sm:$0xff]  ;;  %s11313_s23 = sshll.u32 %s11390_s25, 4  ;;  %s11314_s23 = int_to_ptr.vmem [resolvable:$false] %s11313_s23 }
 0x6b1   : > { %2440 = vmatpush1.bf16.msra.mxu0 %v9631_v9  ;;  %v9627_v9 = vcombine.low %v2165_v59, %v2173_v60 }
 0x6b2   : > { %2523 = vmatprep.subr.bf16.mxu0 %v9620_v16  ;;  %v10923_v16 = vld [vmem:[%s13525_s5 + $0x40] sm:$0xff]  }
 0x719   : > { %v10876_v20 = vpop.permute.xlu0 %10875 }
 0x71a   : > { %v10878_v22 = vunpack.i.h.bf16 %v10876_v20  ;;  %v10877_v23 = vunpack.i.l.bf16 %v10876_v20  ;;  %v9622_v20 = vcombine.high %v2162_v14, %v2170_v17  ;;  %v10924_v17 = vld [vmem:[%s13525_s5 + $0xc0] sm:$0xff]  }
 0x71c   : > { %v2044_v27 = vsel %vm699_vm2, %v1533_v7, %v10878_v22  ;;  %v1368_v28 = vsel %vm699_vm2, %v11655_v39, %v10877_v23  ;;  %v2184_v7 = vld [vmem:[%s13524_s4 + $0xc8] sm:$0xff] }
 0x71d   : > { %v10881_v21 = vpop.permute.xlu1 %10880  ;;  %v9633_v10 = vcombine.low %v2176_v5, %v2184_v7  ;;  %v9634_v12 = vcombine.high %v2176_v5, %v2184_v7  ;;  %v2189_v5 = vld [vmem:[%s13524_s4 + $0xf0] sm:$0xff]  ;;  %v2190_v7 = vld [vmem:[%s13524_s4 + $0xf8] sm:$0xff] }
 0x71e   : > { %v10883_v24 = vunpack.i.h.bf16 %v10881_v21  ;;  %v10882_v25 = vunpack.i.l.bf16 %v10881_v21  ;;  %v9646_v13 = vcombine.high %v2182_v6, %v2190_v7  ;;  %v9643_v8 = vcombine.low %v2181_v4, %v2189_v5 }
 0x71f   : > { %v9645_v14 = vcombine.low %v2182_v6, %v2190_v7 }
 0x720   : > { %v2045_v31 = vsel %vm1369_vm3, %v2044_v27, %v10883_v24  ;;  %v1370_v32 = vsel %vm1369_vm3, %v1368_v28, %v10882_v25  ;;  %v9612_v28 = vld [vmem:[%s13457_s14 + $0x1] ss:$0 sm:$0xff] }
 0x721   : > { %v10886_v26 = vpop.permute.xlu0 %10885 }
 0x722   : > { %v10888_v29 = vunpack.i.h.bf16 %v10886_v26  ;;  %v10887_v30 = vunpack.i.l.bf16 %v10886_v26 }
 0x724   : > { %v2046_v33 = vsel %vm1371_vm4, %v2045_v31, %v10888_v29  ;;  %v1372_v34 = vsel %vm1371_vm4, %v1370_v32, %v10887_v30 }
 0x725   : > { %v2051_v35 = vpack.c.bf16 %v2046_v33, %v1372_v34  ;;  %v9613_v33 = vld [vmem:[%s13457_s14 + $0x2] ss:$0 sm:$0xff] }
 0x727   : > { %10606 = vmatmul.mubr.msk.bf16.vlgmr.msra.gmra.mrb[20].mxu1 %vm651_vm1, %v2051_v35  ;;  %v2177_v35 = vld [vmem:[%s13524_s4 + $0x90] sm:$0xff] }
 0x728   : > { %2481 = vmatpush1.bf16.msra.mxu1 %v9617_v0  ;;  %2512 = vmatprep.mubr.bf16.mxu1 %v11389_v15 }
 0x729   : > { %2482 = vmatprep.subr.bf16.mxu1 %v9634_v12  ;;  %v9644_v12 = vcombine.high %v2181_v4, %v2189_v5 }
 0x72c   : > { %2483 = vmatpush1.bf16.msra.mxu1 %v9633_v10  ;;  %v9629_v10 = vcombine.low %v2166_v61, %v2174_v62 }
 0x72d   : > { %2566 = vmatprep.subr.bf16.mxu1 %v9622_v20  ;;  %v10927_v20 = vld [vmem:[%s13525_s5 + $0x48] sm:$0xff]  }
 0x7fa   : > { %v2106_v39 = vpop.f32.mrb[20].mxu1 }
 0x7fb   : > { %v2107_v37 = vadd.f32 %v9608_v36, %v2106_v39  ;;  %v10607_v38 = vpop.f32.mrb[21].mxu1  ;;  %v2178_v39 = vld [vmem:[%s13524_s4 + $0x98] sm:$0xff] }
 0x7fc   : > { %v2109_v40 = vpop.f32.mrb[22].mxu1 }
 0x7fd   : > { %v2110_v41 = vadd.f32 %v9608_v36, %v2109_v40  ;;  %v10608_v42 = vpop.f32.mrb[23].mxu1  ;;  %v2113_v44 = vadd.f32 %v11307_v43, %v2107_v37  ;;  %v2185_v36 = vld [vmem:[%s13524_s4 + $0xd0] sm:$0xff]  ;;  %v2186_v37 = vld [vmem:[%s13524_s4 + $0xd8] sm:$0xff] }
 0x7fe   : > { %v9636_v42 = vcombine.high %v2177_v35, %v2185_v36  ;;  %v9638_v43 = vcombine.high %v2178_v39, %v2186_v37 }
 0x7ff   : > { %v2115_v11 = vsel %vm651_vm1, %v2113_v44, 0.0  ;;  %v2114_v46 = vadd.f32 %v11308_v45, %v2110_v41  ;;  %v2164_v45 = vld [vmem:[%s13524_s4 + $0x28] sm:$0xff] }
 0x800   : > { %2116 = vadd.xlane.f32.xlu1 %v2115_v11  ;;  %v2171_v11 = vld [vmem:[%s13524_s4 + $0x60] sm:$0xff] }
 0x801   : > { %v2118_v47 = vsel %vm651_vm1, %v2114_v46, 0.0 }
 0x802   : > { %2119 = vadd.xlane.f32.xlu0 %v2118_v47  ;;  %v9635_v47 = vcombine.low %v2177_v35, %v2185_v36  ;;  %v10942_v35 = vld [vmem:[%s13525_s5 + $0xa0] sm:$0xff]   ;;  %v10943_v36 = vld [vmem:[%s13525_s5 + $0x68] sm:$0xff]  }
 0x88d   : > { %v2117_v48 = vpop.xlane.xlu1 %2116 }
 0x88e   : > { %v2122_v49 = vmul.f32 0.03125, %v2117_v48  ;;  %v9637_v48 = vcombine.low %v2178_v39, %v2186_v37  ;;  %v10944_v39 = vld [vmem:[%s13525_s5 + $0xe8] sm:$0xff]  }
 0x88f   : > { %v2120_v50 = vpop.xlane.xlu0 %2119  ;;  %v10945_v37 = vld [vmem:[%s13525_s5 + $0x28] sm:$0xff]  }
 0x890   : > { %v2124_v51 = vsub.f32 %v2113_v44, %v2122_v49  ;;  %v2123_v52 = vmul.f32 0.03125, %v2120_v50  ;;  %v2163_v44 = vld [vmem:[%s13524_s4 + $0x20] sm:$0xff] }
 0x891   : > { %v9624_v49 = vcombine.high %v2163_v44, %v2171_v11 }
 0x892   : > { %v2125_v53 = vsub.f32 %v2114_v46, %v2123_v52  ;;  %v2126_v54 = vmul.f32 %v2124_v51, %v2124_v51  ;;  %v2172_v46 = vld [vmem:[%s13524_s4 + $0x68] sm:$0xff]  ;;  %v2187_v52 = vld [vmem:[%s13524_s4 + $0xe0] sm:$0xff] }
 0x893   : > { %v9626_v50 = vcombine.high %v2164_v45, %v2172_v46 }
 0x894   : > { %v2128_v55 = vsel %vm651_vm1, %v2126_v54, 0.0  ;;  %v2127_v56 = vmul.f32 %v2125_v53, %v2125_v53  ;;  %v2188_v54 = vld [vmem:[%s13524_s4 + $0xe8] sm:$0xff] }
 0x895   : > { %2129 = vadd.xlane.f32.xlu0 %v2128_v55  ;;  %v9623_v55 = vcombine.low %v2163_v44, %v2171_v11  ;;  %v10949_v44 = vld [vmem:[%s13525_s5 + $0x30] sm:$0xff]  }
 0x896   : > { %v2131_v57 = vsel %vm651_vm1, %v2127_v56, 0.0  ;;  %v9625_v56 = vcombine.low %v2164_v45, %v2172_v46  ;;  %v10950_v11 = vld [vmem:[%s13525_s5 + $0xb0] sm:$0xff]   ;;  %v10951_v45 = vld [vmem:[%s13525_s5 + $0x78] sm:$0xff]  }
 0x897   : > { %2132 = vadd.xlane.f32.xlu1 %v2131_v57  ;;  %v10952_v46 = vld [vmem:[%s13525_s5 + $0xf8] sm:$0xff]  }
 0x922   : > { %v2130_v21 = vpop.xlane.xlu0 %2129 }
 0x923   : > { %v2134_v22 = vmul.f32 0.03125, %v2130_v21  ;;  %v10928_v21 = vld [vmem:[%s13525_s5 + $0xc8] sm:$0xff]  }
 0x924   : > { %v2133_v23 = vpop.xlane.xlu1 %2132 }
 0x925   : > { %v2136_v24 = vadd.f32 1e-05, %v2134_v22  ;;  %v2135_v25 = vmul.f32 0.03125, %v2133_v23  ;;  %v10929_v22 = vld [vmem:[%s13525_s5 + $0x8] sm:$0xff]  }
 0x926   : > { %v10930_v23 = vld [vmem:[%s13525_s5 + $0x88] sm:$0xff]  }
 0x927   : > { %11223 = vrsqrt.f32 %v2136_v24  ;;  %v2137_v26 = vadd.f32 1e-05, %v2135_v25  ;;  %v10931_v24 = vld [vmem:[%s13525_s5 + $0x50] sm:$0xff]  }
 0x928   : > { %v10932_v25 = vld [vmem:[%s13525_s5 + $0xd0] sm:$0xff]  }
 0x929   : > { %11225 = vrsqrt.f32 %v2137_v26  ;;  %v10933_v26 = vld [vmem:[%s13525_s5 + $0x10] sm:$0xff]  }
 0x931   : > { %v11224_v27 = vpop.eup %11223 }
 0x932   : > { %v2140_v29 = vmul.f32 %v11224_v27, %v2124_v51  ;;  %v2179_v51 = vld [vmem:[%s13524_s4 + $0xa0] sm:$0xff]  ;;  %v10934_v27 = vld [vmem:[%s13525_s5 + $0x90] sm:$0xff]  }
 0x933   : > { %v11226_v30 = vpop.eup %11225  ;;  %v9640_v57 = vcombine.high %v2179_v51, %v2187_v52  ;;  %v9639_v63 = vcombine.low %v2179_v51, %v2187_v52  ;;  %v2194_v51 = vlaneseq }
 0x934   : > { %v2147_v31 = vmul.f32 %v9612_v28, %v2140_v29  ;;  %v2141_v32 = vmul.f32 %v11226_v30, %v2125_v53  ;;  %v2180_v53 = vld [vmem:[%s13524_s4 + $0xa8] sm:$0xff]  ;;  %v10936_v29 = vld [vmem:[%s13525_s5 + $0xd8] sm:$0xff]   ;;  %s623_s4 = scalar_lea.vmem %s13528_s28, %s13527_s19  ;;  %s13531_s19 = smov 120  }
 0x935   : > { %v9642_v58 = vcombine.high %v2180_v53, %v2188_v54  ;;  %v9641_v0 = vcombine.low %v2180_v53, %v2188_v54  ;;  %v10937_v30 = vld [vmem:[%s13525_s5 + $0x18] sm:$0xff]   ;;  %v2195_v52 = vshrl.u32 %v2194_v51, 7  ;;  %s13534_s28 = smov 104  }
 0x936   : > { %v2148_v34 = vmul.f32 %v9612_v28, %v2141_v32  ;;  %v11797_v38 = vadd.f32 %v9613_v33, %v2147_v31  ;;  %v10935_v28 = vld [vmem:[%s13525_s5 + $0x58] sm:$0xff]   ;;  %v10939_v32 = vld [vmem:[%s13525_s5 + $0x60] sm:$0xff]  }
 0x937   : > { %v10938_v31 = vld [vmem:[%s13525_s5 + $0x98] sm:$0xff]   ;;  %v11977_v53 = vsub.s32 0, %v2195_v52  ;;  %v11979_v54 = vsub.s32 2, %v2195_v52  ;;  %v11992_v62 = vsub.s32 4, %v2195_v52  ;;  %v11998_v4 = vsub.s32 7, %v2195_v52 }
 0x938   : > { %v11799_v40 = vadd.f32 %v9613_v33, %v2148_v34  ;;  %v10940_v33 = vld [vmem:[%s13525_s5 + $0xe0] sm:$0xff]  }
 0x939   : > { %v10941_v34 = vld [vmem:[%s13525_s5 + $0x20] sm:$0xff]  }
 0x93a   : > { %v11803_v41 = vpack.c.bf16 %v11799_v40, %v11797_v38 }
 0x93c   : > { %9647 = vmatmul.mubr.msk.bf16.vlgmr.msra.gmra.mrb[20].mxu0 %vm651_vm1, %v11803_v41  ;;  %9648 = vmatmul.mubr.msk.bf16.vlgmr.msra.gmra.mrb[24].mxu1 %vm651_vm1, %v11803_v41 }
 0x93d   : > { %2524 = vmatpush1.bf16.msra.mxu0 %v9619_v18  ;;  %2567 = vmatpush1.bf16.msra.mxu1 %v9621_v19  ;;  %v10925_v18 = vld [vmem:[%s13525_s5] sm:$0xff]  }
 0x93e   : > { %2525 = vmatprep.subr.bf16.mxu0 %v9636_v42  ;;  %2568 = vmatprep.subr.bf16.mxu1 %v9638_v43  ;;  %v10926_v19 = vld [vmem:[%s13525_s5 + $0x80] sm:$0xff]   ;;  %v10947_v42 = vld [vmem:[%s13525_s5 + $0x70] sm:$0xff]  }
 0x93f   : > { %2555 = vmatprep.mubr.bf16.mxu0 %v11389_v15  ;;  %2598 = vmatprep.mubr.bf16.mxu1 %v11389_v15  ;;  %v10948_v43 = vld [vmem:[%s13525_s5 + $0xf0] sm:$0xff]  }
 0x941   : > { %2526 = vmatpush1.bf16.msra.mxu0 %v9635_v47  ;;  %2569 = vmatpush1.bf16.msra.mxu1 %v9637_v48  ;;  %v10953_v47 = vld [vmem:[%s13525_s5 + $0x38] sm:$0xff]  }
 0x942   : > { %2609 = vmatprep.subr.bf16.mxu0 %v9624_v49  ;;  %2652 = vmatprep.subr.bf16.mxu1 %v9626_v50  ;;  %v10954_v48 = vld [vmem:[%s13525_s5 + $0xb8] sm:$0xff]   ;;  %v10955_v49 = vld [vmem:[%s13525_s5 + $0x140] sm:$0xff]  }
 0x943   : > { %v10956_v50 = vld [vmem:[%s13525_s5 + $0x1c0] sm:$0xff]  }
 0x944   : > { %9649 = vmatmul.mubr.msk.bf16.vlgmr.msra.gmra.mrb[24].mxu0 %vm651_vm1, %v11803_v41  ;;  %9650 = vmatmul.mubr.msk.bf16.vlgmr.msra.gmra.mrb[28].mxu1 %vm651_vm1, %v11803_v41 }
 0x945   : > { %2610 = vmatpush1.bf16.msra.mxu0 %v9623_v55  ;;  %2653 = vmatpush1.bf16.msra.mxu1 %v9625_v56  ;;  %v2156_v55 = vld [vmem:[%s13458_s15] ss:$2 sm:$0xff]  ;;  %v11984_v56 = vsub.s32 1, %v2195_v52 }
 0x946   : > { %2611 = vmatprep.subr.bf16.mxu0 %v9640_v57  ;;  %2654 = vmatprep.subr.bf16.mxu1 %v9642_v58  ;;  %v11986_v57 = vsub.s32 3, %v2195_v52  ;;  %v2197_v58 = vrot.slane %v2156_v55, %v11977_v53  ;;  %v2205_v59 = vrot.slane %v2156_v55, %v11979_v54 }
 0x947   : > { %2641 = vmatprep.mubr.bf16.mxu0 %v11389_v15  ;;  %2684 = vmatprep.mubr.bf16.mxu1 %v11389_v15  ;;  %v2201_v60 = vrot.slane %v2156_v55, %v11984_v56 }
 0x948   : > { %v2209_v61 = vrot.slane %v2156_v55, %v11986_v57 }
 0x949   : > { %2612 = vmatpush1.bf16.msra.mxu0 %v9639_v63  ;;  %2655 = vmatpush1.bf16.msra.mxu1 %v9641_v0  ;;  %v11994_v63 = vsub.s32 6, %v2195_v52 }
 0x94a   : > { %2695 = vmatprep.subr.bf16.mxu0 %v9628_v2  ;;  %2738 = vmatprep.subr.bf16.mxu1 %v9630_v3  ;;  %v11996_v3 = vsub.s32 5, %v2195_v52 }
 0x94c   : > { %9651 = vmatmul.mubr.msk.bf16.vlgmr.msra.gmra.mrb[28].mxu0 %vm651_vm1, %v11803_v41  ;;  %9652 = vmatmul.mubr.msk.bf16.vlgmr.msra.gmra.mrb[32].mxu1 %vm651_vm1, %v11803_v41 }
 0x94d   : > { %2696 = vmatpush1.bf16.msra.mxu0 %v9627_v9  ;;  %2739 = vmatpush1.bf16.msra.mxu1 %v9629_v10 }
 0x94e   : > { %2697 = vmatprep.subr.bf16.mxu0 %v9644_v12  ;;  %2740 = vmatprep.subr.bf16.mxu1 %v9646_v13 }
 0x94f   : > { %2727 = vmatprep.mubr.bf16.mxu0 %v11389_v15  ;;  %2770 = vmatprep.mubr.bf16.mxu1 %v11389_v15 }
 0x951   : > { %2698 = vmatpush1.bf16.msra.mxu0 %v9643_v8  ;;  %2741 = vmatpush1.bf16.msra.mxu1 %v9645_v14 }
 0x952   : > { %10079 = vmatprep.subr.bf16.mxu0 %v10923_v16  ;;  %10101 = vmatprep.subr.bf16.mxu1 %v10924_v17 }
 0x954   : > { %9653 = vmatmul.mubr.msk.bf16.vlgmr.msra.gmra.mrb[32].mxu0 %vm651_vm1, %v11803_v41  ;;  %9654 = vmatmul.mubr.msk.bf16.vlgmr.msra.gmra.mrb[36].mxu1 %vm651_vm1, %v11803_v41  ;;  %v10946_v41 = vld [vmem:[%s13525_s5 + $0xa8] sm:$0xff]  }
 0x955   : > { %10080 = vmatpush3.bf16.msra.mxu0 %v10925_v18  ;;  %10102 = vmatpush3.bf16.msra.mxu1 %v10926_v19  ;;  %v2213_v19 = vrot.slane %v2156_v55, %v11992_v62 }
 0x956   : > { %10081 = vmatprep.subr.bf16.mxu0 %v10927_v20  ;;  %10103 = vmatprep.subr.bf16.mxu1 %v10928_v21  ;;  %v2221_v20 = vrot.slane %v2156_v55, %v11994_v63 }
 0x959   : > { %10082 = vmatpush3.bf16.msra.mxu0 %v10929_v22  ;;  %10104 = vmatpush3.bf16.msra.mxu1 %v10930_v23  ;;  %v2217_v23 = vrot.slane %v2156_v55, %v11996_v3 }
 0x95a   : > { %10083 = vmatprep.subr.bf16.mxu0 %v10931_v24  ;;  %10105 = vmatprep.subr.bf16.mxu1 %v10932_v25  ;;  %v2225_v24 = vrot.slane %v2156_v55, %v11998_v4 }
 0x95d   : > { %10084 = vmatpush3.bf16.msra.mxu0 %v10933_v26  ;;  %10106 = vmatpush3.bf16.msra.mxu1 %v10934_v27 }
 0x95e   : > { %10085 = vmatprep.subr.bf16.mxu0 %v10935_v28  ;;  %10107 = vmatprep.subr.bf16.mxu1 %v10936_v29 }
 0x961   : > { %10086 = vmatpush3.bf16.msra.mxu0 %v10937_v30  ;;  %10108 = vmatpush3.bf16.msra.mxu1 %v10938_v31 }
 0x962   : > { %10087 = vmatprep.subr.bf16.mxu0 %v10939_v32  ;;  %10109 = vmatprep.subr.bf16.mxu1 %v10940_v33  ;;  %v12007_v33 = vld [vmem:[%s13458_s15 + $0x10] ss:$2 sm:$0xff] }
 0x965   : > { %10088 = vmatpush3.bf16.msra.mxu0 %v10941_v34  ;;  %10110 = vmatpush3.bf16.msra.mxu1 %v10942_v35 }
 0x966   : > { %10089 = vmatprep.subr.bf16.mxu0 %v10943_v36  ;;  %10111 = vmatprep.subr.bf16.mxu1 %v10944_v39 }
 0x969   : > { %10090 = vmatpush3.bf16.msra.mxu0 %v10945_v37  ;;  %10112 = vmatpush3.bf16.msra.mxu1 %v10946_v41 }
 0x96a   : > { %10091 = vmatprep.subr.bf16.mxu0 %v10947_v42  ;;  %10113 = vmatprep.subr.bf16.mxu1 %v10948_v43  ;;  %v10957_v42 = vld [vmem:[%s13525_s5 + $0x100] sm:$0xff]  }
 0x96b   : > { %v10958_v43 = vld [vmem:[%s13525_s5 + $0x180] sm:$0xff]  }
 0x96d   : > { %10092 = vmatpush3.bf16.msra.mxu0 %v10949_v44  ;;  %10114 = vmatpush3.bf16.msra.mxu1 %v10950_v11 }
 0x96e   : > { %10093 = vmatprep.subr.bf16.mxu0 %v10951_v45  ;;  %10115 = vmatprep.subr.bf16.mxu1 %v10952_v46 }
 0x971   : > { %10094 = vmatpush3.bf16.msra.mxu0 %v10953_v47  ;;  %10116 = vmatpush3.bf16.msra.mxu1 %v10954_v48  ;;  %v10959_v47 = vld [vmem:[%s13525_s5 + $0x148] sm:$0xff]  }
 0x972   : > { %10123 = vmatprep.subr.bf16.mxu0 %v10955_v49  ;;  %10145 = vmatprep.subr.bf16.mxu1 %v10956_v50  ;;  %v10960_v48 = vld [vmem:[%s13525_s5 + $0x1c8] sm:$0xff]   ;;  %v2229_v49 = vrot.slane %v12007_v33, %v11977_v53 }
 0xa0f   : > { %v2471_v0 = vpop.f32.mrb[20].mxu0  ;;  %v2514_v2 = vpop.f32.mrb[24].mxu1 }
 0xa10   : > { %v2472_v5 = vadd.f32 %v2471_v0, %v2197_v58  ;;  %v2515_v6 = vadd.f32 %v2514_v2, %v2205_v59  ;;  %v2473_v7 = vpop.f32.mrb[21].mxu0  ;;  %v2516_v9 = vpop.f32.mrb[25].mxu1  ;;  %v2233_v2 = vrot.slane %v12007_v33, %v11984_v56 }
 0xa11   : > { %v2474_v10 = vadd.f32 %v2473_v7, %v2201_v60  ;;  %v2517_v12 = vadd.f32 %v2516_v9, %v2209_v61  ;;  %v2475_v13 = vpop.f32.mrb[22].mxu0  ;;  %v2518_v8 = vpop.f32.mrb[26].mxu1  ;;  %v10961_v7 = vld [vmem:[%s13525_s5 + $0x108] sm:$0xff]  }
 0xa12   : > { %v2476_v14 = vadd.f32 %v2475_v13, %v2197_v58  ;;  %v2519_v16 = vadd.f32 %v2518_v8, %v2205_v59  ;;  %v2477_v17 = vpop.f32.mrb[23].mxu0  ;;  %v2520_v18 = vpop.f32.mrb[27].mxu1  ;;  %v2781_v25 = vmax.f32 %v2472_v5, 0.0  ;;  %v2783_v26 = vmax.f32 %v2515_v6, 0.0  ;;  %v10962_v9 = vld [vmem:[%s13525_s5 + $0x188] sm:$0xff]  }
 0xa13   : > { %v2478_v21 = vadd.f32 %v2477_v17, %v2201_v60  ;;  %v2521_v22 = vadd.f32 %v2520_v18, %v2209_v61  ;;  %v2782_v29 = vmax.f32 %v2474_v10, 0.0  ;;  %v2784_v30 = vmax.f32 %v2517_v12, 0.0  ;;  %v10964_v17 = vld [vmem:[%s13525_s5 + $0x1d0] sm:$0xff]  }
 0xa14   : > { %v2797_v27 = vmax.f32 %v2476_v14, 0.0  ;;  %v2799_v28 = vmax.f32 %v2519_v16, 0.0  ;;  %v2237_v58 = vrot.slane %v12007_v33, %v11979_v54  ;;  %v2241_v10 = vrot.slane %v12007_v33, %v11986_v57  ;;  %v10963_v16 = vld [vmem:[%s13525_s5 + $0x150] sm:$0xff]  }
 0xa15   : > { %v2798_v31 = vmax.f32 %v2478_v21, 0.0  ;;  %v2800_v32 = vmax.f32 %v2521_v22, 0.0 }
 0xa16   : > { %v3069_v34 = vpack.c.bf16 %v2797_v27, %v2781_v25  ;;  %v3071_v35 = vpack.c.bf16 %v2799_v28, %v2783_v26  ;;  %v10965_v28 = vld [vmem:[%s13525_s5 + $0x110] sm:$0xff]  }
 0xa17   : > { %v3070_v36 = vpack.c.bf16 %v2798_v31, %v2782_v29  ;;  %v3072_v39 = vpack.c.bf16 %v2800_v32, %v2784_v30  ;;  %v2557_v37 = vpop.f32.mrb[24].mxu0  ;;  %v2600_v41 = vpop.f32.mrb[28].mxu1  ;;  %v10966_v29 = vld [vmem:[%s13525_s5 + $0x190] sm:$0xff]  }
 0xa18   : > { %v2558_v44 = vadd.f32 %v2557_v37, %v2213_v19  ;;  %v2601_v11 = vadd.f32 %v2600_v41, %v2221_v20  ;;  %v2559_v45 = vpop.f32.mrb[25].mxu0  ;;  %v2602_v46 = vpop.f32.mrb[29].mxu1 }
 0xa19   : > { %v2560_v50 = vadd.f32 %v2559_v45, %v2217_v23  ;;  %v2603_v51 = vadd.f32 %v2602_v46, %v2225_v24  ;;  %v2561_v52 = vpop.f32.mrb[26].mxu0  ;;  %v2604_v55 = vpop.f32.mrb[30].mxu1  ;;  %3890 = vmatprep.mubr.bf16.mxu0 %v3070_v36  ;;  %3931 = vmatprep.mubr.bf16.mxu1 %v3072_v39  ;;  %v10968_v36 = vld [vmem:[%s13525_s5 + $0x1d8] sm:$0xff]  }
 0xa1a   : > { %v2562_v59 = vadd.f32 %v2561_v52, %v2213_v19  ;;  %v2605_v60 = vadd.f32 %v2604_v55, %v2221_v20  ;;  %v2563_v61 = vpop.f32.mrb[27].mxu0  ;;  %v2606_v0 = vpop.f32.mrb[31].mxu1  ;;  %3891 = vmatmul.mubr.bf16.vlgmr.msra.gmra.mrb[36].mxu0 %v3069_v34  ;;  %3932 = vmatmul.mubr.bf16.vlgmr.msra.gmra.mrb[40].mxu1 %v3071_v35  ;;  %v2785_v12 = vmax.f32 %v2558_v44, 0.0  ;;  %v2787_v13 = vmax.f32 %v2601_v11, 0.0  ;;  %v10967_v35 = vld [vmem:[%s13525_s5 + $0x158] sm:$0xff]  }
 0xa1b   : > { %v2564_v5 = vadd.f32 %v2563_v61, %v2217_v23  ;;  %v2607_v6 = vadd.f32 %v2606_v0, %v2225_v24  ;;  %10124 = vmatpush3.bf16.msra.mxu0 %v10957_v42  ;;  %10146 = vmatpush3.bf16.msra.mxu1 %v10958_v43  ;;  %v2786_v18 = vmax.f32 %v2560_v50, 0.0  ;;  %v2788_v19 = vmax.f32 %v2603_v51, 0.0  ;;  %v10969_v52 = vld [vmem:[%s13525_s5 + $0x118] sm:$0xff]   ;;  %v10971_v0 = vld [vmem:[%s13525_s5 + $0x160] sm:$0xff]  }
 0xa1c   : > { %v2801_v8 = vmax.f32 %v2562_v59, 0.0  ;;  %v2803_v14 = vmax.f32 %v2605_v60, 0.0  ;;  %10125 = vmatprep.subr.bf16.mxu0 %v10959_v47  ;;  %10147 = vmatprep.subr.bf16.mxu1 %v10960_v48  ;;  %v2245_v43 = vrot.slane %v12007_v33, %v11992_v62  ;;  %v2253_v47 = vrot.slane %v12007_v33, %v11994_v63 }
 0xa1d   : > { %v2802_v20 = vmax.f32 %v2564_v5, 0.0  ;;  %v2804_v21 = vmax.f32 %v2607_v6, 0.0  ;;  %v2249_v48 = vrot.slane %v12007_v33, %v11996_v3  ;;  %v2257_v55 = vrot.slane %v12007_v33, %v11998_v4 }
 0xa1e   : > { %v12041_v22 = vpack.c.bf16 %v2801_v8, %v2785_v12  ;;  %v12043_v23 = vpack.c.bf16 %v2803_v14, %v2787_v13 }
 0xa1f   : > { %v3074_v24 = vpack.c.bf16 %v2802_v20, %v2786_v18  ;;  %v3076_v25 = vpack.c.bf16 %v2804_v21, %v2788_v19  ;;  %10126 = vmatpush3.bf16.msra.mxu0 %v10961_v7  ;;  %10148 = vmatpush3.bf16.msra.mxu1 %v10962_v9  ;;  %v2643_v26 = vpop.f32.mrb[28].mxu0  ;;  %v2686_v27 = vpop.f32.mrb[32].mxu1 }
 0xa20   : > { %v2644_v30 = vadd.f32 %v2643_v26, %v2229_v49  ;;  %v2687_v31 = vadd.f32 %v2686_v27, %v2237_v58  ;;  %v2645_v32 = vpop.f32.mrb[29].mxu0  ;;  %v2688_v34 = vpop.f32.mrb[33].mxu1  ;;  %10127 = vmatprep.subr.bf16.mxu0 %v10963_v16  ;;  %10149 = vmatprep.subr.bf16.mxu1 %v10964_v17  ;;  %v10973_v16 = vld [vmem:[%s13525_s5 + $0x120] sm:$0xff]  }
 0xa21   : > { %v2646_v39 = vadd.f32 %v2645_v32, %v2233_v2  ;;  %v2689_v37 = vadd.f32 %v2688_v34, %v2241_v10  ;;  %v2647_v41 = vpop.f32.mrb[30].mxu0  ;;  %v2690_v42 = vpop.f32.mrb[34].mxu1  ;;  %3972 = vmatprep.mubr.bf16.mxu0 %v3074_v24  ;;  %4013 = vmatprep.mubr.bf16.mxu1 %v3076_v25  ;;  %v10974_v17 = vld [vmem:[%s13525_s5 + $0x1a0] sm:$0xff]   ;;  %v10975_v24 = vld [vmem:[%s13525_s5 + $0x168] sm:$0xff]  }
 0xa22   : > { %v2648_v44 = vadd.f32 %v2647_v41, %v2229_v49  ;;  %v2691_v11 = vadd.f32 %v2690_v42, %v2237_v58  ;;  %v2649_v45 = vpop.f32.mrb[31].mxu0  ;;  %v2692_v46 = vpop.f32.mrb[35].mxu1  ;;  %v10970_v49 = vld [vmem:[%s13525_s5 + $0x198] sm:$0xff]   ;;  %v2789_v58 = vmax.f32 %v2644_v30, 0.0  ;;  %v2791_v59 = vmax.f32 %v2687_v31, 0.0  ;;  %v10976_v25 = vld [vmem:[%s13525_s5 + $0x1e8] sm:$0xff]  }
 0xa23   : > { %v2650_v50 = vadd.f32 %v2649_v45, %v2233_v2  ;;  %v2693_v51 = vadd.f32 %v2692_v46, %v2241_v10  ;;  %10128 = vmatpush3.bf16.msra.mxu0 %v10965_v28  ;;  %10150 = vmatpush3.bf16.msra.mxu1 %v10966_v29  ;;  %v10972_v2 = vld [vmem:[%s13525_s5 + $0x1e0] sm:$0xff]   ;;  %v2790_v5 = vmax.f32 %v2646_v39, 0.0  ;;  %v2792_v6 = vmax.f32 %v2689_v37, 0.0  ;;  %v10977_v39 = vld [vmem:[%s13525_s5 + $0x128] sm:$0xff]   ;;  %v10980_v45 = vld [vmem:[%s13525_s5 + $0x1f0] sm:$0xff]  }
 0xa24   : > { %v2805_v60 = vmax.f32 %v2648_v44, 0.0  ;;  %v2807_v61 = vmax.f32 %v2691_v11, 0.0  ;;  %10129 = vmatprep.subr.bf16.mxu0 %v10967_v35  ;;  %10151 = vmatprep.subr.bf16.mxu1 %v10968_v36  ;;  %v10978_v37 = vld [vmem:[%s13525_s5 + $0x1a8] sm:$0xff]  }
 0xa25   : > { %v2806_v7 = vmax.f32 %v2650_v50, 0.0  ;;  %v2808_v9 = vmax.f32 %v2693_v51, 0.0 }
 0xa26   : > { %v12077_v10 = vpack.c.bf16 %v2805_v60, %v2789_v58  ;;  %v12079_v33 = vpack.c.bf16 %v2807_v61, %v2791_v59  ;;  %v10981_v58 = vld [vmem:[%s13525_s5 + $0x130] sm:$0xff]   ;;  %v10983_v60 = vld [vmem:[%s13525_s5 + $0x178] sm:$0xff]  }
 0xa27   : > { %v12081_v12 = vpack.c.bf16 %v2806_v7, %v2790_v5  ;;  %v12083_v13 = vpack.c.bf16 %v2808_v9, %v2792_v6  ;;  %10130 = vmatpush3.bf16.msra.mxu0 %v10969_v52  ;;  %10152 = vmatpush3.bf16.msra.mxu1 %v10970_v49  ;;  %v2729_v8 = vpop.f32.mrb[32].mxu0  ;;  %v2772_v14 = vpop.f32.mrb[36].mxu1  ;;  %v10982_v59 = vld [vmem:[%s13525_s5 + $0x1b0] sm:$0xff]   ;;  %v10984_v61 = vld [vmem:[%s13525_s5 + $0x1f8] sm:$0xff]   ;;  %v10987_v5 = vld [vmem:[%s13525_s5 + $0x240] sm:$0xff]  }
 0xa28   : > { %v2730_v18 = vadd.f32 %v2729_v8, %v2245_v43  ;;  %v2773_v19 = vadd.f32 %v2772_v14, %v2253_v47  ;;  %v2731_v20 = vpop.f32.mrb[33].mxu0  ;;  %v2774_v21 = vpop.f32.mrb[37].mxu1  ;;  %10131 = vmatprep.subr.bf16.mxu0 %v10971_v0  ;;  %10153 = vmatprep.subr.bf16.mxu1 %v10972_v2  ;;  %v10985_v0 = vld [vmem:[%s13525_s5 + $0x138] sm:$0xff]   ;;  %v10988_v6 = vld [vmem:[%s13525_s5 + $0x2c0] sm:$0xff]   ;;  %v10991_v8 = vld [vmem:[%s13525_s5 + $0x248] sm:$0xff]  }
 0xa29   : > { %v2732_v26 = vadd.f32 %v2731_v20, %v2249_v48  ;;  %v2775_v27 = vadd.f32 %v2774_v21, %v2257_v55  ;;  %v2733_v28 = vpop.f32.mrb[34].mxu0  ;;  %v2776_v29 = vpop.f32.mrb[38].mxu1  ;;  %v10986_v2 = vld [vmem:[%s13525_s5 + $0x1b8] sm:$0xff]   ;;  %v10989_v7 = vld [vmem:[%s13525_s5 + $0x200] sm:$0xff]   ;;  %v10992_v14 = vld [vmem:[%s13525_s5 + $0x2c8] sm:$0xff]  }
 0xa2a   : > { %v2734_v30 = vadd.f32 %v2733_v28, %v2245_v43  ;;  %v2777_v31 = vadd.f32 %v2776_v29, %v2253_v47  ;;  %v2735_v32 = vpop.f32.mrb[35].mxu0  ;;  %v2778_v34 = vpop.f32.mrb[39].mxu1  ;;  %v2793_v41 = vmax.f32 %v2730_v18, 0.0  ;;  %v2795_v42 = vmax.f32 %v2773_v19, 0.0  ;;  %v10979_v43 = vld [vmem:[%s13525_s5 + $0x170] sm:$0xff]   ;;  %v10990_v9 = vld [vmem:[%s13525_s5 + $0x280] sm:$0xff]  }
 0xa2b   : > { %v2736_v35 = vadd.f32 %v2735_v32, %v2249_v48  ;;  %v2779_v36 = vadd.f32 %v2778_v34, %v2257_v55  ;;  %10132 = vmatpush3.bf16.msra.mxu0 %v10973_v16  ;;  %10154 = vmatpush3.bf16.msra.mxu1 %v10974_v17  ;;  %v2794_v46 = vmax.f32 %v2732_v26, 0.0  ;;  %v2796_v47 = vmax.f32 %v2775_v27, 0.0  ;;  %v10993_v16 = vld [vmem:[%s13525_s5 + $0x208] sm:$0xff]   ;;  %v10999_v18 = vld [vmem:[%s13525_s5 + $0x258] sm:$0xff]   ;;  %v11005_v26 = vld [vmem:[%s13525_s5 + $0x220] sm:$0xff]  }
 0xa2c   : > { %v2809_v44 = vmax.f32 %v2734_v30, 0.0  ;;  %v2811_v11 = vmax.f32 %v2777_v31, 0.0  ;;  %10133 = vmatprep.subr.bf16.mxu0 %v10975_v24  ;;  %10155 = vmatprep.subr.bf16.mxu1 %v10976_v25  ;;  %v10994_v17 = vld [vmem:[%s13525_s5 + $0x288] sm:$0xff]   ;;  %v11000_v19 = vld [vmem:[%s13525_s5 + $0x2d8] sm:$0xff]   ;;  %v11003_v24 = vld [vmem:[%s13525_s5 + $0x260] sm:$0xff]  }
 0xa2d   : > { %v2810_v48 = vmax.f32 %v2736_v35, 0.0  ;;  %v2812_v50 = vmax.f32 %v2779_v36, 0.0  ;;  %v11001_v20 = vld [vmem:[%s13525_s5 + $0x218] sm:$0xff]   ;;  %v11004_v25 = vld [vmem:[%s13525_s5 + $0x2e0] sm:$0xff]   ;;  %v11007_v28 = vld [vmem:[%s13525_s5 + $0x268] sm:$0xff]  }
 0xa2e   : > { %v12109_v51 = vpack.c.bf16 %v2809_v44, %v2793_v41  ;;  %v12111_v52 = vpack.c.bf16 %v2811_v11, %v2795_v42  ;;  %v11002_v21 = vld [vmem:[%s13525_s5 + $0x298] sm:$0xff]   ;;  %v11006_v27 = vld [vmem:[%s13525_s5 + $0x2a0] sm:$0xff]   ;;  %v11008_v29 = vld [vmem:[%s13525_s5 + $0x2e8] sm:$0xff]  }
 0xa2f   : > { %v12113_v49 = vpack.c.bf16 %v2810_v48, %v2794_v46  ;;  %v12115_v55 = vpack.c.bf16 %v2812_v50, %v2796_v47  ;;  %10134 = vmatpush3.bf16.msra.mxu0 %v10977_v39  ;;  %10156 = vmatpush3.bf16.msra.mxu1 %v10978_v37  ;;  %v11009_v30 = vld [vmem:[%s13525_s5 + $0x228] sm:$0xff]   ;;  %v11011_v32 = vld [vmem:[%s13525_s5 + $0x270] sm:$0xff]   ;;  %v11015_v39 = vld [vmem:[%s13525_s5 + $0x278] sm:$0xff]  }
 0xa30   : > { %10135 = vmatprep.subr.bf16.mxu0 %v10979_v43  ;;  %10157 = vmatprep.subr.bf16.mxu1 %v10980_v45  ;;  %v11010_v31 = vld [vmem:[%s13525_s5 + $0x2a8] sm:$0xff]   ;;  %v11012_v34 = vld [vmem:[%s13525_s5 + $0x2f0] sm:$0xff]   ;;  %v11016_v37 = vld [vmem:[%s13525_s5 + $0x2f8] sm:$0xff]  }
 0xa31   : > { %v11013_v35 = vld [vmem:[%s13525_s5 + $0x230] sm:$0xff]   ;;  %v11017_v41 = vld [vmem:[%s13525_s5 + $0x238] sm:$0xff]   ;;  %v11019_v44 = vld [vmem:[%s13525_s5 + $0x340] sm:$0xff]  }
 0xa32   : > { %v11014_v36 = vld [vmem:[%s13525_s5 + $0x2b0] sm:$0xff]   ;;  %v11018_v42 = vld [vmem:[%s13525_s5 + $0x2b8] sm:$0xff]   ;;  %v11020_v11 = vld [vmem:[%s13525_s5 + $0x3c0] sm:$0xff]  }
 0xa33   : > { %10136 = vmatpush3.bf16.msra.mxu0 %v10981_v58  ;;  %10158 = vmatpush3.bf16.msra.mxu1 %v10982_v59  ;;  %v11021_v43 = vld [vmem:[%s13525_s5 + $0x300] sm:$0xff]   ;;  %v11023_v46 = vld [vmem:[%s13525_s5 + $0x348] sm:$0xff]   ;;  %v11030_v58 = vld [vmem:[%s13525_s5 + $0x390] sm:$0xff]  }
 0xa34   : > { %10137 = vmatprep.subr.bf16.mxu0 %v10983_v60  ;;  %10159 = vmatprep.subr.bf16.mxu1 %v10984_v61  ;;  %v11022_v45 = vld [vmem:[%s13525_s5 + $0x380] sm:$0xff]   ;;  %v11024_v47 = vld [vmem:[%s13525_s5 + $0x3c8] sm:$0xff]   ;;  %v11032_v59 = vld [vmem:[%s13525_s5 + $0x3d8] sm:$0xff]  }
 0xa35   : > { %v11025_v48 = vld [vmem:[%s13525_s5 + $0x308] sm:$0xff]   ;;  %v11033_v60 = vld [vmem:[%s13525_s5 + $0x318] sm:$0xff]  }
 0xa36   : > { %v11026_v50 = vld [vmem:[%s13525_s5 + $0x388] sm:$0xff]   ;;  %v11034_v61 = vld [vmem:[%s13525_s5 + $0x398] sm:$0xff]  }
 0xa37   : > { %10138 = vmatpush3.bf16.msra.mxu0 %v10985_v0  ;;  %10160 = vmatpush3.bf16.msra.mxu1 %v10986_v2  ;;  %v11035_v0 = vld [vmem:[%s13525_s5 + $0x360] sm:$0xff]  }
 0xa38   : > { %10167 = vmatprep.subr.bf16.mxu0 %v10987_v5  ;;  %10189 = vmatprep.subr.bf16.mxu1 %v10988_v6  ;;  %v11036_v2 = vld [vmem:[%s13525_s5 + $0x3e0] sm:$0xff]  }
 0xa39   : > { %v11037_v5 = vld [vmem:[%s13525_s5 + $0x320] sm:$0xff]  }
 0xa3a   : > { %3973 = vmatmul.mubr.bf16.vlgmr.msra.gmra.mrb[40].mxu0 %v12041_v22  ;;  %4014 = vmatmul.mubr.bf16.vlgmr.msra.gmra.mrb[44].mxu1 %v12043_v23  ;;  %v10995_v22 = vld [vmem:[%s13525_s5 + $0x250] sm:$0xff]   ;;  %v11038_v6 = vld [vmem:[%s13525_s5 + $0x3a0] sm:$0xff]  }
 0xa3b   : > { %10168 = vmatpush3.bf16.msra.mxu0 %v10989_v7  ;;  %4054 = vmatprep.mubr.bf16.mxu0 %v12081_v12  ;;  %v10996_v23 = vld [vmem:[%s13525_s5 + $0x2d0] sm:$0xff]   ;;  %v11039_v7 = vld [vmem:[%s13525_s5 + $0x368] sm:$0xff]  }
 0xa3c   : > { %10190 = vmatpush3.bf16.msra.mxu1 %v10990_v9  ;;  %4095 = vmatprep.mubr.bf16.mxu1 %v12083_v13  ;;  %v10997_v12 = vld [vmem:[%s13525_s5 + $0x210] sm:$0xff]   ;;  %v11040_v9 = vld [vmem:[%s13525_s5 + $0x3e8] sm:$0xff]  }
 0xa3d   : > { %10169 = vmatprep.subr.bf16.mxu0 %v10991_v8  ;;  %10191 = vmatprep.subr.bf16.mxu1 %v10992_v14  ;;  %v10998_v13 = vld [vmem:[%s13525_s5 + $0x290] sm:$0xff]   ;;  %v11041_v8 = vld [vmem:[%s13525_s5 + $0x328] sm:$0xff]  }
 0xa3e   : > { %v11042_v14 = vld [vmem:[%s13525_s5 + $0x3a8] sm:$0xff]  }
 0xa3f   : > { %10170 = vmatpush3.bf16.msra.mxu0 %v10993_v16  ;;  %v11043_v16 = vld [vmem:[%s13525_s5 + $0x370] sm:$0xff]  }
 0xa40   : > { %10192 = vmatpush3.bf16.msra.mxu1 %v10994_v17  ;;  %10171 = vmatprep.subr.bf16.mxu0 %v10995_v22  ;;  %v11044_v17 = vld [vmem:[%s13525_s5 + $0x3f0] sm:$0xff]  }
 0xa41   : > { %10193 = vmatprep.subr.bf16.mxu1 %v10996_v23  ;;  %v11045_v22 = vld [vmem:[%s13525_s5 + $0x330] sm:$0xff]  }
 0xa42   : > { %v11046_v23 = vld [vmem:[%s13525_s5 + $0x3b0] sm:$0xff]  }
 0xa43   : > { %10172 = vmatpush3.bf16.msra.mxu0 %v10997_v12  ;;  %v11047_v12 = vld [vmem:[%s13525_s5 + $0x378] sm:$0xff]  }
 0xa44   : > { %10194 = vmatpush3.bf16.msra.mxu1 %v10998_v13  ;;  %10173 = vmatprep.subr.bf16.mxu0 %v10999_v18  ;;  %v11048_v13 = vld [vmem:[%s13525_s5 + $0x3f8] sm:$0xff]  }
 0xa45   : > { %10195 = vmatprep.subr.bf16.mxu1 %v11000_v19  ;;  %v11049_v18 = vld [vmem:[%s13525_s5 + $0x338] sm:$0xff]  }
 0xa46   : > { %v11050_v19 = vld [vmem:[%s13525_s5 + $0x3b8] sm:$0xff]  }
 0xa47   : > { %10174 = vmatpush3.bf16.msra.mxu0 %v11001_v20  ;;  %v11051_v20 = vld [vmem:[%s13526_s6] sm:$0xff]  }
 0xa48   : > { %10196 = vmatpush3.bf16.msra.mxu1 %v11002_v21  ;;  %10175 = vmatprep.subr.bf16.mxu0 %v11003_v24  ;;  %v12346_v21 = vld [vmem:[%s623_s4] sm:$0xff]  ;;  %v12348_v24 = vld [vmem:[%s623_s4 + $0x8] sm:$0xff]  ;;  %s13537_s4 = smov 40  }
 0xa49   : > { %10197 = vmatprep.subr.bf16.mxu1 %v11004_v25  ;;  %v11052_v25 = vld [vmem:[%s13526_s6 + $0x8] sm:$0xff]   ;;  %s610_s6 = sand.u32 1, %s11363_s30  }
 0xa4a   : > { %s13401_s2 = scalar_lea.sflag [#allocation3], %s610_s6 }
 0xa4b   : > { %10176 = vmatpush3.bf16.msra.mxu0 %v11005_v26 }
 0xa4c   : > { %10198 = vmatpush3.bf16.msra.mxu1 %v11006_v27  ;;  %10177 = vmatprep.subr.bf16.mxu0 %v11007_v28  ;;  %v9655_v27 = vld [vmem:[%s13457_s14 + $0x3] ss:$0 sm:$0xff] }
 0xa4d   : > { %10199 = vmatprep.subr.bf16.mxu1 %v11008_v29 }
 0xa4f   : > { %10178 = vmatpush3.bf16.msra.mxu0 %v11009_v30 }
 0xa50   : > { %10200 = vmatpush3.bf16.msra.mxu1 %v11010_v31  ;;  %10179 = vmatprep.subr.bf16.mxu0 %v11011_v32 }
 0xa51   : > { %10201 = vmatprep.subr.bf16.mxu1 %v11012_v34 }
 0xa53   : > { %10180 = vmatpush3.bf16.msra.mxu0 %v11013_v35 }
 0xa54   : > { %10202 = vmatpush3.bf16.msra.mxu1 %v11014_v36  ;;  %10181 = vmatprep.subr.bf16.mxu0 %v11015_v39 }
 0xa55   : > { %10203 = vmatprep.subr.bf16.mxu1 %v11016_v37 }
 0xa57   : > { %10182 = vmatpush3.bf16.msra.mxu0 %v11017_v41 }
 0xa58   : > { %10204 = vmatpush3.bf16.msra.mxu1 %v11018_v42  ;;  %10211 = vmatprep.subr.bf16.mxu0 %v11019_v44 }
 0xa59   : > { %10233 = vmatprep.subr.bf16.mxu1 %v11020_v11 }
 0xa5a   : > { %4055 = vmatmul.mubr.bf16.vlgmr.msra.gmra.mrb[44].mxu0 %v12077_v10  ;;  %v11027_v10 = vld [vmem:[%s13525_s5 + $0x350] sm:$0xff]  }
 0xa5b   : > { %4096 = vmatmul.mubr.bf16.vlgmr.msra.gmra.mrb[48].mxu1 %v12079_v33  ;;  %10212 = vmatpush3.bf16.msra.mxu0 %v11021_v43  ;;  %v11028_v33 = vld [vmem:[%s13525_s5 + $0x3d0] sm:$0xff]  }
 0xa5c   : > { %4136 = vmatprep.mubr.bf16.mxu0 %v12113_v49  ;;  %10234 = vmatpush3.bf16.msra.mxu1 %v11022_v45  ;;  %v11029_v49 = vld [vmem:[%s13525_s5 + $0x310] sm:$0xff]  }
 0xa5d   : > { %4177 = vmatprep.mubr.bf16.mxu1 %v12115_v55  ;;  %10213 = vmatprep.subr.bf16.mxu0 %v11023_v46  ;;  %v11031_v55 = vld [vmem:[%s13525_s5 + $0x358] sm:$0xff]   ;;  %s11315_s5 = scalar_lea.vmem %s11314_s23, 512 }
 0xa5e   : > { %10235 = vmatprep.subr.bf16.mxu1 %v11024_v47 }
 0xa5f   : > { %10214 = vmatpush3.bf16.msra.mxu0 %v11025_v48 }
 0xa60   : > { %10236 = vmatpush3.bf16.msra.mxu1 %v11026_v50  ;;  %10215 = vmatprep.subr.bf16.mxu0 %v11027_v10 }
 0xa61   : > { %10237 = vmatprep.subr.bf16.mxu1 %v11028_v33 }
 0xa63   : > { %10216 = vmatpush3.bf16.msra.mxu0 %v11029_v49 }
 0xa64   : > { %10238 = vmatpush3.bf16.msra.mxu1 %v11030_v58  ;;  %10217 = vmatprep.subr.bf16.mxu0 %v11031_v55 }
 0xa65   : > { %10239 = vmatprep.subr.bf16.mxu1 %v11032_v59 }
 0xa67   : > { %10218 = vmatpush3.bf16.msra.mxu0 %v11033_v60 }
 0xa68   : > { %10240 = vmatpush3.bf16.msra.mxu1 %v11034_v61  ;;  %10219 = vmatprep.subr.bf16.mxu0 %v11035_v0 }
 0xa69   : > { %10241 = vmatprep.subr.bf16.mxu1 %v11036_v2 }
 0xa6b   : > { %10220 = vmatpush3.bf16.msra.mxu0 %v11037_v5 }
 0xa6c   : > { %10242 = vmatpush3.bf16.msra.mxu1 %v11038_v6  ;;  %10221 = vmatprep.subr.bf16.mxu0 %v11039_v7 }
 0xa6d   : > { %10243 = vmatprep.subr.bf16.mxu1 %v11040_v9 }
 0xa6f   : > { %10222 = vmatpush3.bf16.msra.mxu0 %v11041_v8 }
 0xa70   : > { %10244 = vmatpush3.bf16.msra.mxu1 %v11042_v14  ;;  %10223 = vmatprep.subr.bf16.mxu0 %v11043_v16 }
 0xa71   : > { %10245 = vmatprep.subr.bf16.mxu1 %v11044_v17 }
 0xa73   : > { %10224 = vmatpush3.bf16.msra.mxu0 %v11045_v22 }
 0xa74   : > { %10246 = vmatpush3.bf16.msra.mxu1 %v11046_v23  ;;  %10225 = vmatprep.subr.bf16.mxu0 %v11047_v12 }
 0xa75   : > { %10247 = vmatprep.subr.bf16.mxu1 %v11048_v13 }
 0xa77   : > { %10226 = vmatpush3.bf16.msra.mxu0 %v11049_v18 }
 0xa78   : > { %10248 = vmatpush3.bf16.msra.mxu1 %v11050_v19  ;;  %10609 = vmatprep.subr.bf16.mxu0 %v11373_v1 }
 0xa79   : > { %10617 = vmatprep.subr.mxu1 %v11373_v1 }
 0xa7a   : > { %4137 = vmatmul.mubr.bf16.vlgmr.msra.gmra.mrb[48].mxu0 %v12109_v51  ;;  %v4235_v51 = vpack.c.bf16 %v12348_v24, %v12346_v21 }
 0xa7b   : > { %4178 = vmatmul.mubr.bf16.vlgmr.msra.gmra.mrb[52].mxu1 %v12111_v52  ;;  %10610 = vmatpush3.bf16.msra.mxu0 %v11051_v20 }
 0xa7c   : > { %10611 = vmatprep.subr.bf16.mxu0 %v11373_v1  ;;  %10613 = vmatprep.mubr.msk.bf16.mxu0 %vm11374_vm0, %v11373_v1 }
 0xa7d   : > { %10619 = vmatprep.mubr.msk.f32.mxu1 %vm11374_vm0, %v11373_v1 }
 0xa7f   : > { %10612 = vmatpush3.bf16.msra.mxu0 %v11052_v25 }
 0xa80   : > { %10622 = vmatprep.subr.mxu0 %v11373_v1 }
 0xa82   : > { %10614 = vmatmul.mubr.msk.bf16.vlgmr.msra.gmra.mrb[52].mxu0 %vm651_vm1, %v4235_v51 }
 0xa83   : > { %10624 = vmatprep.mubr.msk.f32.mxu0 %vm11374_vm0, %v11373_v1 }
 0xaed   : > { %v10095_v52 = vpop.f32.mrb[36].mxu0  ;;  %v10117_v26 = vpop.f32.mrb[40].mxu1 }
 0xaee   : > { %v10096_v28 = vpop.f32.mrb[37].mxu0  ;;  %v10118_v29 = vpop.f32.mrb[41].mxu1 }
 0xaef   : > { %v10097_v30 = vadd.f32 %v10096_v28, %v10095_v52  ;;  %v10119_v31 = vadd.f32 %v10118_v29, %v10117_v26  ;;  %v10098_v32 = vpop.f32.mrb[38].mxu0  ;;  %v10120_v34 = vpop.f32.mrb[42].mxu1 }
 0xaf0   : > { %v10099_v35 = vpop.f32.mrb[39].mxu0  ;;  %v10121_v36 = vpop.f32.mrb[43].mxu1 }
 0xaf1   : > { %v3893_v39 = vadd.f32 %v10097_v30, %v9655_v27  ;;  %v10100_v37 = vadd.f32 %v10099_v35, %v10098_v32  ;;  %v10122_v41 = vadd.f32 %v10121_v36, %v10120_v34 }
 0xaf3   : > { %v3934_v42 = vadd.f32 %v10119_v31, %v3893_v39  ;;  %v3896_v44 = vadd.f32 %v10100_v37, %v9655_v27 }
 0xaf5   : > { %v3937_v11 = vadd.f32 %v10122_v41, %v3896_v44 }
 0xb0d   : > { %v10139_v43 = vpop.f32.mrb[40].mxu0  ;;  %v10161_v45 = vpop.f32.mrb[44].mxu1 }
 0xb0e   : > { %v10140_v46 = vpop.f32.mrb[41].mxu0  ;;  %v10162_v47 = vpop.f32.mrb[45].mxu1 }
 0xb0f   : > { %v10141_v48 = vadd.f32 %v10140_v46, %v10139_v43  ;;  %v10163_v50 = vadd.f32 %v10162_v47, %v10161_v45  ;;  %v10142_v10 = vpop.f32.mrb[42].mxu0  ;;  %v10164_v33 = vpop.f32.mrb[46].mxu1 }
 0xb10   : > { %v10143_v49 = vpop.f32.mrb[43].mxu0  ;;  %v10165_v58 = vpop.f32.mrb[47].mxu1 }
 0xb11   : > { %v3975_v55 = vadd.f32 %v10141_v48, %v3934_v42  ;;  %v10144_v59 = vadd.f32 %v10143_v49, %v10142_v10  ;;  %v10166_v60 = vadd.f32 %v10165_v58, %v10164_v33  ;;  %v9786_v42 = vld [vmem:[%s13459_s16 + $0x1] ss:$0 sm:$0xff] }
 0xb13   : > { %v4016_v61 = vadd.f32 %v10163_v50, %v3975_v55  ;;  %v3978_v0 = vadd.f32 %v10144_v59, %v3937_v11 }
 0xb15   : > { %v4019_v2 = vadd.f32 %v10166_v60, %v3978_v0 }
 0xb2d   : > { %v10183_v5 = vpop.f32.mrb[44].mxu0 }
 0xb2e   : > { %v10205_v6 = vpop.f32.mrb[48].mxu1  ;;  %v10184_v7 = vpop.f32.mrb[45].mxu0 }
 0xb2f   : > { %v10185_v9 = vadd.f32 %v10184_v7, %v10183_v5  ;;  %v10206_v8 = vpop.f32.mrb[49].mxu1  ;;  %v10186_v14 = vpop.f32.mrb[46].mxu0 }
 0xb30   : > { %v10207_v16 = vadd.f32 %v10206_v8, %v10205_v6  ;;  %v10208_v17 = vpop.f32.mrb[50].mxu1  ;;  %v10187_v22 = vpop.f32.mrb[47].mxu0 }
 0xb31   : > { %v4057_v23 = vadd.f32 %v10185_v9, %v4016_v61  ;;  %v10188_v12 = vadd.f32 %v10187_v22, %v10186_v14  ;;  %v10209_v13 = vpop.f32.mrb[51].mxu1 }
 0xb32   : > { %v10210_v18 = vadd.f32 %v10209_v13, %v10208_v17 }
 0xb33   : > { %v4098_v19 = vadd.f32 %v10207_v16, %v4057_v23  ;;  %v4060_v20 = vadd.f32 %v10188_v12, %v4019_v2 }
 0xb35   : > { %v4101_v25 = vadd.f32 %v10210_v18, %v4060_v20 }
 0xb4d   : > { %v10227_v51 = vpop.f32.mrb[48].mxu0 }
 0xb4e   : > { %v10249_v52 = vpop.f32.mrb[52].mxu1  ;;  %v10228_v26 = vpop.f32.mrb[49].mxu0 }
 0xb4f   : > { %v10229_v27 = vadd.f32 %v10228_v26, %v10227_v51  ;;  %v10250_v28 = vpop.f32.mrb[53].mxu1  ;;  %v10230_v29 = vpop.f32.mrb[50].mxu0 }
 0xb50   : > { %v10251_v30 = vadd.f32 %v10250_v28, %v10249_v52  ;;  %v10252_v31 = vpop.f32.mrb[54].mxu1  ;;  %v10231_v32 = vpop.f32.mrb[51].mxu0 }
 0xb51   : > { %v4139_v34 = vadd.f32 %v10229_v27, %v4098_v19  ;;  %v10232_v35 = vadd.f32 %v10231_v32, %v10230_v29  ;;  %v10253_v36 = vpop.f32.mrb[55].mxu1 }
 0xb52   : > { %v10254_v39 = vadd.f32 %v10253_v36, %v10252_v31 }
 0xb53   : > { %v12368_v37 = vadd.f32 %v10251_v30, %v4139_v34  ;;  %v4142_v41 = vadd.f32 %v10232_v35, %v4101_v25 }
 0xb55   : > { %v12373_v44 = vadd.f32 %v10254_v39, %v4142_v41  ;;  %v4289_v11 = vpop.f32.mrb[52].mxu0 }
 0xb56   : > { %v12375_v43 = vadd.f32 %v9786_v42, %v4289_v11  ;;  %v10615_v45 = vpop.f32.mrb[53].mxu0 }
 0xb57   : > { %v4292_v46 = vpop.f32.mrb[54].mxu0 }
 0xb58   : > { %4462 = vrot.lane.b32.xlu1 %v12375_v43, %s13529_s21  ;;  %4297 = vrot.lane.b32.xlu0 %v12375_v43, %s13530_s26  ;;  %v10616_v47 = vpop.f32.mrb[55].mxu0  ;;  %v12389_v48 = vadd.f32 %v9786_v42, %v4292_v46 }
 0xb5c   : > { %4460 = vrot.lane.b32.xlu1 %v12375_v43, %s13531_s19  ;;  %4627 = vrot.lane.b32.xlu0 %v12375_v43, %s13521_s27 }
 0xb60   : > { %4625 = vrot.lane.b32.xlu1 %v12375_v43, %s13532_s20  ;;  %4792 = vrot.lane.b32.xlu0 %v12375_v43, %s13533_s0 }
 0xb64   : > { %4790 = vrot.lane.b32.xlu1 %v12375_v43, %s13534_s28  ;;  %4971 = vrot.lane.b32.xlu0 %v12389_v48, %s13530_s26 }
 0xb68   : > { %5136 = vrot.lane.b32.xlu1 %v12389_v48, %s13529_s21  ;;  %5134 = vrot.lane.b32.xlu0 %v12389_v48, %s13531_s19 }
 0xb6c   : > { %5301 = vrot.lane.b32.xlu1 %v12389_v48, %s13521_s27  ;;  %5299 = vrot.lane.b32.xlu0 %v12389_v48, %s13532_s20 }
 0xb70   : > { %5466 = vrot.lane.b32.xlu1 %v12389_v48, %s13533_s0  ;;  %5464 = vrot.lane.b32.xlu0 %v12389_v48, %s13534_s28 }
 0xb74   : > { %4384 = vrot.lane.b32.xlu1 %v12375_v43, %s13522_s22 }
 0xbca   : > { %v4463_v50 = vpop.permute.xlu1 %4462  ;;  %v4298_v10 = vpop.permute.xlu0 %4297 }
 0xbcb   : > { %10618 = vmatpush3.xpose.msk.msra.mxu1 %vm699_vm2, %v4298_v10 }
 0xbcc   : > { %10627 = vmatprep.subr.mxu1 %v11373_v1 }
 0xbce   : > { %v4461_v33 = vpop.permute.xlu1 %4460  ;;  %10620 = vmatmul.mubr.msk.f32.vlgmr.msra.gmra.mrb[18].mxu1 %vm699_vm2, %v12375_v43  ;;  %v4628_v49 = vpop.permute.xlu0 %4627 }
 0xbcf   : > { %10628 = vmatpush3.xpose.msk.msra.mxu1 %vm699_vm2, %v4463_v50  ;;  %10629 = vmatprep.mubr.msk.f32.mxu1 %vm11374_vm0, %v11373_v1 }
 0xbd0   : > { %10637 = vmatprep.subr.mxu1 %v11373_v1 }
 0xbd2   : > { %v4626_v58 = vpop.permute.xlu1 %4625  ;;  %10630 = vmatmul.mubr.msk.f32.vlgmr.msra.gmra.mrb[56].mxu1 %vm699_vm2, %v4461_v33  ;;  %v4793_v55 = vpop.permute.xlu0 %4792 }
 0xbd3   : > { %10638 = vmatpush3.xpose.msk.msra.mxu1 %vm699_vm2, %v4628_v49  ;;  %10639 = vmatprep.mubr.msk.f32.mxu1 %vm11374_vm0, %v11373_v1 }
 0xbd4   : > { %10647 = vmatprep.subr.mxu1 %v11373_v1 }
 0xbd6   : > { %v4791_v59 = vpop.permute.xlu1 %4790  ;;  %10640 = vmatmul.mubr.msk.f32.vlgmr.msra.gmra.mrb[58].mxu1 %vm699_vm2, %v4626_v58  ;;  %v4972_v60 = vpop.permute.xlu0 %4971 }
 0xbd7   : > { %10648 = vmatpush3.xpose.msk.msra.mxu1 %vm699_vm2, %v4793_v55  ;;  %10649 = vmatprep.mubr.msk.f32.mxu1 %vm11374_vm0, %v11373_v1 }
 0xbd8   : > { %10657 = vmatprep.subr.mxu1 %v11373_v1 }
 0xbda   : > { %10650 = vmatmul.mubr.msk.f32.vlgmr.msra.gmra.mrb[60].mxu1 %vm699_vm2, %v4791_v59  ;;  %v5137_v61 = vpop.permute.xlu1 %5136  ;;  %v5135_v0 = vpop.permute.xlu0 %5134 }
 0xbdb   : > { %10658 = vmatpush3.xpose.msk.msra.mxu1 %vm699_vm2, %v4972_v60  ;;  %10659 = vmatprep.mubr.msk.f32.mxu1 %vm11374_vm0, %v11373_v1 }
 0xbdc   : > { %10667 = vmatprep.subr.mxu1 %v11373_v1 }
 0xbde   : > { %v5302_v2 = vpop.permute.xlu1 %5301  ;;  %10660 = vmatmul.mubr.msk.f32.vlgmr.msra.gmra.mrb[62].mxu1 %vm699_vm2, %v12389_v48  ;;  %v5300_v6 = vpop.permute.xlu0 %5299 }
 0xbdf   : > { %10668 = vmatpush3.xpose.msk.msra.mxu1 %vm699_vm2, %v5137_v61  ;;  %10669 = vmatprep.mubr.msk.f32.mxu1 %vm11374_vm0, %v11373_v1 }
 0xbe0   : > { %10677 = vmatprep.subr.mxu1 %v11373_v1 }
 0xbe2   : > { %v5467_v5 = vpop.permute.xlu1 %5466  ;;  %10670 = vmatmul.mubr.msk.f32.vlgmr.msra.gmra.mrb[64].mxu1 %vm699_vm2, %v5135_v0  ;;  %v5465_v9 = vpop.permute.xlu0 %5464 }
 0xbe3   : > { %10678 = vmatpush3.xpose.msk.msra.mxu1 %vm699_vm2, %v5302_v2  ;;  %10679 = vmatprep.mubr.msk.f32.mxu1 %vm11374_vm0, %v11373_v1 }
 0xbe4   : > { %10687 = vmatprep.subr.mxu1 %v11373_v1 }
 0xbe6   : > { %v4385_v7 = vpop.permute.xlu1 %4384  ;;  %10680 = vmatmul.mubr.msk.f32.vlgmr.msra.gmra.mrb[66].mxu1 %vm699_vm2, %v5300_v6 }
 0xbe7   : > { %10623 = vmatpush3.msra.mxu0 %v4385_v7  ;;  %10688 = vmatpush3.xpose.msk.msra.mxu1 %vm699_vm2, %v5467_v5 }
 0xbe8   : > { %10689 = vmatprep.mubr.msk.f32.mxu1 %vm11374_vm0, %v11373_v1  ;;  %10632 = vmatprep.subr.mxu0 %v11373_v1 }
 0xbe9   : > { %10697 = vmatprep.subr.bf16.mxu1 %v11373_v1 }
 0xbea   : > { %10690 = vmatmul.mubr.msk.f32.vlgmr.msra.gmra.mrb[68].mxu1 %vm699_vm2, %v5465_v9 }
 0xbeb   : > { %10701 = vmatprep.mubr.msk.bf16.mxu1 %vm11374_vm0, %v11373_v1 }
 0xca1   : > { %v4369_v8 = vpop.f32.mrb[18].mxu1 }
 0xca2   : > { %v10621_v14 = vpop.f32.mrb[19].mxu1  ;;  %v4373_v16 = vsel %vm699_vm2, %v4369_v8, -inf }
 0xca3   : > { %4374 = vmax.xlane.f32.xlu1 %v4373_v16 }
 0xca5   : > { %v4534_v17 = vpop.f32.mrb[56].mxu1 }
 0xca6   : > { %v10631_v22 = vpop.f32.mrb[57].mxu1  ;;  %v4538_v23 = vsel %vm699_vm2, %v4534_v17, -inf }
 0xca7   : > { %4539 = vmax.xlane.f32.xlu0 %v4538_v23 }
 0xca9   : > { %v4699_v12 = vpop.f32.mrb[58].mxu1 }
 0xcaa   : > { %v10641_v13 = vpop.f32.mrb[59].mxu1  ;;  %v4703_v18 = vsel %vm699_vm2, %v4699_v12, -inf }
 0xcab   : > { %4704 = vmax.xlane.f32.xlu0 %v4703_v18 }
 0xcad   : > { %v4864_v19 = vpop.f32.mrb[60].mxu1 }
 0xcae   : > { %v10651_v20 = vpop.f32.mrb[61].mxu1  ;;  %v4868_v25 = vsel %vm699_vm2, %v4864_v19, -inf }
 0xcaf   : > { %4869 = vmax.xlane.f32.xlu1 %v4868_v25 }
 0xcb1   : > { %v5043_v51 = vpop.f32.mrb[62].mxu1 }
 0xcb2   : > { %v10661_v52 = vpop.f32.mrb[63].mxu1  ;;  %v5047_v26 = vsel %vm699_vm2, %v5043_v51, -inf }
 0xcb3   : > { %5048 = vmax.xlane.f32.xlu0 %v5047_v26 }
 0xcb5   : > { %v5208_v27 = vpop.f32.mrb[64].mxu1 }
 0xcb6   : > { %v10671_v28 = vpop.f32.mrb[65].mxu1  ;;  %v5212_v29 = vsel %vm699_vm2, %v5208_v27, -inf }
 0xcb7   : > { %5213 = vmax.xlane.f32.xlu1 %v5212_v29 }
 0xcb9   : > { %v5373_v30 = vpop.f32.mrb[66].mxu1 }
 0xcba   : > { %v10681_v31 = vpop.f32.mrb[67].mxu1  ;;  %v5377_v32 = vsel %vm699_vm2, %v5373_v30, -inf }
 0xcbb   : > { %5378 = vmax.xlane.f32.xlu0 %v5377_v32 }
 0xcbd   : > { %v5538_v34 = vpop.f32.mrb[68].mxu1 }
 0xcbe   : > { %v10691_v35 = vpop.f32.mrb[69].mxu1  ;;  %v5542_v36 = vsel %vm699_vm2, %v5538_v34, -inf }
 0xcc8   : > { %4714 = vrot.lane.b32.xlu1 %v12375_v43, %s13535_s29 }
 0xcd1   : > { %4549 = vrot.lane.b32.xlu0 %v12375_v43, %s13536_s24 }
 0xcec   : > { %5543 = vmax.xlane.f32.xlu1 %v5542_v36 }
 0xcfd   : > { %4879 = vrot.lane.b32.xlu1 %v12375_v43, %s13537_s4 }
 0xd30   : > { %v4375_v39 = vpop.xlane.xlu1 %4374 }
 0xd31   : > { %v4376_v41 = vsub.f32 %v4369_v8, %v4375_v39 }
 0xd33   : > { %v4377_v42 = vmul.f32 1.442695, %v4376_v41 }
 0xd34   : > { %v4540_v11 = vpop.xlane.xlu0 %4539 }
 0xd35   : > { %11227 = vpow2.f32 %v4377_v42  ;;  %v4541_v45 = vsub.f32 %v4534_v17, %v4540_v11 }
 0xd37   : > { %v4542_v46 = vmul.f32 1.442695, %v4541_v45 }
 0xd38   : > { %v4705_v47 = vpop.xlane.xlu0 %4704 }
 0xd39   : > { %11229 = vpow2.f32 %v4542_v46  ;;  %v4706_v50 = vsub.f32 %v4699_v12, %v4705_v47 }
 0xd3b   : > { %v4707_v10 = vmul.f32 1.442695, %v4706_v50 }
 0xd3c   : > { %v4870_v60 = vpop.xlane.xlu1 %4869 }
 0xd3d   : > { %11231 = vpow2.f32 %v4707_v10  ;;  %v4871_v61 = vsub.f32 %v4864_v19, %v4870_v60 }
 0xd3f   : > { %v11228_v33 = vpop.eup %11227  ;;  %v4872_v6 = vmul.f32 1.442695, %v4871_v61 }
 0xd40   : > { %v4379_v49 = vsel %vm699_vm2, %v11228_v33, 0.0  ;;  %v5049_v0 = vpop.xlane.xlu0 %5048 }
 0xd41   : > { %4380 = vadd.xlane.f32.xlu0 %v4379_v49  ;;  %v5050_v5 = vsub.f32 %v5043_v51, %v5049_v0  ;;  %11233 = vpow2.f32 %v4872_v6 }
 0xd43   : > { %v11230_v58 = vpop.eup %11229  ;;  %v5051_v8 = vmul.f32 1.442695, %v5050_v5 }
 0xd44   : > { %v4544_v55 = vsel %vm699_vm2, %v11230_v58, 0.0  ;;  %v5214_v2 = vpop.xlane.xlu1 %5213 }
 0xd45   : > { %4545 = vadd.xlane.f32.xlu1 %v4544_v55  ;;  %v5215_v7 = vsub.f32 %v5208_v27, %v5214_v2  ;;  %11235 = vpow2.f32 %v5051_v8 }
 0xd47   : > { %v12468_v43 = vpop.eup %11231  ;;  %v5216_v14 = vmul.f32 1.442695, %v5215_v7 }
 0xd48   : > { %v4709_v59 = vsel %vm699_vm2, %v12468_v43, 0.0  ;;  %v5379_v9 = vpop.xlane.xlu0 %5378  ;;  %v4715_v22 = vpop.permute.xlu1 %4714 }
 0xd49   : > { %4710 = vadd.xlane.f32.xlu0 %v4709_v59  ;;  %v5380_v16 = vsub.f32 %v5373_v30, %v5379_v9  ;;  %11237 = vpow2.f32 %v5216_v14 }
 0xd4b   : > { %v5381_v17 = vmul.f32 1.442695, %v5380_v16  ;;  %v11234_v23 = vpop.eup %11233 }
 0xd4c   : > { %v4874_v18 = vsel %vm699_vm2, %v11234_v23, 0.0  ;;  %v4550_v30 = vpop.permute.xlu0 %4549 }
 0xd4d   : > { %11239 = vpow2.f32 %v5381_v17 }
 0xd4f   : > { %v12476_v12 = vpop.eup %11235 }
 0xd50   : > { %v5053_v52 = vsel %vm699_vm2, %v12476_v12, 0.0 }
 0xd53   : > { %v12479_v19 = vpop.eup %11237 }
 0xd54   : > { %v5218_v51 = vsel %vm699_vm2, %v12479_v19, 0.0 }
 0xd56   : > { %5058 = vrot.lane.b32.xlu1 %v12389_v48, %s13522_s22 }
 0xd57   : > { %v12485_v26 = vpop.eup %11239 }
 0xd58   : > { %v5383_v27 = vsel %vm699_vm2, %v12485_v26, 0.0 }
 0xd5f   : > { %5223 = vrot.lane.b32.xlu0 %v12389_v48, %s13536_s24  ;;  %s13539_s24 = smov 16  }
 0xd79   : > { %v5544_v13 = vpop.xlane.xlu1 %5543 }
 0xd7a   : > { %v5545_v20 = vsub.f32 %v5538_v34, %v5544_v13  ;;  %4875 = vadd.xlane.f32.xlu1 %v4874_v18  ;;  %v11053_v18 = vld [vmem:[%s13450_s7] sm:$0xff]  }
 0xd7b   : > { %10698 = vmatpush3.bf16.msra.mxu1 %v11053_v18 }
 0xd7c   : > { %v5546_v25 = vmul.f32 1.442695, %v5545_v20  ;;  %10699 = vmatprep.subr.bf16.mxu1 %v11373_v1 }
 0xd7d   : > { %v4880_v31 = vpop.permute.xlu1 %4879 }
 0xd7e   : > { %11241 = vpow2.f32 %v5546_v25  ;;  %5219 = vadd.xlane.f32.xlu1 %v5218_v51  ;;  %5054 = vadd.xlane.f32.xlu0 %v5053_v52  ;;  %v11054_v25 = vld [vmem:[%s13450_s7 + $0x8] sm:$0xff]  }
 0xd7f   : > { %10700 = vmatpush3.bf16.msra.mxu1 %v11054_v25 }
 0xd80   : > { %10713 = vmatprep.subr.bf16.mxu1 %v11373_v1 }
 0xd82   : > { %5384 = vadd.xlane.f32.xlu0 %v5383_v27 }
 0xd88   : > { %v12489_v28 = vpop.eup %11241 }
 0xd89   : > { %v5548_v29 = vsel %vm699_vm2, %v12489_v28, 0.0 }
 0xd8a   : > { %5549 = vadd.xlane.f32.xlu0 %v5548_v29 }
 0xd8f   : > { %5388 = vrot.lane.b32.xlu1 %v12389_v48, %s13535_s29  ;;  %s13538_s29 = smov 8  }
 0xda0   : > { %5553 = vrot.lane.b32.xlu0 %v12389_v48, %s13537_s4  ;;  %s13540_s4 = smov 24  }
 0xdce   : > { %v4381_v32 = vpop.xlane.xlu0 %4380 }
 0xdcf   : > { %11243 = vrcp.f32 %v4381_v32 }
 0xdd2   : > { %v4546_v34 = vpop.xlane.xlu1 %4545 }
 0xdd3   : > { %11245 = vrcp.f32 %v4546_v34  ;;  %v4186_v34 = vadd.f32 %v12368_v37, %v11797_v38 }
 0xdd6   : > { %v4711_v35 = vpop.xlane.xlu0 %4710  ;;  %v5059_v45 = vpop.permute.xlu1 %5058 }
 0xdd7   : > { %11247 = vrcp.f32 %v4711_v35  ;;  %v4188_v35 = vsel %vm651_vm1, %v4186_v34, 0.0 }
 0xdd9   : > { %v11244_v36 = vpop.eup %11243 }
 0xdda   : > { %v4383_v39 = vmul.f32 %v11244_v36, %v11228_v33  ;;  %v5224_v46 = vpop.permute.xlu0 %5223  ;;  %v4187_v36 = vadd.f32 %v12373_v44, %v11799_v40 }
 0xddc   : > { %10625 = vmatmul.mubr.msk.f32.vlgmr.msra.gmra.mrb[18].mxu0 %vm699_vm2, %v4383_v39  ;;  %v4191_v39 = vsel %vm651_vm1, %v4187_v36, 0.0 }
 0xddd   : > { %v11246_v41 = vpop.eup %11245  ;;  %10633 = vmatpush3.msra.mxu0 %v4550_v30  ;;  %10634 = vmatprep.mubr.msk.f32.mxu0 %vm11374_vm0, %v11373_v1 }
 0xdde   : > { %v4548_v42 = vmul.f32 %v11246_v41, %v11230_v58  ;;  %10642 = vmatprep.subr.mxu0 %v11373_v1 }
 0xde0   : > { %10635 = vmatmul.mubr.msk.f32.vlgmr.msra.gmra.mrb[56].mxu0 %vm699_vm2, %v4548_v42 }
 0xde1   : > { %v11248_v48 = vpop.eup %11247  ;;  %10643 = vmatpush3.msra.mxu0 %v4715_v22  ;;  %10644 = vmatprep.mubr.msk.f32.mxu0 %vm11374_vm0, %v11373_v1 }
 0xde2   : > { %v4713_v11 = vmul.f32 %v11248_v48, %v12468_v43  ;;  %10652 = vmatprep.subr.mxu0 %v11373_v1 }
 0xde4   : > { %10645 = vmatmul.mubr.msk.f32.vlgmr.msra.gmra.mrb[58].mxu0 %vm699_vm2, %v4713_v11 }
 0xde5   : > { %10653 = vmatpush3.msra.mxu0 %v4880_v31  ;;  %10654 = vmatprep.mubr.msk.f32.mxu0 %vm11374_vm0, %v11373_v1 }
 0xde6   : > { %10662 = vmatprep.subr.mxu0 %v11373_v1 }
 0xe07   : > { %v4876_v47 = vpop.xlane.xlu1 %4875 }
 0xe08   : > { %11249 = vrcp.f32 %v4876_v47 }
 0xe0b   : > { %v5055_v50 = vpop.xlane.xlu0 %5054  ;;  %v5220_v10 = vpop.xlane.xlu1 %5219 }
 0xe0c   : > { %11251 = vrcp.f32 %v5055_v50 }
 0xe0d   : > { %11253 = vrcp.f32 %v5220_v10 }
 0xe0f   : > { %v5385_v33 = vpop.xlane.xlu0 %5384  ;;  %v5389_v2 = vpop.permute.xlu1 %5388 }
 0xe10   : > { %11255 = vrcp.f32 %v5385_v33 }
 0xe12   : > { %v11250_v49 = vpop.eup %11249 }
 0xe13   : > { %v4878_v58 = vmul.f32 %v11250_v49, %v11234_v23 }
 0xe15   : > { %10655 = vmatmul.mubr.msk.f32.vlgmr.msra.gmra.mrb[60].mxu0 %vm699_vm2, %v4878_v58 }
 0xe16   : > { %10663 = vmatpush3.msra.mxu0 %v5059_v45  ;;  %10664 = vmatprep.mubr.msk.f32.mxu0 %vm11374_vm0, %v11373_v1  ;;  %v11252_v55 = vpop.eup %11251 }
 0xe17   : > { %v5550_v43 = vpop.xlane.xlu0 %5549  ;;  %10672 = vmatprep.subr.mxu0 %v11373_v1  ;;  %v5057_v59 = vmul.f32 %v11252_v55, %v12476_v12  ;;  %v11254_v60 = vpop.eup %11253 }
 0xe18   : > { %11257 = vrcp.f32 %v5550_v43  ;;  %v5222_v61 = vmul.f32 %v11254_v60, %v12479_v19 }
 0xe19   : > { %10665 = vmatmul.mubr.msk.f32.vlgmr.msra.gmra.mrb[62].mxu0 %vm699_vm2, %v5057_v59 }
 0xe1a   : > { %10673 = vmatpush3.msra.mxu0 %v5224_v46  ;;  %10674 = vmatprep.mubr.msk.f32.mxu0 %vm11374_vm0, %v11373_v1  ;;  %v11256_v0 = vpop.eup %11255 }
 0xe1b   : > { %10682 = vmatprep.subr.mxu0 %v11373_v1  ;;  %v5387_v5 = vmul.f32 %v11256_v0, %v12485_v26  ;;  %v5554_v7 = vpop.permute.xlu0 %5553 }
 0xe1d   : > { %10675 = vmatmul.mubr.msk.f32.vlgmr.msra.gmra.mrb[64].mxu0 %vm699_vm2, %v5222_v61 }
 0xe1e   : > { %10683 = vmatpush3.msra.mxu0 %v5389_v2  ;;  %10684 = vmatprep.mubr.msk.f32.mxu0 %vm11374_vm0, %v11373_v1  ;;  %v9814_v2 = vld [vmem:[%s13457_s14 + $0x6] ss:$0 sm:$0xff] }
 0xe1f   : > { %10692 = vmatprep.subr.mxu0 %v11373_v1 }
 0xe21   : > { %10685 = vmatmul.mubr.msk.f32.vlgmr.msra.gmra.mrb[66].mxu0 %vm699_vm2, %v5387_v5 }
 0xe22   : > { %v11258_v6 = vpop.eup %11257  ;;  %10693 = vmatpush3.msra.mxu0 %v5554_v7  ;;  %10694 = vmatprep.mubr.msk.f32.mxu0 %vm11374_vm0, %v11373_v1 }
 0xe23   : > { %v5552_v9 = vmul.f32 %v11258_v6, %v12489_v28  ;;  %10705 = vmatprep.subr.bf16.mxu0 %v11373_v1 }
 0xe25   : > { %10695 = vmatmul.mubr.msk.f32.vlgmr.msra.gmra.mrb[68].mxu0 %vm699_vm2, %v5552_v9 }
 0xe26   : > { %10709 = vmatprep.mubr.msk.bf16.mxu0 %vm11374_vm0, %v11373_v1 }
 0xeaf   : > { %v4456_v8 = vpop.f32.mrb[18].mxu0 }
 0xeb0   : > { %v10626_v14 = vpop.f32.mrb[19].mxu0 }
 0xeb3   : > { %v4621_v16 = vpop.f32.mrb[56].mxu0 }
 0xeb4   : > { %v10636_v17 = vpop.f32.mrb[57].mxu0 }
 0xeb7   : > { %v4786_v22 = vpop.f32.mrb[58].mxu0 }
 0xeb8   : > { %v10646_v23 = vpop.f32.mrb[59].mxu0 }
 0xee8   : > { %v4951_v12 = vpop.f32.mrb[60].mxu0 }
 0xee9   : > { %v10656_v13 = vpop.f32.mrb[61].mxu0 }
 0xeec   : > { %v5130_v19 = vpop.f32.mrb[62].mxu0 }
 0xeed   : > { %v10666_v20 = vpop.f32.mrb[63].mxu0 }
 0xeee   : > { %v11055_v20 = vld [vmem:[%s13452_s9] sm:$0xff]  }
 0xef0   : > { %v5295_v51 = vpop.f32.mrb[64].mxu0 }
 0xef1   : > { %v10889_v52 = vpack.i.bf16 %v5295_v51, %v4621_v16  ;;  %v10676_v26 = vpop.f32.mrb[65].mxu0 }
 0xef3   : > { %10890 = vrot.lane.b32.xlu1 %v10889_v52, %s13538_s29 }
 0xef4   : > { %v5460_v27 = vpop.f32.mrb[66].mxu0 }
 0xef5   : > { %v10894_v28 = vpack.i.bf16 %v5460_v27, %v4786_v22  ;;  %v10686_v29 = vpop.f32.mrb[67].mxu0 }
 0xef7   : > { %10895 = vrot.lane.b32.xlu0 %v10894_v28, %s13539_s24 }
 0xef8   : > { %v5625_v30 = vpop.f32.mrb[68].mxu0 }
 0xef9   : > { %v10899_v31 = vpack.i.bf16 %v5625_v30, %v4951_v12  ;;  %v10696_v32 = vpop.f32.mrb[69].mxu0 }
 0xefb   : > { %10900 = vrot.lane.b32.xlu1 %v10899_v31, %s13540_s4 }
 0xf16   : > { %4189 = vadd.xlane.f32.xlu0 %v4188_v35 }
 0xf1f   : > { %4192 = vadd.xlane.f32.xlu1 %v4191_v39 }
 0xf65   : > { %v10891_v41 = vpop.permute.xlu1 %10890 }
 0xf66   : > { %v10893_v48 = vunpack.i.h.bf16 %v10891_v41  ;;  %v10892_v11 = vunpack.i.l.bf16 %v10891_v41 }
 0xf68   : > { %v5641_v50 = vsel %vm699_vm2, %v5130_v19, %v10893_v48  ;;  %v4967_v38 = vsel %vm699_vm2, %v4456_v8, %v10892_v11  ;;  %v9784_v11 = vld [vmem:[%s13457_s14 + $0x4] ss:$0 sm:$0xff] }
 0xf69   : > { %v10896_v42 = vpop.permute.xlu0 %10895 }
 0xf6a   : > { %v10898_v45 = vunpack.i.h.bf16 %v10896_v42  ;;  %v10897_v46 = vunpack.i.l.bf16 %v10896_v42 }
 0xf6c   : > { %v5642_v33 = vsel %vm1369_vm3, %v5641_v50, %v10898_v45  ;;  %v4968_v40 = vsel %vm1369_vm3, %v4967_v38, %v10897_v46  ;;  %v9785_v50 = vld [vmem:[%s13457_s14 + $0x5] ss:$0 sm:$0xff] }
 0xf6d   : > { %v10901_v47 = vpop.permute.xlu1 %10900 }
 0xf6e   : > { %v10903_v37 = vunpack.i.h.bf16 %v10901_v47  ;;  %v10902_v10 = vunpack.i.l.bf16 %v10901_v47 }
 0xf70   : > { %v5643_v44 = vsel %vm1371_vm4, %v5642_v33, %v10903_v37  ;;  %v4969_v49 = vsel %vm1371_vm4, %v4968_v40, %v10902_v10  ;;  %v11057_v40 = vld [vmem:[%s13451_s8] sm:$0xff]  }
 0xf71   : > { %v5648_v58 = vpack.c.bf16 %v5643_v44, %v4969_v49  ;;  %10706 = vmatpush3.bf16.msra.mxu0 %v11057_v40  ;;  %v11058_v44 = vld [vmem:[%s13451_s8 + $0x8] sm:$0xff]  }
 0xf72   : > { %10707 = vmatprep.subr.bf16.mxu0 %v11373_v1 }
 0xf73   : > { %10702 = vmatmul.mubr.msk.bf16.vlgmr.msra.gmra.mrb[72].mxu1 %vm651_vm1, %v5648_v58 }
 0xf74   : > { %10717 = vmatprep.mubr.msk.bf16.mxu1 %vm11374_vm0, %v11373_v1  ;;  %10714 = vmatpush3.bf16.msra.mxu1 %v11055_v20 }
 0xf75   : > { %10715 = vmatprep.subr.bf16.mxu1 %v11373_v1  ;;  %10708 = vmatpush3.bf16.msra.mxu0 %v11058_v44 }
 0xf76   : > { %10721 = vmatprep.subr.mxu0 %v11373_v1 }
 0xfa3   : > { %v4190_v55 = vpop.xlane.xlu0 %4189 }
 0xfa4   : > { %v4194_v43 = vmul.f32 0.03125, %v4190_v55 }
 0xfa6   : > { %v4196_v59 = vsub.f32 %v4186_v34, %v4194_v43 }
 0xfa8   : > { %v4198_v60 = vmul.f32 %v4196_v59, %v4196_v59 }
 0xfaa   : > { %v4200_v61 = vsel %vm651_vm1, %v4198_v60, 0.0 }
 0xfab   : > { %4201 = vadd.xlane.f32.xlu1 %v4200_v61 }
 0xfac   : > { %v4193_v0 = vpop.xlane.xlu1 %4192 }
 0xfad   : > { %v4195_v6 = vmul.f32 0.03125, %v4193_v0 }
 0xfaf   : > { %v4197_v22 = vsub.f32 %v4187_v36, %v4195_v6 }
 0xfb1   : > { %v4199_v18 = vmul.f32 %v4197_v22, %v4197_v22 }
 0xfb3   : > { %v4203_v19 = vsel %vm651_vm1, %v4199_v18, 0.0 }
0x1046   : > { %v5703_v5 = vpop.f32.mrb[72].mxu1 }
0x1047   : > { %v5704_v7 = vadd.f32 %v9814_v2, %v5703_v5  ;;  %v10703_v9 = vpop.f32.mrb[73].mxu1 }
0x1048   : > { %v5706_v8 = vpop.f32.mrb[74].mxu1  ;;  %v9819_v9 = vld [vmem:[%s13457_s14 + $0x8] ss:$0 sm:$0xff] }
0x1049   : > { %v5707_v14 = vadd.f32 %v9814_v2, %v5706_v8  ;;  %v10704_v16 = vpop.f32.mrb[75].mxu1  ;;  %v5710_v17 = vadd.f32 %v5704_v7, %v12346_v21  ;;  %v11056_v21 = vld [vmem:[%s13452_s9 + $0x8] sm:$0xff]   ;;  %v9818_v2 = vld [vmem:[%s13457_s14 + $0x7] ss:$0 sm:$0xff] }
0x104a   : > { %10716 = vmatpush3.bf16.msra.mxu1 %v11056_v21 }
0x104b   : > { %v5712_v23 = vsel %vm651_vm1, %v5710_v17, 0.0  ;;  %v5711_v12 = vadd.f32 %v5707_v14, %v12348_v24  ;;  %10731 = vmatprep.subr.mxu1 %v11373_v1  ;;  %v4202_v24 = vpop.xlane.xlu1 %4201 }
0x104c   : > { %5713 = vadd.xlane.f32.xlu0 %v5712_v23  ;;  %v4206_v25 = vmul.f32 0.03125, %v4202_v24  ;;  %v9820_v24 = vld [vmem:[%s13457_s14 + $0x9] ss:$0 sm:$0xff] }
0x104d   : > { %v5715_v13 = vsel %vm651_vm1, %v5711_v12, 0.0 }
0x104e   : > { %v4208_v26 = vadd.f32 1e-05, %v4206_v25 }
0x1050   : > { %5716 = vadd.xlane.f32.xlu0 %v5715_v13  ;;  %11259 = vrsqrt.f32 %v4208_v26 }
0x1054   : > { %4204 = vadd.xlane.f32.xlu0 %v4203_v19 }
0x105a   : > { %v11260_v42 = vpop.eup %11259 }
0x105b   : > { %v4212_v48 = vmul.f32 %v11260_v42, %v4196_v59 }
0x105d   : > { %v4219_v46 = vmul.f32 %v9784_v11, %v4212_v48 }
0x105f   : > { %v4226_v37 = vadd.f32 %v9785_v50, %v4219_v46 }
0x10d9   : > { %v5714_v51 = vpop.xlane.xlu0 %5713 }
0x10da   : > { %v5718_v52 = vmul.f32 0.03125, %v5714_v51 }
0x10dc   : > { %v5720_v27 = vsub.f32 %v5710_v17, %v5718_v52 }
0x10dd   : > { %v5717_v28 = vpop.xlane.xlu0 %5716 }
0x10de   : > { %v5719_v29 = vmul.f32 0.03125, %v5717_v28  ;;  %v5722_v30 = vmul.f32 %v5720_v27, %v5720_v27 }
0x10e0   : > { %v5721_v31 = vsub.f32 %v5711_v12, %v5719_v29  ;;  %v5724_v32 = vsel %vm651_vm1, %v5722_v30, 0.0 }
0x10e1   : > { %5725 = vadd.xlane.f32.xlu1 %v5724_v32  ;;  %v4205_v34 = vpop.xlane.xlu0 %4204 }
0x10e2   : > { %v4207_v35 = vmul.f32 0.03125, %v4205_v34  ;;  %v5723_v36 = vmul.f32 %v5721_v31, %v5721_v31 }
0x10e4   : > { %v4209_v39 = vadd.f32 1e-05, %v4207_v35  ;;  %v5727_v41 = vsel %vm651_vm1, %v5723_v36, 0.0 }
0x10e5   : > { %5728 = vadd.xlane.f32.xlu0 %v5727_v41 }
0x10e6   : > { %11261 = vrsqrt.f32 %v4209_v39 }
0x10f0   : > { %v11262_v45 = vpop.eup %11261 }
0x10f1   : > { %v4213_v47 = vmul.f32 %v11262_v45, %v4197_v22  ;;  %v9824_v22 = vld [vmem:[%s13460_s17] ss:$0 sm:$0xff] }
0x10f3   : > { %v4220_v38 = vmul.f32 %v9784_v11, %v4213_v47 }
0x10f5   : > { %v4227_v10 = vadd.f32 %v9785_v50, %v4220_v38 }
0x10f7   : > { %v5822_v33 = vpack.c.bf16 %v4227_v10, %v4226_v37 }
0x10f9   : > { %10718 = vmatmul.mubr.msk.bf16.vlgmr.msra.gmra.mrb[76].mxu1 %vm651_vm1, %v5822_v33 }
0x10fa   : > { %10733 = vmatprep.mubr.msk.f32.mxu1 %vm11374_vm0, %v11373_v1 }
0x116e   : > { %v5726_v49 = vpop.xlane.xlu1 %5725 }
0x116f   : > { %v5730_v58 = vmul.f32 0.03125, %v5726_v49 }
0x1171   : > { %v5732_v55 = vadd.f32 1e-05, %v5730_v58 }
0x1172   : > { %v5729_v43 = vpop.xlane.xlu0 %5728 }
0x1173   : > { %11263 = vrsqrt.f32 %v5732_v55  ;;  %v5731_v59 = vmul.f32 0.03125, %v5729_v43 }
0x1175   : > { %v5733_v60 = vadd.f32 1e-05, %v5731_v59 }
0x1177   : > { %11265 = vrsqrt.f32 %v5733_v60 }
0x117d   : > { %v11264_v61 = vpop.eup %11263 }
0x117e   : > { %v5736_v0 = vmul.f32 %v11264_v61, %v5720_v27 }
0x1180   : > { %v5743_v6 = vmul.f32 %v9818_v2, %v5736_v0 }
0x1181   : > { %v11266_v5 = vpop.eup %11265 }
0x1182   : > { %v5737_v7 = vmul.f32 %v11266_v5, %v5721_v31  ;;  %v12601_v14 = vadd.f32 %v9819_v9, %v5743_v6 }
0x1184   : > { %v5744_v8 = vmul.f32 %v9818_v2, %v5737_v7 }
0x1186   : > { %v12603_v16 = vadd.f32 %v9819_v9, %v5744_v8 }
0x1188   : > { %v5756_v17 = vpack.c.bf16 %v12603_v16, %v12601_v14 }
0x118a   : > { %10710 = vmatmul.mubr.msk.bf16.vlgmr.msra.gmra.mrb[72].mxu0 %vm651_vm1, %v5756_v17 }
0x118b   : > { %10723 = vmatprep.mubr.msk.f32.mxu0 %vm11374_vm0, %v11373_v1 }
0x11cc   : > { %v5879_v23 = vpop.f32.mrb[76].mxu1 }
0x11cd   : > { %v12613_v12 = vadd.f32 %v9824_v22, %v5879_v23  ;;  %v10719_v13 = vpop.f32.mrb[77].mxu1 }
0x11ce   : > { %v5882_v18 = vpop.f32.mrb[78].mxu1 }
0x11cf   : > { %v12615_v19 = vadd.f32 %v9824_v22, %v5882_v18  ;;  %6051 = vrot.lane.b32.xlu1 %v12613_v12, %s13531_s19  ;;  %v10720_v20 = vpop.f32.mrb[79].mxu1  ;;  %10722 = vmatpush3.xpose.msk.msra.mxu0 %vm699_vm2, %v12613_v12 }
0x11d0   : > { %10726 = vmatprep.subr.mxu0 %v11373_v1 }
0x11d3   : > { %6216 = vrot.lane.b32.xlu1 %v12613_v12, %s13532_s20 }
0x1241   : > { %v6052_v21 = vpop.permute.xlu1 %6051 }
0x1242   : > { %10732 = vmatpush3.xpose.msk.msra.mxu1 %vm699_vm2, %v6052_v21 }
0x1243   : > { %10741 = vmatprep.subr.mxu1 %v11373_v1 }
0x1245   : > { %v6217_v29 = vpop.permute.xlu1 %6216 }
0x125d   : > { %v5811_v25 = vpop.f32.mrb[72].mxu0 }
0x125e   : > { %v5812_v51 = vadd.f32 %v9820_v24, %v5811_v25  ;;  %v10711_v52 = vpop.f32.mrb[73].mxu0 }
0x125f   : > { %v5814_v26 = vpop.f32.mrb[74].mxu0 }
0x1260   : > { %6214 = vrot.lane.b32.xlu1 %v5812_v51, %s13532_s20  ;;  %6049 = vrot.lane.b32.xlu0 %v5812_v51, %s13531_s19  ;;  %v10712_v27 = vpop.f32.mrb[75].mxu0  ;;  %v5815_v28 = vadd.f32 %v9820_v24, %v5814_v26 }
0x1261   : > { %10724 = vmatmul.mubr.msk.f32.vlgmr.msra.gmra.mrb[70].mxu0 %vm699_vm2, %v5812_v51 }
0x1262   : > { %10728 = vmatprep.mubr.msk.f32.mxu0 %vm11374_vm0, %v11373_v1 }
0x1264   : > { %6379 = vrot.lane.b32.xlu1 %v5812_v51, %s13534_s28  ;;  %6381 = vrot.lane.b32.xlu0 %v12613_v12, %s13534_s28 }
0x1268   : > { %6724 = vrot.lane.b32.xlu0 %v12615_v19, %s13531_s19  ;;  %6722 = vrot.lane.b32.xlu1 %v5815_v28, %s13531_s19 }
0x126c   : > { %6889 = vrot.lane.b32.xlu0 %v12615_v19, %s13532_s20  ;;  %6887 = vrot.lane.b32.xlu1 %v5815_v28, %s13532_s20 }
0x1270   : > { %7054 = vrot.lane.b32.xlu0 %v12615_v19, %s13534_s28  ;;  %7052 = vrot.lane.b32.xlu1 %v5815_v28, %s13534_s28 }
0x1274   : > { %5973 = vrot.lane.b32.xlu0 %v12613_v12, %s13530_s26  ;;  %6138 = vrot.lane.b32.xlu1 %v12613_v12, %s13529_s21 }
0x12d2   : > { %v6215_v30 = vpop.permute.xlu1 %6214  ;;  %v6050_v31 = vpop.permute.xlu0 %6049 }
0x12d3   : > { %10734 = vmatmul.mubr.msk.f32.vlgmr.msra.gmra.mrb[70].mxu1 %vm699_vm2, %v6050_v31 }
0x12d4   : > { %10742 = vmatpush3.xpose.msk.msra.mxu1 %vm699_vm2, %v6217_v29  ;;  %10743 = vmatprep.mubr.msk.f32.mxu1 %vm11374_vm0, %v11373_v1 }
0x12d5   : > { %10751 = vmatprep.subr.mxu1 %v11373_v1 }
0x12d6   : > { %v6382_v32 = vpop.permute.xlu0 %6381  ;;  %v6380_v34 = vpop.permute.xlu1 %6379 }
0x12d7   : > { %10744 = vmatmul.mubr.msk.f32.vlgmr.msra.gmra.mrb[80].mxu1 %vm699_vm2, %v6215_v30 }
0x12d8   : > { %10752 = vmatpush3.xpose.msk.msra.mxu1 %vm699_vm2, %v6382_v32  ;;  %10753 = vmatprep.mubr.msk.f32.mxu1 %vm11374_vm0, %v11373_v1 }
0x12d9   : > { %10761 = vmatprep.subr.mxu1 %v11373_v1 }
0x12da   : > { %v6725_v35 = vpop.permute.xlu0 %6724  ;;  %v6723_v36 = vpop.permute.xlu1 %6722 }
0x12db   : > { %10754 = vmatmul.mubr.msk.f32.vlgmr.msra.gmra.mrb[82].mxu1 %vm699_vm2, %v6380_v34 }
0x12dc   : > { %10762 = vmatpush3.xpose.msk.msra.mxu1 %vm699_vm2, %v12615_v19  ;;  %10763 = vmatprep.mubr.msk.f32.mxu1 %vm11374_vm0, %v11373_v1 }
0x12dd   : > { %10771 = vmatprep.subr.mxu1 %v11373_v1 }
0x12de   : > { %v6890_v39 = vpop.permute.xlu0 %6889  ;;  %v6888_v42 = vpop.permute.xlu1 %6887 }
0x12df   : > { %10764 = vmatmul.mubr.msk.f32.vlgmr.msra.gmra.mrb[84].mxu1 %vm699_vm2, %v5815_v28 }
0x12e0   : > { %10772 = vmatpush3.xpose.msk.msra.mxu1 %vm699_vm2, %v6725_v35  ;;  %10773 = vmatprep.mubr.msk.f32.mxu1 %vm11374_vm0, %v11373_v1 }
0x12e1   : > { %10781 = vmatprep.subr.mxu1 %v11373_v1 }
0x12e2   : > { %v7055_v41 = vpop.permute.xlu0 %7054  ;;  %v7053_v11 = vpop.permute.xlu1 %7052 }
0x12e3   : > { %10774 = vmatmul.mubr.msk.f32.vlgmr.msra.gmra.mrb[86].mxu1 %vm699_vm2, %v6723_v36 }
0x12e4   : > { %10782 = vmatpush3.xpose.msk.msra.mxu1 %vm699_vm2, %v6890_v39  ;;  %10783 = vmatprep.mubr.msk.f32.mxu1 %vm11374_vm0, %v11373_v1 }
0x12e5   : > { %10791 = vmatprep.subr.mxu1 %v11373_v1 }
0x12e6   : > { %v5974_v48 = vpop.permute.xlu0 %5973  ;;  %v6139_v20 = vpop.permute.xlu1 %6138 }
0x12e7   : > { %10727 = vmatpush3.msra.mxu0 %v5974_v48  ;;  %10784 = vmatmul.mubr.msk.f32.vlgmr.msra.gmra.mrb[88].mxu1 %vm699_vm2, %v6888_v42 }
0x12e8   : > { %10792 = vmatpush3.xpose.msk.msra.mxu1 %vm699_vm2, %v7055_v41  ;;  %10793 = vmatprep.mubr.msk.f32.mxu1 %vm11374_vm0, %v11373_v1 }
0x12e9   : > { %10736 = vmatprep.subr.mxu0 %v11373_v1  ;;  %10801 = vmatprep.subr.bf16.mxu1 %v11373_v1 }
0x12eb   : > { %10794 = vmatmul.mubr.msk.f32.vlgmr.msra.gmra.mrb[90].mxu1 %vm699_vm2, %v7053_v11 }
0x12ec   : > { %10805 = vmatprep.mubr.msk.bf16.mxu1 %vm11374_vm0, %v11373_v1 }
0x1334   : > { %v5958_v45 = vpop.f32.mrb[70].mxu0 }
0x1335   : > { %v10725_v46 = vpop.f32.mrb[71].mxu0  ;;  %v5962_v47 = vsel %vm699_vm2, %v5958_v45, -inf }
0x1336   : > { %5963 = vmax.xlane.f32.xlu0 %v5962_v47 }
0x13a6   : > { %v6123_v50 = vpop.f32.mrb[70].mxu1 }
0x13a7   : > { %v10735_v38 = vpop.f32.mrb[71].mxu1  ;;  %v6127_v37 = vsel %vm699_vm2, %v6123_v50, -inf }
0x13a8   : > { %6128 = vmax.xlane.f32.xlu1 %v6127_v37 }
0x13aa   : > { %v6288_v10 = vpop.f32.mrb[80].mxu1 }
0x13ab   : > { %v10745_v33 = vpop.f32.mrb[81].mxu1  ;;  %v6292_v40 = vsel %vm699_vm2, %v6288_v10, -inf }
0x13ac   : > { %6293 = vmax.xlane.f32.xlu0 %v6292_v40 }
0x13ae   : > { %v6453_v44 = vpop.f32.mrb[82].mxu1 }
0x13af   : > { %v10755_v49 = vpop.f32.mrb[83].mxu1  ;;  %v6457_v58 = vsel %vm699_vm2, %v6453_v44, -inf }
0x13b0   : > { %6458 = vmax.xlane.f32.xlu0 %v6457_v58 }
0x13b2   : > { %v6631_v55 = vpop.f32.mrb[84].mxu1 }
0x13b3   : > { %v10765_v43 = vpop.f32.mrb[85].mxu1  ;;  %v6635_v59 = vsel %vm699_vm2, %v6631_v55, -inf }
0x13b4   : > { %6636 = vmax.xlane.f32.xlu1 %v6635_v59 }
0x13b6   : > { %v6796_v60 = vpop.f32.mrb[86].mxu1 }
0x13b7   : > { %v10775_v61 = vpop.f32.mrb[87].mxu1  ;;  %v6800_v0 = vsel %vm699_vm2, %v6796_v60, -inf }
0x13b8   : > { %6801 = vmax.xlane.f32.xlu0 %v6800_v0 }
0x13ba   : > { %v6961_v2 = vpop.f32.mrb[88].mxu1 }
0x13bb   : > { %v10785_v5 = vpop.f32.mrb[89].mxu1  ;;  %v6965_v6 = vsel %vm699_vm2, %v6961_v2, -inf }
0x13bc   : > { %6966 = vmax.xlane.f32.xlu1 %v6965_v6 }
0x13be   : > { %v7126_v7 = vpop.f32.mrb[90].mxu1 }
0x13bf   : > { %v10795_v9 = vpop.f32.mrb[91].mxu1  ;;  %v7130_v8 = vsel %vm699_vm2, %v7126_v7, -inf }
0x13c0   : > { %7131 = vmax.xlane.f32.xlu0 %v7130_v8 }
0x13c3   : > { %v5964_v17 = vpop.xlane.xlu0 %5963 }
0x13c4   : > { %v5965_v22 = vsub.f32 %v5958_v45, %v5964_v17 }
0x13c6   : > { %v5966_v23 = vmul.f32 1.442695, %v5965_v22 }
0x13c8   : > { %11267 = vpow2.f32 %v5966_v23 }
0x13cd   : > { %6468 = vrot.lane.b32.xlu1 %v12613_v12, %s13533_s0 }
0x13d2   : > { %v11268_v13 = vpop.eup %11267 }
0x13d3   : > { %v5968_v18 = vsel %vm699_vm2, %v11268_v13, 0.0 }
0x13d6   : > { %6303 = vrot.lane.b32.xlu0 %v12613_v12, %s13521_s27 }
0x13f1   : > { %5969 = vadd.xlane.f32.xlu1 %v5968_v18 }
0x1435   : > { %v6129_v21 = vpop.xlane.xlu1 %6128 }
0x1436   : > { %v6130_v24 = vsub.f32 %v6123_v50, %v6129_v21 }
0x1438   : > { %v6131_v25 = vmul.f32 1.442695, %v6130_v24 }
0x1439   : > { %v6294_v51 = vpop.xlane.xlu0 %6293 }
0x143a   : > { %11269 = vpow2.f32 %v6131_v25  ;;  %v6295_v52 = vsub.f32 %v6288_v10, %v6294_v51 }
0x143c   : > { %v6296_v26 = vmul.f32 1.442695, %v6295_v52 }
0x143d   : > { %v6459_v27 = vpop.xlane.xlu0 %6458 }
0x143e   : > { %11271 = vpow2.f32 %v6296_v26  ;;  %v6460_v28 = vsub.f32 %v6453_v44, %v6459_v27 }
0x1440   : > { %v6461_v12 = vmul.f32 1.442695, %v6460_v28 }
0x1441   : > { %v6637_v36 = vpop.xlane.xlu1 %6636 }
0x1442   : > { %11273 = vpow2.f32 %v6461_v12  ;;  %v6638_v39 = vsub.f32 %v6631_v55, %v6637_v36 }
0x1444   : > { %v11270_v29 = vpop.eup %11269  ;;  %v6639_v11 = vmul.f32 1.442695, %v6638_v39 }
0x1445   : > { %v6133_v30 = vsel %vm699_vm2, %v11270_v29, 0.0  ;;  %v6802_v41 = vpop.xlane.xlu0 %6801 }
0x1446   : > { %6134 = vadd.xlane.f32.xlu0 %v6133_v30  ;;  %v6803_v48 = vsub.f32 %v6796_v60, %v6802_v41  ;;  %11275 = vpow2.f32 %v6639_v11 }
0x1448   : > { %v11272_v31 = vpop.eup %11271  ;;  %v6804_v47 = vmul.f32 1.442695, %v6803_v48 }
0x1449   : > { %v6298_v32 = vsel %vm699_vm2, %v11272_v31, 0.0  ;;  %v6967_v42 = vpop.xlane.xlu1 %6966 }
0x144a   : > { %6299 = vadd.xlane.f32.xlu1 %v6298_v32  ;;  %v6968_v45 = vsub.f32 %v6961_v2, %v6967_v42  ;;  %11277 = vpow2.f32 %v6804_v47 }
0x144c   : > { %v12700_v34 = vpop.eup %11273  ;;  %v6969_v50 = vmul.f32 1.442695, %v6968_v45 }
0x144d   : > { %v6463_v35 = vsel %vm699_vm2, %v12700_v34, 0.0  ;;  %v7132_v46 = vpop.xlane.xlu0 %7131  ;;  %v6469_v10 = vpop.permute.xlu1 %6468 }
0x144e   : > { %6464 = vadd.xlane.f32.xlu0 %v6463_v35  ;;  %v7133_v38 = vsub.f32 %v7126_v7, %v7132_v46  ;;  %11279 = vpow2.f32 %v6969_v50  ;;  %v11059_v46 = vld [vmem:[%s13453_s10] sm:$0xff]   ;;  %v11060_v50 = vld [vmem:[%s13453_s10 + $0x8] sm:$0xff]  }
0x144f   : > { %10802 = vmatpush3.bf16.msra.mxu1 %v11059_v46 }
0x1450   : > { %v7134_v37 = vmul.f32 1.442695, %v7133_v38  ;;  %v11276_v33 = vpop.eup %11275  ;;  %10803 = vmatprep.subr.bf16.mxu1 %v11373_v1 }
0x1451   : > { %v6641_v49 = vsel %vm699_vm2, %v11276_v33, 0.0  ;;  %v6304_v2 = vpop.permute.xlu0 %6303 }
0x1452   : > { %11281 = vpow2.f32 %v7134_v37 }
0x1453   : > { %10804 = vmatpush3.bf16.msra.mxu1 %v11060_v50 }
0x1454   : > { %v12708_v40 = vpop.eup %11277 }
0x1455   : > { %v6806_v43 = vsel %vm699_vm2, %v12708_v40, 0.0 }
0x1458   : > { %v12711_v58 = vpop.eup %11279 }
0x1459   : > { %v6971_v55 = vsel %vm699_vm2, %v12711_v58, 0.0 }
0x145b   : > { %6811 = vrot.lane.b32.xlu1 %v12615_v19, %s13529_s21 }
0x145c   : > { %v12717_v59 = vpop.eup %11281 }
0x145d   : > { %v7136_v60 = vsel %vm699_vm2, %v12717_v59, 0.0 }
0x1464   : > { %6646 = vrot.lane.b32.xlu0 %v12615_v19, %s13530_s26 }
0x147e   : > { %v5970_v44 = vpop.xlane.xlu1 %5969 }
0x147f   : > { %11283 = vrcp.f32 %v5970_v44  ;;  %6642 = vadd.xlane.f32.xlu1 %v6641_v49 }
0x1483   : > { %6972 = vadd.xlane.f32.xlu1 %v6971_v55  ;;  %6807 = vadd.xlane.f32.xlu0 %v6806_v43 }
0x1487   : > { %7137 = vadd.xlane.f32.xlu1 %v7136_v60 }
0x1489   : > { %v11284_v61 = vpop.eup %11283 }
0x148a   : > { %v5972_v0 = vmul.f32 %v11284_v61, %v11268_v13 }
0x148c   : > { %10729 = vmatmul.mubr.msk.f32.vlgmr.msra.gmra.mrb[76].mxu0 %vm699_vm2, %v5972_v0 }
0x148d   : > { %10737 = vmatpush3.msra.mxu0 %v6139_v20  ;;  %10738 = vmatprep.mubr.msk.f32.mxu0 %vm11374_vm0, %v11373_v1 }
0x148e   : > { %10746 = vmatprep.subr.mxu0 %v11373_v1 }
0x1498   : > { %7141 = vrot.lane.b32.xlu1 %v12615_v19, %s13533_s0  ;;  %s10040_s0 = sshll.u32 %s11513_s1, 8 }
0x1499   : > { %6976 = vrot.lane.b32.xlu0 %v12615_v19, %s13521_s27  ;;  %s9575_s27 = sshll.u32 %s610_s6, 4 }
0x149a   : > { %s612_s19 = scalar_lea.vmem [#allocation2], %s9575_s27 }
0x149b   : > { %s9497_s20 = sshll.u32 %s612_s19, 4  ;;  %s13394_s20 = int_to_ptr.vmem [resolvable:$true] %s9497_s20 }
0x149c   : > { %s11309_s1 = scalar_lea.vmem %s13394_s20, 256  ;;  %p11316_p0 = scmp.lt.s32.totalorder %s13394_s20, %s11314_s23 }
0x149d   : > { %p11310_p11 = scmp.ne.s32.totalorder %s13394_s20, %s11309_s1  ;;  %p11317_p1 = scmp.lt.s32.totalorder %s11315_s5, %s11309_s1 }
0x149f   : > { %p11311_p12 = pnand %p11310_p11, %p11530_p5  ;;  %p11318_p2 = por %p11317_p1, %p11316_p0 }
0x14a1   : > { %p11312_p13 = pneg %p11311_p12 }
0x14a3   : > { %p11319_p3 = pnand %p11318_p2, %p11312_p13 }
0x14d3   : > { %v6135_v5 = vpop.xlane.xlu0 %6134 }
0x14d4   : > { %11285 = vrcp.f32 %v6135_v5 }
0x14d7   : > { %v6300_v6 = vpop.xlane.xlu1 %6299 }
0x14d8   : > { %11287 = vrcp.f32 %v6300_v6 }
0x14db   : > { %v6465_v7 = vpop.xlane.xlu0 %6464  ;;  %v6812_v18 = vpop.permute.xlu1 %6811 }
0x14dc   : > { %11289 = vrcp.f32 %v6465_v7 }
0x14de   : > { %v11286_v9 = vpop.eup %11285 }
0x14df   : > { %v6137_v8 = vmul.f32 %v11286_v9, %v11270_v29  ;;  %v6647_v13 = vpop.permute.xlu0 %6646 }
0x14e1   : > { %10739 = vmatmul.mubr.msk.f32.vlgmr.msra.gmra.mrb[78].mxu0 %vm699_vm2, %v6137_v8 }
0x14e2   : > { %v11288_v17 = vpop.eup %11287  ;;  %10747 = vmatpush3.msra.mxu0 %v6304_v2  ;;  %10748 = vmatprep.mubr.msk.f32.mxu0 %vm11374_vm0, %v11373_v1 }
0x14e3   : > { %v6302_v22 = vmul.f32 %v11288_v17, %v11272_v31  ;;  %10756 = vmatprep.subr.mxu0 %v11373_v1 }
0x14e5   : > { %10749 = vmatmul.mubr.msk.f32.vlgmr.msra.gmra.mrb[80].mxu0 %vm699_vm2, %v6302_v22 }
0x14e6   : > { %v11290_v19 = vpop.eup %11289  ;;  %10757 = vmatpush3.msra.mxu0 %v6469_v10  ;;  %10758 = vmatprep.mubr.msk.f32.mxu0 %vm11374_vm0, %v11373_v1 }
0x14e7   : > { %v6467_v23 = vmul.f32 %v11290_v19, %v12700_v34  ;;  %10766 = vmatprep.subr.mxu0 %v11373_v1 }
0x14e9   : > { %10759 = vmatmul.mubr.msk.f32.vlgmr.msra.gmra.mrb[82].mxu0 %vm699_vm2, %v6467_v23 }
0x14ea   : > { %10767 = vmatpush3.msra.mxu0 %v6647_v13  ;;  %10768 = vmatprep.mubr.msk.f32.mxu0 %vm11374_vm0, %v11373_v1 }
0x14eb   : > { %10776 = vmatprep.subr.mxu0 %v11373_v1 }
0x150c   : > { %v6643_v20 = vpop.xlane.xlu1 %6642 }
0x150d   : > { %11291 = vrcp.f32 %v6643_v20 }
0x1510   : > { %v6973_v21 = vpop.xlane.xlu1 %6972  ;;  %v6808_v24 = vpop.xlane.xlu0 %6807 }
0x1511   : > { %11293 = vrcp.f32 %v6808_v24 }
0x1512   : > { %11295 = vrcp.f32 %v6973_v21 }
0x1514   : > { %v7138_v25 = vpop.xlane.xlu1 %7137  ;;  %v6977_v12 = vpop.permute.xlu0 %6976 }
0x1515   : > { %11297 = vrcp.f32 %v7138_v25 }
0x1517   : > { %v11292_v51 = vpop.eup %11291 }
0x1518   : > { %v6645_v52 = vmul.f32 %v11292_v51, %v11276_v33  ;;  %v7142_v31 = vpop.permute.xlu1 %7141 }
0x151a   : > { %10769 = vmatmul.mubr.msk.f32.vlgmr.msra.gmra.mrb[84].mxu0 %vm699_vm2, %v6645_v52 }
0x151b   : > { %10777 = vmatpush3.msra.mxu0 %v6812_v18  ;;  %10778 = vmatprep.mubr.msk.f32.mxu0 %vm11374_vm0, %v11373_v1  ;;  %v11294_v26 = vpop.eup %11293  ;;  %v9852_v18 = vld [vmem:[%s13457_s14 + $0xa] ss:$0 sm:$0xff] }
0x151c   : > { %10786 = vmatprep.subr.mxu0 %v11373_v1  ;;  %v6810_v27 = vmul.f32 %v11294_v26, %v12708_v40  ;;  %v11296_v28 = vpop.eup %11295 }
0x151d   : > { %v6975_v29 = vmul.f32 %v11296_v28, %v12711_v58 }
0x151e   : > { %10779 = vmatmul.mubr.msk.f32.vlgmr.msra.gmra.mrb[86].mxu0 %vm699_vm2, %v6810_v27 }
0x151f   : > { %10787 = vmatpush3.msra.mxu0 %v6977_v12  ;;  %10788 = vmatprep.mubr.msk.f32.mxu0 %vm11374_vm0, %v11373_v1  ;;  %v11298_v30 = vpop.eup %11297 }
0x1520   : > { %10796 = vmatprep.subr.mxu0 %v11373_v1  ;;  %v7140_v32 = vmul.f32 %v11298_v30, %v12717_v59 }
0x1522   : > { %10789 = vmatmul.mubr.msk.f32.vlgmr.msra.gmra.mrb[88].mxu0 %vm699_vm2, %v6975_v29 }
0x1523   : > { %10797 = vmatpush3.msra.mxu0 %v7142_v31  ;;  %10798 = vmatprep.mubr.msk.f32.mxu0 %vm11374_vm0, %v11373_v1 }
0x1526   : > { %10799 = vmatmul.mubr.msk.f32.vlgmr.msra.gmra.mrb[90].mxu0 %vm699_vm2, %v7140_v32 }
0x1527   : > { %7654 = vmatprep.mubr.bf16.mxu0 %v11389_v15 }
0x155f   : > { %v6045_v34 = vpop.f32.mrb[76].mxu0 }
0x1560   : > { %v10730_v35 = vpop.f32.mrb[77].mxu0 }
0x15b4   : > { %v6210_v36 = vpop.f32.mrb[78].mxu0 }
0x15b5   : > { %v10740_v39 = vpop.f32.mrb[79].mxu0 }
0x15b8   : > { %v6375_v41 = vpop.f32.mrb[80].mxu0 }
0x15b9   : > { %v10750_v42 = vpop.f32.mrb[81].mxu0 }
0x15ba   : > { %v7352_v42 = vld [vmem:[%s13454_s11 + $0x40] sm:$0xff] }
0x15bc   : > { %v6540_v48 = vpop.f32.mrb[82].mxu0 }
0x15bd   : > { %v10760_v11 = vpop.f32.mrb[83].mxu0 }
0x15ed   : > { %v6718_v45 = vpop.f32.mrb[84].mxu0 }
0x15ee   : > { %v10770_v47 = vpop.f32.mrb[85].mxu0 }
0x15f1   : > { %v6883_v38 = vpop.f32.mrb[86].mxu0 }
0x15f2   : > { %v10904_v37 = vpack.i.bf16 %v6883_v38, %v6210_v36  ;;  %v10780_v10 = vpop.f32.mrb[87].mxu0  ;;  %v7360_v38 = vld [vmem:[%s13454_s11 + $0x80] sm:$0xff] }
0x15f3   : > { %v7361_v10 = vld [vmem:[%s13454_s11 + $0x88] sm:$0xff] }
0x15f4   : > { %10905 = vrot.lane.b32.xlu0 %v10904_v37, %s13538_s29  ;;  %v7368_v37 = vld [vmem:[%s13454_s11 + $0xc0] sm:$0xff] }
0x15f5   : > { %v7048_v33 = vpop.f32.mrb[88].mxu0 }
0x15f6   : > { %v10909_v40 = vpack.i.bf16 %v7048_v33, %v6375_v41  ;;  %v10790_v44 = vpop.f32.mrb[89].mxu0  ;;  %v9877_v33 = vcombine.high %v7360_v38, %v7368_v37 }
0x15f7   : > { %v9876_v44 = vcombine.low %v7360_v38, %v7368_v37  ;;  %v7350_v37 = vld [vmem:[%s13454_s11 + $0x30] sm:$0xff] }
0x15f8   : > { %10910 = vrot.lane.b32.xlu1 %v10909_v40, %s13539_s24  ;;  %v7369_v40 = vld [vmem:[%s13454_s11 + $0xc8] sm:$0xff] }
0x15f9   : > { %v7213_v49 = vpop.f32.mrb[90].mxu0 }
0x15fa   : > { %v10914_v58 = vpack.i.bf16 %v7213_v49, %v6540_v48  ;;  %v10800_v55 = vpop.f32.mrb[91].mxu0  ;;  %v7345_v48 = vld [vmem:[%s13454_s11 + $0x8] sm:$0xff]  ;;  %v9878_v49 = vcombine.low %v7361_v10, %v7369_v40 }
0x15fb   : > { %v7346_v55 = vld [vmem:[%s13454_s11 + $0x10] sm:$0xff] }
0x15fc   : > { %10915 = vrot.lane.b32.xlu0 %v10914_v58, %s13540_s4  ;;  %v9879_v58 = vcombine.high %v7361_v10, %v7369_v40  ;;  %v7358_v10 = vld [vmem:[%s13454_s11 + $0x70] sm:$0xff]  ;;  %v7359_v40 = vld [vmem:[%s13454_s11 + $0x78] sm:$0xff]  ;;  %s13541_s4 = sld [smem:[#allocation18_spill]] }
0x1602   : > { %s13399_s22 = scalar_lea.hbm %s13541_s4, %s10040_s0 }
0x1666   : > { %v10906_v43 = vpop.permute.xlu0 %10905 }
0x1667   : > { %v10908_v60 = vunpack.i.h.bf16 %v10906_v43  ;;  %v10907_v61 = vunpack.i.l.bf16 %v10906_v43  ;;  %v7354_v43 = vld [vmem:[%s13454_s11 + $0x50] sm:$0xff] }
0x1669   : > { %v7229_v6 = vsel %vm699_vm2, %v6718_v45, %v10908_v60  ;;  %v6556_v7 = vsel %vm699_vm2, %v6045_v34, %v10907_v61  ;;  %v7353_v45 = vld [vmem:[%s13454_s11 + $0x48] sm:$0xff]  ;;  %v9865_v60 = vcombine.high %v7346_v55, %v7354_v43  ;;  %v7355_v61 = vld [vmem:[%s13454_s11 + $0x58] sm:$0xff] }
0x166a   : > { %v10911_v59 = vpop.permute.xlu1 %10910  ;;  %v9862_v47 = vcombine.low %v7345_v48, %v7353_v45  ;;  %v9863_v50 = vcombine.high %v7345_v48, %v7353_v45  ;;  %v7372_v48 = vld [vmem:[%s13454_s11 + $0xe0] sm:$0xff]  ;;  %v7373_v45 = vld [vmem:[%s13454_s11 + $0xe8] sm:$0xff] }
0x166b   : > { %v10913_v0 = vunpack.i.h.bf16 %v10911_v59  ;;  %v10912_v2 = vunpack.i.l.bf16 %v10911_v59  ;;  %v7347_v59 = vld [vmem:[%s13454_s11 + $0x18] sm:$0xff] }
0x166c   : > { %7665 = vmatprep.subr.bf16.mxu1 %v9863_v50 }
0x166d   : > { %v7230_v17 = vsel %vm1369_vm3, %v7229_v6, %v10913_v0  ;;  %v6557_v22 = vsel %vm1369_vm3, %v6556_v7, %v10912_v2  ;;  %v9864_v0 = vcombine.low %v7346_v55, %v7354_v43  ;;  %v9866_v2 = vcombine.low %v7347_v59, %v7355_v61  ;;  %v7366_v43 = vld [vmem:[%s13454_s11 + $0xb0] sm:$0xff] }
0x166e   : > { %v10916_v5 = vpop.permute.xlu0 %10915 }
0x166f   : > { %v10918_v9 = vunpack.i.h.bf16 %v10916_v5  ;;  %v10917_v8 = vunpack.i.l.bf16 %v10916_v5  ;;  %v9867_v5 = vcombine.high %v7347_v59, %v7355_v61  ;;  %v7374_v59 = vld [vmem:[%s13454_s11 + $0xf0] sm:$0xff]  ;;  %v7375_v61 = vld [vmem:[%s13454_s11 + $0xf8] sm:$0xff] }
0x1671   : > { %v7231_v19 = vsel %vm1371_vm4, %v7230_v17, %v10918_v9  ;;  %v6558_v23 = vsel %vm1371_vm4, %v6557_v22, %v10917_v8 }
0x1672   : > { %v7236_v13 = vpack.c.bf16 %v7231_v19, %v6558_v23  ;;  %v9856_v23 = vld [vmem:[%s13457_s14 + $0xb] ss:$0 sm:$0xff] }
0x1674   : > { %10806 = vmatmul.mubr.msk.bf16.vlgmr.msra.gmra.mrb[92].mxu1 %vm651_vm1, %v7236_v13 }
0x1675   : > { %7697 = vmatprep.mubr.bf16.mxu1 %v11389_v15  ;;  %7666 = vmatpush1.bf16.msra.mxu1 %v9862_v47 }
0x1676   : > { %7667 = vmatprep.subr.bf16.mxu1 %v9879_v58  ;;  %v9873_v58 = vcombine.high %v7350_v37, %v7358_v10 }
0x1679   : > { %7668 = vmatpush1.bf16.msra.mxu1 %v9878_v49 }
0x167a   : > { %7751 = vmatprep.subr.bf16.mxu1 %v9867_v5  ;;  %v9889_v5 = vcombine.high %v7366_v43, %v7374_v59 }
0x1747   : > { %v7291_v20 = vpop.f32.mrb[92].mxu1 }
0x1748   : > { %v7292_v21 = vadd.f32 %v9852_v18, %v7291_v20  ;;  %v10807_v24 = vpop.f32.mrb[93].mxu1 }
0x1749   : > { %v7294_v25 = vpop.f32.mrb[94].mxu1  ;;  %v9857_v24 = vld [vmem:[%s13457_s14 + $0xc] ss:$0 sm:$0xff] }
0x174a   : > { %v7298_v51 = vadd.f32 %v7292_v21, %v12601_v14  ;;  %v7295_v52 = vadd.f32 %v9852_v18, %v7294_v25  ;;  %v10808_v26 = vpop.f32.mrb[95].mxu1 }
0x174b   : > { %v7363_v26 = vld [vmem:[%s13454_s11 + $0x98] sm:$0xff] }
0x174c   : > { %v7299_v27 = vadd.f32 %v7295_v52, %v12603_v16  ;;  %v7300_v28 = vsel %vm651_vm1, %v7298_v51, 0.0  ;;  %v7344_v16 = vld [vmem:[%s13454_s11] sm:$0xff]  ;;  %v7370_v52 = vld [vmem:[%s13454_s11 + $0xd0] sm:$0xff] }
0x174d   : > { %7301 = vadd.xlane.f32.xlu1 %v7300_v28  ;;  %v9861_v11 = vcombine.high %v7344_v16, %v7352_v42  ;;  %v9860_v46 = vcombine.low %v7344_v16, %v7352_v42  ;;  %v7364_v42 = vld [vmem:[%s13454_s11 + $0xa0] sm:$0xff] }
0x174e   : > { %v7303_v12 = vsel %vm651_vm1, %v7299_v27, 0.0  ;;  %v9885_v50 = vcombine.high %v7364_v42, %v7372_v48 }
0x174f   : > { %7304 = vadd.xlane.f32.xlu0 %v7303_v12  ;;  %7622 = vmatprep.subr.bf16.mxu0 %v9861_v11  ;;  %v7365_v11 = vld [vmem:[%s13454_s11 + $0xa8] sm:$0xff] }
0x1750   : > { %7623 = vmatpush1.bf16.msra.mxu0 %v9860_v46  ;;  %v9887_v38 = vcombine.high %v7365_v11, %v7373_v45  ;;  %v9886_v49 = vcombine.low %v7365_v11, %v7373_v45  ;;  %v11090_v11 = vld [vmem:[%s13455_s12 + $0xf8] sm:$0xff]  }
0x1751   : > { %7624 = vmatprep.subr.bf16.mxu0 %v9877_v33  ;;  %v7351_v33 = vld [vmem:[%s13454_s11 + $0x38] sm:$0xff] }
0x1752   : > { %v9875_v55 = vcombine.high %v7351_v33, %v7359_v40  ;;  %v11091_v45 = vld [vmem:[%s13455_s12 + $0x38] sm:$0xff]  }
0x1754   : > { %7625 = vmatpush1.bf16.msra.mxu0 %v9876_v44  ;;  %v9884_v44 = vcombine.low %v7364_v42, %v7372_v48  ;;  %v11088_v42 = vld [vmem:[%s13455_s12 + $0xb0] sm:$0xff]   ;;  %v11089_v48 = vld [vmem:[%s13455_s12 + $0x78] sm:$0xff]  }
0x1755   : > { %7708 = vmatprep.subr.bf16.mxu0 %v9865_v60  ;;  %v7367_v60 = vld [vmem:[%s13454_s11 + $0xb8] sm:$0xff] }
0x17da   : > { %v7302_v29 = vpop.xlane.xlu1 %7301 }
0x17db   : > { %v7306_v30 = vmul.f32 0.03125, %v7302_v29 }
0x17dc   : > { %v7305_v31 = vpop.xlane.xlu0 %7304 }
0x17dd   : > { %v7308_v32 = vsub.f32 %v7298_v51, %v7306_v30  ;;  %v7307_v34 = vmul.f32 0.03125, %v7305_v31  ;;  %v7362_v51 = vld [vmem:[%s13454_s11 + $0x90] sm:$0xff] }
0x17de   : > { %v9881_v30 = vcombine.high %v7362_v51, %v7370_v52 }
0x17df   : > { %v7309_v35 = vsub.f32 %v7299_v27, %v7307_v34  ;;  %v7310_v36 = vmul.f32 %v7308_v32, %v7308_v32  ;;  %v7371_v27 = vld [vmem:[%s13454_s11 + $0xd8] sm:$0xff]  ;;  %v7356_v34 = vld [vmem:[%s13454_s11 + $0x60] sm:$0xff] }
0x17e0   : > { %v9883_v31 = vcombine.high %v7363_v26, %v7371_v27 }
0x17e1   : > { %v7312_v39 = vsel %vm651_vm1, %v7310_v36, 0.0  ;;  %v7311_v14 = vmul.f32 %v7309_v35, %v7309_v35  ;;  %v7357_v36 = vld [vmem:[%s13454_s11 + $0x68] sm:$0xff] }
0x17e2   : > { %7313 = vadd.xlane.f32.xlu0 %v7312_v39  ;;  %v9880_v39 = vcombine.low %v7362_v51, %v7370_v52  ;;  %v11073_v51 = vld [vmem:[%s13455_s12 + $0x58] sm:$0xff]  }
0x17e3   : > { %v7315_v41 = vsel %vm651_vm1, %v7311_v14, 0.0  ;;  %v9882_v14 = vcombine.low %v7363_v26, %v7371_v27  ;;  %v11074_v52 = vld [vmem:[%s13455_s12 + $0xd8] sm:$0xff]  }
0x17e4   : > { %7316 = vadd.xlane.f32.xlu1 %v7315_v41  ;;  %v11075_v26 = vld [vmem:[%s13455_s12 + $0x18] sm:$0xff]  }
0x17e5   : > { %v11076_v27 = vld [vmem:[%s13455_s12 + $0x98] sm:$0xff]  }
0x186f   : > { %v7314_v6 = vpop.xlane.xlu0 %7313 }
0x1870   : > { %v7318_v7 = vmul.f32 0.03125, %v7314_v6  ;;  %v9891_v6 = vcombine.high %v7367_v60, %v7375_v61 }
0x1871   : > { %v7317_v9 = vpop.xlane.xlu1 %7316 }
0x1872   : > { %v7320_v8 = vadd.f32 1e-05, %v7318_v7  ;;  %v7319_v17 = vmul.f32 0.03125, %v7317_v9  ;;  %v9888_v7 = vcombine.low %v7366_v43, %v7374_v59  ;;  %v9890_v9 = vcombine.low %v7367_v60, %v7375_v61 }
0x1874   : > { %11299 = vrsqrt.f32 %v7320_v8  ;;  %v7321_v22 = vadd.f32 1e-05, %v7319_v17  ;;  %v11061_v8 = vld [vmem:[%s13455_s12 + $0x40] sm:$0xff]  }
0x1875   : > { %v11062_v17 = vld [vmem:[%s13455_s12 + $0xc0] sm:$0xff]  }
0x1876   : > { %11301 = vrsqrt.f32 %v7321_v22  ;;  %v11063_v22 = vld [vmem:[%s13455_s12] sm:$0xff]  }
0x187e   : > { %v11300_v19 = vpop.eup %11299 }
0x187f   : > { %v7324_v13 = vmul.f32 %v11300_v19, %v7308_v32  ;;  %v7348_v32 = vld [vmem:[%s13454_s11 + $0x20] sm:$0xff] }
0x1880   : > { %v11302_v18 = vpop.eup %11301  ;;  %v9869_v41 = vcombine.high %v7348_v32, %v7356_v34  ;;  %v9868_v46 = vcombine.low %v7348_v32, %v7356_v34  ;;  %v11064_v19 = vld [vmem:[%s13455_s12 + $0x80] sm:$0xff]   ;;  %v11081_v34 = vld [vmem:[%s13455_s12 + $0x68] sm:$0xff]  }
0x1881   : > { %v7331_v20 = vmul.f32 %v9856_v23, %v7324_v13  ;;  %v7325_v21 = vmul.f32 %v11302_v18, %v7309_v35  ;;  %v7349_v35 = vld [vmem:[%s13454_s11 + $0x28] sm:$0xff]  ;;  %v11080_v32 = vld [vmem:[%s13455_s12 + $0xa0] sm:$0xff]  }
0x1882   : > { %v9871_v16 = vcombine.high %v7349_v35, %v7357_v36  ;;  %v9870_v47 = vcombine.low %v7349_v35, %v7357_v36  ;;  %v11067_v13 = vld [vmem:[%s13455_s12 + $0x8] sm:$0xff]  }
0x1883   : > { %v7332_v25 = vmul.f32 %v9856_v23, %v7325_v21  ;;  %v12839_v28 = vadd.f32 %v9857_v24, %v7331_v20  ;;  %v11065_v23 = vld [vmem:[%s13455_s12 + $0x48] sm:$0xff]   ;;  %v11069_v20 = vld [vmem:[%s13455_s12 + $0x50] sm:$0xff]  }
0x1884   : > { %v11068_v18 = vld [vmem:[%s13455_s12 + $0x88] sm:$0xff]   ;;  %v11070_v21 = vld [vmem:[%s13455_s12 + $0xd0] sm:$0xff]  }
0x1885   : > { %v12841_v12 = vadd.f32 %v9857_v24, %v7332_v25  ;;  %v11071_v24 = vld [vmem:[%s13455_s12 + $0x10] sm:$0xff]   ;;  %v11082_v35 = vld [vmem:[%s13455_s12 + $0xe8] sm:$0xff]  }
0x1886   : > { %v11072_v25 = vld [vmem:[%s13455_s12 + $0x90] sm:$0xff]   ;;  %v11083_v36 = vld [vmem:[%s13455_s12 + $0x28] sm:$0xff]  }
0x1887   : > { %v12845_v29 = vpack.c.bf16 %v12841_v12, %v12839_v28 }
0x1889   : > { %9892 = vmatmul.mubr.msk.bf16.vlgmr.msra.gmra.mrb[92].mxu0 %vm651_vm1, %v12845_v29  ;;  %9893 = vmatmul.mubr.msk.bf16.vlgmr.msra.gmra.mrb[96].mxu1 %vm651_vm1, %v12845_v29 }
0x188a   : > { %7709 = vmatpush1.bf16.msra.mxu0 %v9864_v0  ;;  %7752 = vmatpush1.bf16.msra.mxu1 %v9866_v2  ;;  %v9872_v0 = vcombine.low %v7350_v37, %v7358_v10  ;;  %v9874_v2 = vcombine.low %v7351_v33, %v7359_v40 }
0x188b   : > { %7710 = vmatprep.subr.bf16.mxu0 %v9881_v30  ;;  %7753 = vmatprep.subr.bf16.mxu1 %v9883_v31  ;;  %v11078_v30 = vld [vmem:[%s13455_s12 + $0xe0] sm:$0xff]  }
0x188c   : > { %7740 = vmatprep.mubr.bf16.mxu0 %v11389_v15  ;;  %7783 = vmatprep.mubr.bf16.mxu1 %v11389_v15  ;;  %v11079_v31 = vld [vmem:[%s13455_s12 + $0x20] sm:$0xff]  }
0x188e   : > { %7711 = vmatpush1.bf16.msra.mxu0 %v9880_v39  ;;  %7754 = vmatpush1.bf16.msra.mxu1 %v9882_v14  ;;  %v11084_v39 = vld [vmem:[%s13455_s12 + $0xa8] sm:$0xff]   ;;  %v11085_v14 = vld [vmem:[%s13455_s12 + $0x70] sm:$0xff]  }
0x188f   : > { %7794 = vmatprep.subr.bf16.mxu0 %v9869_v41  ;;  %7837 = vmatprep.subr.bf16.mxu1 %v9871_v16  ;;  %v11086_v41 = vld [vmem:[%s13455_s12 + $0xf0] sm:$0xff]  }
0x1890   : > { %v11087_v16 = vld [vmem:[%s13455_s12 + $0x30] sm:$0xff]  }
0x1891   : > { %9894 = vmatmul.mubr.msk.bf16.vlgmr.msra.gmra.mrb[96].mxu0 %vm651_vm1, %v12845_v29  ;;  %9895 = vmatmul.mubr.msk.bf16.vlgmr.msra.gmra.mrb[100].mxu1 %vm651_vm1, %v12845_v29 }
0x1892   : > { %7795 = vmatpush1.bf16.msra.mxu0 %v9868_v46  ;;  %7838 = vmatpush1.bf16.msra.mxu1 %v9870_v47  ;;  %v11092_v46 = vld [vmem:[%s13455_s12 + $0xb8] sm:$0xff]   ;;  %v11093_v47 = vld [vmem:[%s13455_s12 + $0x140] sm:$0xff]  }
0x1893   : > { %7796 = vmatprep.subr.bf16.mxu0 %v9885_v50  ;;  %7839 = vmatprep.subr.bf16.mxu1 %v9887_v38  ;;  %v11094_v50 = vld [vmem:[%s13455_s12 + $0x1c0] sm:$0xff]  }
0x1894   : > { %7826 = vmatprep.mubr.bf16.mxu0 %v11389_v15  ;;  %7869 = vmatprep.mubr.bf16.mxu1 %v11389_v15  ;;  %v9858_v38 = vld [vmem:[%s13458_s15 + $0x1] ss:$2 sm:$0xff] }
0x1895   : > { %v7382_v37 = vrot.slane %v9858_v38, %v11977_v53  ;;  %v7390_v10 = vrot.slane %v9858_v38, %v11979_v54  ;;  %v7386_v33 = vrot.slane %v9858_v38, %v11984_v56  ;;  %v7394_v40 = vrot.slane %v9858_v38, %v11986_v57 }
0x1896   : > { %7797 = vmatpush1.bf16.msra.mxu0 %v9884_v44  ;;  %7840 = vmatpush1.bf16.msra.mxu1 %v9886_v49 }
0x1897   : > { %7880 = vmatprep.subr.bf16.mxu0 %v9873_v58  ;;  %7923 = vmatprep.subr.bf16.mxu1 %v9875_v55 }
0x1899   : > { %9896 = vmatmul.mubr.msk.bf16.vlgmr.msra.gmra.mrb[100].mxu0 %vm651_vm1, %v12845_v29  ;;  %9897 = vmatmul.mubr.msk.bf16.vlgmr.msra.gmra.mrb[104].mxu1 %vm651_vm1, %v12845_v29 }
0x189a   : > { %7881 = vmatpush1.bf16.msra.mxu0 %v9872_v0  ;;  %7924 = vmatpush1.bf16.msra.mxu1 %v9874_v2 }
0x189b   : > { %7882 = vmatprep.subr.bf16.mxu0 %v9889_v5  ;;  %7925 = vmatprep.subr.bf16.mxu1 %v9891_v6 }
0x189c   : > { %7912 = vmatprep.mubr.bf16.mxu0 %v11389_v15  ;;  %7955 = vmatprep.mubr.bf16.mxu1 %v11389_v15  ;;  %v11066_v15 = vld [vmem:[%s13455_s12 + $0xc8] sm:$0xff]  }
0x189e   : > { %7883 = vmatpush1.bf16.msra.mxu0 %v9888_v7  ;;  %7926 = vmatpush1.bf16.msra.mxu1 %v9890_v9 }
0x189f   : > { %10334 = vmatprep.subr.bf16.mxu0 %v11061_v8  ;;  %10356 = vmatprep.subr.bf16.mxu1 %v11062_v17  ;;  %v7398_v8 = vrot.slane %v9858_v38, %v11992_v62  ;;  %v7406_v17 = vrot.slane %v9858_v38, %v11994_v63 }
0x18a1   : > { %9898 = vmatmul.mubr.msk.bf16.vlgmr.msra.gmra.mrb[104].mxu0 %vm651_vm1, %v12845_v29  ;;  %9899 = vmatmul.mubr.msk.bf16.vlgmr.msra.gmra.mrb[108].mxu1 %vm651_vm1, %v12845_v29  ;;  %v11077_v29 = vld [vmem:[%s13455_s12 + $0x60] sm:$0xff]  }
0x18a2   : > { %10335 = vmatpush3.bf16.msra.mxu0 %v11063_v22  ;;  %10357 = vmatpush3.bf16.msra.mxu1 %v11064_v19 }
0x18a3   : > { %10336 = vmatprep.subr.bf16.mxu0 %v11065_v23  ;;  %10358 = vmatprep.subr.bf16.mxu1 %v11066_v15  ;;  %v7402_v23 = vrot.slane %v9858_v38, %v11996_v3  ;;  %v7410_v15 = vrot.slane %v9858_v38, %v11998_v4 }
0x18a6   : > { %10337 = vmatpush3.bf16.msra.mxu0 %v11067_v13  ;;  %10359 = vmatpush3.bf16.msra.mxu1 %v11068_v18 }
0x18a7   : > { %10338 = vmatprep.subr.bf16.mxu0 %v11069_v20  ;;  %10360 = vmatprep.subr.bf16.mxu1 %v11070_v21 }
0x18aa   : > { %10339 = vmatpush3.bf16.msra.mxu0 %v11071_v24  ;;  %10361 = vmatpush3.bf16.msra.mxu1 %v11072_v25 }
0x18ab   : > { %10340 = vmatprep.subr.bf16.mxu0 %v11073_v51  ;;  %10362 = vmatprep.subr.bf16.mxu1 %v11074_v52 }
0x18ae   : > { %10341 = vmatpush3.bf16.msra.mxu0 %v11075_v26  ;;  %10363 = vmatpush3.bf16.msra.mxu1 %v11076_v27  ;;  %v13033_v26 = vld [vmem:[%s13458_s15 + $0x11] ss:$2 sm:$0xff] }
0x18af   : > { %10342 = vmatprep.subr.bf16.mxu0 %v11077_v29  ;;  %10364 = vmatprep.subr.bf16.mxu1 %v11078_v30  ;;  %v7422_v38 = vrot.slane %v13033_v26, %v11979_v54  ;;  %v11100_v54 = vld [vmem:[%s13455_s12 + $0x188] sm:$0xff]  }
0x18b2   : > { %10343 = vmatpush3.bf16.msra.mxu0 %v11079_v31  ;;  %10365 = vmatpush3.bf16.msra.mxu1 %v11080_v32 }
0x18b3   : > { %10344 = vmatprep.subr.bf16.mxu0 %v11081_v34  ;;  %10366 = vmatprep.subr.bf16.mxu1 %v11082_v35  ;;  %v11095_v35 = vld [vmem:[%s13455_s12 + $0x100] sm:$0xff]  }
0x18b6   : > { %10345 = vmatpush3.bf16.msra.mxu0 %v11083_v36  ;;  %10367 = vmatpush3.bf16.msra.mxu1 %v11084_v39  ;;  %v11096_v36 = vld [vmem:[%s13455_s12 + $0x180] sm:$0xff]  }
0x18b7   : > { %10346 = vmatprep.subr.bf16.mxu0 %v11085_v14  ;;  %10368 = vmatprep.subr.bf16.mxu1 %v11086_v41 }
0x18ba   : > { %10347 = vmatpush3.bf16.msra.mxu0 %v11087_v16  ;;  %10369 = vmatpush3.bf16.msra.mxu1 %v11088_v42  ;;  %v11097_v42 = vld [vmem:[%s13455_s12 + $0x148] sm:$0xff]  }
0x18bb   : > { %10348 = vmatprep.subr.bf16.mxu0 %v11089_v48  ;;  %10370 = vmatprep.subr.bf16.mxu1 %v11090_v11  ;;  %v11098_v48 = vld [vmem:[%s13455_s12 + $0x1c8] sm:$0xff]   ;;  %v7414_v11 = vrot.slane %v13033_v26, %v11977_v53 }
0x18be   : > { %10349 = vmatpush3.bf16.msra.mxu0 %v11091_v45  ;;  %10371 = vmatpush3.bf16.msra.mxu1 %v11092_v46 }
0x18bf   : > { %10378 = vmatprep.subr.bf16.mxu0 %v11093_v47  ;;  %10400 = vmatprep.subr.bf16.mxu1 %v11094_v50 }
0x195c   : > { %v7656_v44 = vpop.f32.mrb[92].mxu0  ;;  %v7699_v49 = vpop.f32.mrb[96].mxu1 }
0x195d   : > { %v7657_v58 = vadd.f32 %v7656_v44, %v7382_v37  ;;  %v7700_v55 = vadd.f32 %v7699_v49, %v7390_v10  ;;  %v7658_v43 = vpop.f32.mrb[93].mxu0  ;;  %v7701_v59 = vpop.f32.mrb[97].mxu1  ;;  %v7418_v44 = vrot.slane %v13033_v26, %v11984_v56  ;;  %v11101_v56 = vld [vmem:[%s13455_s12 + $0x150] sm:$0xff]  }
0x195e   : > { %v7659_v60 = vadd.f32 %v7658_v43, %v7386_v33  ;;  %v7702_v61 = vadd.f32 %v7701_v59, %v7394_v40  ;;  %v7660_v0 = vpop.f32.mrb[94].mxu0  ;;  %v7703_v2 = vpop.f32.mrb[98].mxu1 }
0x195f   : > { %v7661_v5 = vadd.f32 %v7660_v0, %v7382_v37  ;;  %v7704_v6 = vadd.f32 %v7703_v2, %v7390_v10  ;;  %v7662_v7 = vpop.f32.mrb[95].mxu0  ;;  %v7705_v9 = vpop.f32.mrb[99].mxu1  ;;  %v7966_v13 = vmax.f32 %v7657_v58, 0.0  ;;  %v7968_v18 = vmax.f32 %v7700_v55, 0.0  ;;  %v11099_v58 = vld [vmem:[%s13455_s12 + $0x108] sm:$0xff]   ;;  %v11102_v0 = vld [vmem:[%s13455_s12 + $0x1d0] sm:$0xff]  }
0x1960   : > { %v7663_v22 = vadd.f32 %v7662_v7, %v7386_v33  ;;  %v7706_v19 = vadd.f32 %v7705_v9, %v7394_v40  ;;  %v7967_v24 = vmax.f32 %v7659_v60, 0.0  ;;  %v7969_v25 = vmax.f32 %v7702_v61, 0.0 }
0x1961   : > { %v7982_v20 = vmax.f32 %v7661_v5, 0.0  ;;  %v7984_v21 = vmax.f32 %v7704_v6, 0.0  ;;  %v7426_v55 = vrot.slane %v13033_v26, %v11986_v57 }
0x1962   : > { %v7983_v51 = vmax.f32 %v7663_v22, 0.0  ;;  %v7985_v52 = vmax.f32 %v7706_v19, 0.0 }
0x1963   : > { %v8254_v27 = vpack.c.bf16 %v7982_v20, %v7966_v13  ;;  %v8256_v29 = vpack.c.bf16 %v7984_v21, %v7968_v18 }
0x1964   : > { %v8255_v30 = vpack.c.bf16 %v7983_v51, %v7967_v24  ;;  %v8257_v31 = vpack.c.bf16 %v7985_v52, %v7969_v25  ;;  %v7742_v32 = vpop.f32.mrb[96].mxu0  ;;  %v7785_v34 = vpop.f32.mrb[100].mxu1  ;;  %v11105_v24 = vld [vmem:[%s13455_s12 + $0x158] sm:$0xff]  }
0x1965   : > { %v7743_v39 = vadd.f32 %v7742_v32, %v7398_v8  ;;  %v7786_v14 = vadd.f32 %v7785_v34, %v7406_v17  ;;  %v7744_v41 = vpop.f32.mrb[97].mxu0  ;;  %v7787_v16 = vpop.f32.mrb[101].mxu1  ;;  %v11106_v25 = vld [vmem:[%s13455_s12 + $0x1d8] sm:$0xff]  }
0x1966   : > { %v7745_v45 = vadd.f32 %v7744_v41, %v7402_v23  ;;  %v7788_v46 = vadd.f32 %v7787_v16, %v7410_v15  ;;  %v7746_v47 = vpop.f32.mrb[98].mxu0  ;;  %v7789_v50 = vpop.f32.mrb[102].mxu1  ;;  %9075 = vmatprep.mubr.bf16.mxu0 %v8255_v30  ;;  %9116 = vmatprep.mubr.bf16.mxu1 %v8257_v31  ;;  %v7430_v30 = vrot.slane %v13033_v26, %v11992_v62  ;;  %v11107_v16 = vld [vmem:[%s13455_s12 + $0x118] sm:$0xff]  }
0x1967   : > { %v7747_v37 = vadd.f32 %v7746_v47, %v7398_v8  ;;  %v7790_v10 = vadd.f32 %v7789_v50, %v7406_v17  ;;  %v7748_v33 = vpop.f32.mrb[99].mxu0  ;;  %v7791_v40 = vpop.f32.mrb[103].mxu1  ;;  %9076 = vmatmul.mubr.bf16.vlgmr.msra.gmra.mrb[108].mxu0 %v8254_v27  ;;  %9117 = vmatmul.mubr.bf16.vlgmr.msra.gmra.mrb[112].mxu1 %v8256_v29  ;;  %v7970_v43 = vmax.f32 %v7743_v39, 0.0  ;;  %v7972_v59 = vmax.f32 %v7786_v14, 0.0  ;;  %v11108_v62 = vld [vmem:[%s13455_s12 + $0x198] sm:$0xff]  }
0x1968   : > { %v7749_v49 = vadd.f32 %v7748_v33, %v7402_v23  ;;  %v7792_v53 = vadd.f32 %v7791_v40, %v7410_v15  ;;  %10379 = vmatpush3.bf16.msra.mxu0 %v11095_v35  ;;  %10401 = vmatpush3.bf16.msra.mxu1 %v11096_v36  ;;  %v7971_v2 = vmax.f32 %v7745_v45, 0.0  ;;  %v7973_v5 = vmax.f32 %v7788_v46, 0.0  ;;  %v11103_v23 = vld [vmem:[%s13455_s12 + $0x110] sm:$0xff]   ;;  %v11110_v46 = vld [vmem:[%s13455_s12 + $0x1e0] sm:$0xff]  }
0x1969   : > { %v7986_v60 = vmax.f32 %v7747_v37, 0.0  ;;  %v7988_v61 = vmax.f32 %v7790_v10, 0.0  ;;  %10380 = vmatprep.subr.bf16.mxu0 %v11097_v42  ;;  %10402 = vmatprep.subr.bf16.mxu1 %v11098_v48  ;;  %v11104_v15 = vld [vmem:[%s13455_s12 + $0x190] sm:$0xff]   ;;  %v7438_v36 = vrot.slane %v13033_v26, %v11994_v63  ;;  %v7434_v39 = vrot.slane %v13033_v26, %v11996_v3  ;;  %v11109_v3 = vld [vmem:[%s13455_s12 + $0x160] sm:$0xff]  }
0x196a   : > { %v7987_v6 = vmax.f32 %v7749_v49, 0.0  ;;  %v7989_v7 = vmax.f32 %v7792_v53, 0.0  ;;  %v7442_v42 = vrot.slane %v13033_v26, %v11998_v4  ;;  %v11111_v49 = vld [vmem:[%s13455_s12 + $0x120] sm:$0xff]  }
0x196b   : > { %v13067_v9 = vpack.c.bf16 %v7986_v60, %v7970_v43  ;;  %v13069_v57 = vpack.c.bf16 %v7988_v61, %v7972_v59  ;;  %v11112_v53 = vld [vmem:[%s13455_s12 + $0x1a0] sm:$0xff]   ;;  %v11113_v59 = vld [vmem:[%s13455_s12 + $0x168] sm:$0xff]  }
0x196c   : > { %v8259_v8 = vpack.c.bf16 %v7987_v6, %v7971_v2  ;;  %v8261_v17 = vpack.c.bf16 %v7989_v7, %v7973_v5  ;;  %10381 = vmatpush3.bf16.msra.mxu0 %v11099_v58  ;;  %10403 = vmatpush3.bf16.msra.mxu1 %v11100_v54  ;;  %v7828_v22 = vpop.f32.mrb[100].mxu0  ;;  %v7871_v19 = vpop.f32.mrb[104].mxu1  ;;  %v11114_v60 = vld [vmem:[%s13455_s12 + $0x1e8] sm:$0xff]  }
0x196d   : > { %v7829_v13 = vadd.f32 %v7828_v22, %v7414_v11  ;;  %v7872_v18 = vadd.f32 %v7871_v19, %v7422_v38  ;;  %v7830_v20 = vpop.f32.mrb[101].mxu0  ;;  %v7873_v21 = vpop.f32.mrb[105].mxu1  ;;  %10382 = vmatprep.subr.bf16.mxu0 %v11101_v56  ;;  %10404 = vmatprep.subr.bf16.mxu1 %v11102_v0  ;;  %v11115_v19 = vld [vmem:[%s13455_s12 + $0x128] sm:$0xff]  }
0x196e   : > { %v7831_v51 = vadd.f32 %v7830_v20, %v7418_v44  ;;  %v7874_v52 = vadd.f32 %v7873_v21, %v7426_v55  ;;  %v7832_v27 = vpop.f32.mrb[102].mxu0  ;;  %v7875_v29 = vpop.f32.mrb[106].mxu1  ;;  %9157 = vmatprep.mubr.bf16.mxu0 %v8259_v8  ;;  %9198 = vmatprep.mubr.bf16.mxu1 %v8261_v17  ;;  %v11117_v21 = vld [vmem:[%s13455_s12 + $0x170] sm:$0xff]  }
0x196f   : > { %v7833_v31 = vadd.f32 %v7832_v27, %v7414_v11  ;;  %v7876_v32 = vadd.f32 %v7875_v29, %v7422_v38  ;;  %v7834_v34 = vpop.f32.mrb[103].mxu0  ;;  %v7877_v35 = vpop.f32.mrb[107].mxu1  ;;  %v7974_v48 = vmax.f32 %v7829_v13, 0.0  ;;  %v7976_v63 = vmax.f32 %v7872_v18, 0.0 }
0x1970   : > { %v7835_v14 = vadd.f32 %v7834_v34, %v7418_v44  ;;  %v7878_v41 = vadd.f32 %v7877_v35, %v7426_v55  ;;  %10383 = vmatpush3.bf16.msra.mxu0 %v11103_v23  ;;  %10405 = vmatpush3.bf16.msra.mxu1 %v11104_v15  ;;  %v7975_v47 = vmax.f32 %v7831_v51, 0.0  ;;  %v7977_v50 = vmax.f32 %v7874_v52, 0.0  ;;  %v11116_v23 = vld [vmem:[%s13455_s12 + $0x1a8] sm:$0xff]   ;;  %v11119_v34 = vld [vmem:[%s13455_s12 + $0x130] sm:$0xff]  }
0x1971   : > { %v7990_v11 = vmax.f32 %v7833_v31, 0.0  ;;  %v7992_v45 = vmax.f32 %v7876_v32, 0.0  ;;  %10384 = vmatprep.subr.bf16.mxu0 %v11105_v24  ;;  %10406 = vmatprep.subr.bf16.mxu1 %v11106_v25  ;;  %v11118_v24 = vld [vmem:[%s13455_s12 + $0x1f0] sm:$0xff]  }
0x1972   : > { %v7991_v38 = vmax.f32 %v7835_v14, 0.0  ;;  %v7993_v37 = vmax.f32 %v7878_v41, 0.0  ;;  %v11120_v35 = vld [vmem:[%s13455_s12 + $0x1b0] sm:$0xff]   ;;  %v11123_v14 = vld [vmem:[%s13455_s12 + $0x138] sm:$0xff]  }
0x1973   : > { %v13103_v10 = vpack.c.bf16 %v7990_v11, %v7974_v48  ;;  %v13105_v4 = vpack.c.bf16 %v7992_v45, %v7976_v63  ;;  %v11124_v41 = vld [vmem:[%s13455_s12 + $0x1b8] sm:$0xff]   ;;  %v11128_v48 = vld [vmem:[%s13455_s12 + $0x280] sm:$0xff]   ;;  %v11129_v63 = vld [vmem:[%s13455_s12 + $0x248] sm:$0xff]  }
0x1974   : > { %v13107_v26 = vpack.c.bf16 %v7991_v38, %v7975_v47  ;;  %v13109_v33 = vpack.c.bf16 %v7993_v37, %v7977_v50  ;;  %10385 = vmatpush3.bf16.msra.mxu0 %v11107_v16  ;;  %10407 = vmatpush3.bf16.msra.mxu1 %v11108_v62  ;;  %v7914_v40 = vpop.f32.mrb[104].mxu0  ;;  %v7957_v44 = vpop.f32.mrb[108].mxu1  ;;  %v11125_v16 = vld [vmem:[%s13455_s12 + $0x240] sm:$0xff]   ;;  %v11130_v11 = vld [vmem:[%s13455_s12 + $0x2c8] sm:$0xff]   ;;  %v11136_v47 = vld [vmem:[%s13455_s12 + $0x290] sm:$0xff]  }
0x1975   : > { %v7915_v58 = vadd.f32 %v7914_v40, %v7430_v30  ;;  %v7958_v54 = vadd.f32 %v7957_v44, %v7438_v36  ;;  %v7916_v55 = vpop.f32.mrb[105].mxu0  ;;  %v7959_v43 = vpop.f32.mrb[109].mxu1  ;;  %10386 = vmatprep.subr.bf16.mxu0 %v11109_v3  ;;  %10408 = vmatprep.subr.bf16.mxu1 %v11110_v46  ;;  %v11126_v62 = vld [vmem:[%s13455_s12 + $0x2c0] sm:$0xff]   ;;  %v11131_v45 = vld [vmem:[%s13455_s12 + $0x208] sm:$0xff]   ;;  %v11135_v46 = vld [vmem:[%s13455_s12 + $0x210] sm:$0xff]  }
0x1976   : > { %v7917_v61 = vadd.f32 %v7916_v55, %v7434_v39  ;;  %v7960_v56 = vadd.f32 %v7959_v43, %v7442_v42  ;;  %v7918_v0 = vpop.f32.mrb[106].mxu0  ;;  %v7961_v2 = vpop.f32.mrb[110].mxu1  ;;  %v11132_v3 = vld [vmem:[%s13455_s12 + $0x288] sm:$0xff]   ;;  %v11137_v50 = vld [vmem:[%s13455_s12 + $0x258] sm:$0xff]   ;;  %v11142_v40 = vld [vmem:[%s13455_s12 + $0x2e0] sm:$0xff]  }
0x1977   : > { %v7919_v5 = vadd.f32 %v7918_v0, %v7430_v30  ;;  %v7962_v6 = vadd.f32 %v7961_v2, %v7438_v36  ;;  %v7920_v7 = vpop.f32.mrb[107].mxu0  ;;  %v7963_v8 = vpop.f32.mrb[111].mxu1  ;;  %v7978_v15 = vmax.f32 %v7915_v58, 0.0  ;;  %v7980_v13 = vmax.f32 %v7958_v54, 0.0  ;;  %v11121_v36 = vld [vmem:[%s13455_s12 + $0x178] sm:$0xff]   ;;  %v11143_v44 = vld [vmem:[%s13455_s12 + $0x220] sm:$0xff]  }
0x1978   : > { %v7921_v17 = vadd.f32 %v7920_v7, %v7434_v39  ;;  %v7964_v22 = vadd.f32 %v7963_v8, %v7442_v42  ;;  %10387 = vmatpush3.bf16.msra.mxu0 %v11111_v49  ;;  %10409 = vmatpush3.bf16.msra.mxu1 %v11112_v53  ;;  %v7979_v25 = vmax.f32 %v7917_v61, 0.0  ;;  %v7981_v51 = vmax.f32 %v7960_v56, 0.0  ;;  %v11122_v39 = vld [vmem:[%s13455_s12 + $0x1f8] sm:$0xff]   ;;  %v11127_v42 = vld [vmem:[%s13455_s12 + $0x200] sm:$0xff]   ;;  %v11145_v53 = vld [vmem:[%s13455_s12 + $0x268] sm:$0xff]  }
0x1979   : > { %v7994_v18 = vmax.f32 %v7919_v5, 0.0  ;;  %v7996_v20 = vmax.f32 %v7962_v6, 0.0  ;;  %10388 = vmatprep.subr.bf16.mxu0 %v11113_v59  ;;  %10410 = vmatprep.subr.bf16.mxu1 %v11114_v60  ;;  %v11138_v38 = vld [vmem:[%s13455_s12 + $0x2d8] sm:$0xff]   ;;  %v11144_v49 = vld [vmem:[%s13455_s12 + $0x2a0] sm:$0xff]   ;;  %v11146_v58 = vld [vmem:[%s13455_s12 + $0x2e8] sm:$0xff]  }
0x197a   : > { %v7995_v52 = vmax.f32 %v7921_v17, 0.0  ;;  %v7997_v27 = vmax.f32 %v7964_v22, 0.0  ;;  %v11139_v37 = vld [vmem:[%s13455_s12 + $0x218] sm:$0xff]   ;;  %v11147_v54 = vld [vmem:[%s13455_s12 + $0x228] sm:$0xff]   ;;  %v11149_v43 = vld [vmem:[%s13455_s12 + $0x270] sm:$0xff]  }
0x197b   : > { %v13135_v29 = vpack.c.bf16 %v7994_v18, %v7978_v15  ;;  %v13137_v30 = vpack.c.bf16 %v7996_v20, %v7980_v13  ;;  %v11148_v55 = vld [vmem:[%s13455_s12 + $0x2a8] sm:$0xff]   ;;  %v11150_v59 = vld [vmem:[%s13455_s12 + $0x2f0] sm:$0xff]   ;;  %v11153_v56 = vld [vmem:[%s13455_s12 + $0x278] sm:$0xff]  }
0x197c   : > { %v13139_v31 = vpack.c.bf16 %v7995_v52, %v7979_v25  ;;  %v13141_v32 = vpack.c.bf16 %v7997_v27, %v7981_v51  ;;  %10389 = vmatpush3.bf16.msra.mxu0 %v11115_v19  ;;  %10411 = vmatpush3.bf16.msra.mxu1 %v11116_v23  ;;  %v11151_v60 = vld [vmem:[%s13455_s12 + $0x230] sm:$0xff]   ;;  %v11154_v0 = vld [vmem:[%s13455_s12 + $0x2f8] sm:$0xff]   ;;  %v11157_v6 = vld [vmem:[%s13455_s12 + $0x340] sm:$0xff]  }
0x197d   : > { %10390 = vmatprep.subr.bf16.mxu0 %v11117_v21  ;;  %10412 = vmatprep.subr.bf16.mxu1 %v11118_v24  ;;  %v11152_v61 = vld [vmem:[%s13455_s12 + $0x2b0] sm:$0xff]   ;;  %v11155_v2 = vld [vmem:[%s13455_s12 + $0x238] sm:$0xff]   ;;  %v11158_v7 = vld [vmem:[%s13455_s12 + $0x3c0] sm:$0xff]  }
0x197e   : > { %v11156_v5 = vld [vmem:[%s13455_s12 + $0x2b8] sm:$0xff]   ;;  %v11159_v8 = vld [vmem:[%s13455_s12 + $0x300] sm:$0xff]   ;;  %v11161_v22 = vld [vmem:[%s13455_s12 + $0x348] sm:$0xff]  }
0x197f   : > { %v11160_v17 = vld [vmem:[%s13455_s12 + $0x380] sm:$0xff]   ;;  %v11162_v19 = vld [vmem:[%s13455_s12 + $0x3c8] sm:$0xff]   ;;  %v11167_v13 = vld [vmem:[%s13455_s12 + $0x310] sm:$0xff]  }
0x1980   : > { %10391 = vmatpush3.bf16.msra.mxu0 %v11119_v34  ;;  %10413 = vmatpush3.bf16.msra.mxu1 %v11120_v35  ;;  %v11163_v23 = vld [vmem:[%s13455_s12 + $0x308] sm:$0xff]   ;;  %v11168_v18 = vld [vmem:[%s13455_s12 + $0x390] sm:$0xff]   ;;  %v11169_v20 = vld [vmem:[%s13455_s12 + $0x358] sm:$0xff]  }
0x1981   : > { %10392 = vmatprep.subr.bf16.mxu0 %v11121_v36  ;;  %10414 = vmatprep.subr.bf16.mxu1 %v11122_v39  ;;  %v11164_v15 = vld [vmem:[%s13455_s12 + $0x388] sm:$0xff]   ;;  %v11170_v21 = vld [vmem:[%s13455_s12 + $0x3d8] sm:$0xff]   ;;  %v11173_v51 = vld [vmem:[%s13455_s12 + $0x360] sm:$0xff]  }
0x1982   : > { %v11171_v24 = vld [vmem:[%s13455_s12 + $0x318] sm:$0xff]   ;;  %v11174_v52 = vld [vmem:[%s13455_s12 + $0x3e0] sm:$0xff]   ;;  %v11178_v34 = vld [vmem:[%s13455_s12 + $0x3e8] sm:$0xff]  }
0x1983   : > { %v11172_v25 = vld [vmem:[%s13455_s12 + $0x398] sm:$0xff]   ;;  %v11175_v27 = vld [vmem:[%s13455_s12 + $0x320] sm:$0xff]   ;;  %v11179_v35 = vld [vmem:[%s13455_s12 + $0x328] sm:$0xff]  }
0x1984   : > { %10393 = vmatpush3.bf16.msra.mxu0 %v11123_v14  ;;  %10415 = vmatpush3.bf16.msra.mxu1 %v11124_v41  ;;  %v11180_v36 = vld [vmem:[%s13455_s12 + $0x3a8] sm:$0xff]   ;;  %v11181_v39 = vld [vmem:[%s13455_s12 + $0x370] sm:$0xff]  }
0x1985   : > { %10422 = vmatprep.subr.bf16.mxu0 %v11125_v16  ;;  %10444 = vmatprep.subr.bf16.mxu1 %v11126_v62  ;;  %v11182_v14 = vld [vmem:[%s13455_s12 + $0x3f0] sm:$0xff]   ;;  %v11185_v62 = vld [vmem:[%s13455_s12 + $0x378] sm:$0xff]  }
0x1986   : > { %v11183_v41 = vld [vmem:[%s13455_s12 + $0x330] sm:$0xff]  }
0x1987   : > { %9158 = vmatmul.mubr.bf16.vlgmr.msra.gmra.mrb[112].mxu0 %v13067_v9  ;;  %9199 = vmatmul.mubr.bf16.vlgmr.msra.gmra.mrb[116].mxu1 %v13069_v57  ;;  %v11133_v9 = vld [vmem:[%s13455_s12 + $0x250] sm:$0xff]  }
0x1988   : > { %10423 = vmatpush3.bf16.msra.mxu0 %v11127_v42  ;;  %9239 = vmatprep.mubr.bf16.mxu0 %v13107_v26  ;;  %v11134_v57 = vld [vmem:[%s13455_s12 + $0x2d0] sm:$0xff]   ;;  %v11140_v26 = vld [vmem:[%s13455_s12 + $0x298] sm:$0xff]  }
0x1989   : > { %10445 = vmatpush3.bf16.msra.mxu1 %v11128_v48  ;;  %9280 = vmatprep.mubr.bf16.mxu1 %v13109_v33  ;;  %v11141_v33 = vld [vmem:[%s13455_s12 + $0x260] sm:$0xff]   ;;  %v11184_v16 = vld [vmem:[%s13455_s12 + $0x3b0] sm:$0xff]   ;;  %v11186_v42 = vld [vmem:[%s13455_s12 + $0x3f8] sm:$0xff]  }
0x198a   : > { %10424 = vmatprep.subr.bf16.mxu0 %v11129_v63  ;;  %10446 = vmatprep.subr.bf16.mxu1 %v11130_v11  ;;  %v11187_v48 = vld [vmem:[%s13455_s12 + $0x338] sm:$0xff]  }
0x198b   : > { %v11188_v63 = vld [vmem:[%s13455_s12 + $0x3b8] sm:$0xff]  }
0x198c   : > { %10425 = vmatpush3.bf16.msra.mxu0 %v11131_v45 }
0x198d   : > { %10447 = vmatpush3.bf16.msra.mxu1 %v11132_v3  ;;  %10426 = vmatprep.subr.bf16.mxu0 %v11133_v9  ;;  %v9900_v3 = vld [vmem:[%s13457_s14 + $0xd] ss:$0 sm:$0xff] }
0x198e   : > { %10448 = vmatprep.subr.bf16.mxu1 %v11134_v57 }
0x1990   : > { %10427 = vmatpush3.bf16.msra.mxu0 %v11135_v46 }
0x1991   : > { %10449 = vmatpush3.bf16.msra.mxu1 %v11136_v47  ;;  %10428 = vmatprep.subr.bf16.mxu0 %v11137_v50 }
0x1992   : > { %10450 = vmatprep.subr.bf16.mxu1 %v11138_v38 }
0x1994   : > { %10429 = vmatpush3.bf16.msra.mxu0 %v11139_v37 }
0x1995   : > { %10451 = vmatpush3.bf16.msra.mxu1 %v11140_v26  ;;  %10430 = vmatprep.subr.bf16.mxu0 %v11141_v33 }
0x1996   : > { %10452 = vmatprep.subr.bf16.mxu1 %v11142_v40 }
0x1998   : > { %10431 = vmatpush3.bf16.msra.mxu0 %v11143_v44 }
0x1999   : > { %10453 = vmatpush3.bf16.msra.mxu1 %v11144_v49  ;;  %10432 = vmatprep.subr.bf16.mxu0 %v11145_v53 }
0x199a   : > { %10454 = vmatprep.subr.bf16.mxu1 %v11146_v58 }
0x199c   : > { %10433 = vmatpush3.bf16.msra.mxu0 %v11147_v54 }
0x199d   : > { %10455 = vmatpush3.bf16.msra.mxu1 %v11148_v55  ;;  %10434 = vmatprep.subr.bf16.mxu0 %v11149_v43 }
0x199e   : > { %10456 = vmatprep.subr.bf16.mxu1 %v11150_v59 }
0x19a0   : > { %10435 = vmatpush3.bf16.msra.mxu0 %v11151_v60 }
0x19a1   : > { %10457 = vmatpush3.bf16.msra.mxu1 %v11152_v61  ;;  %10436 = vmatprep.subr.bf16.mxu0 %v11153_v56 }
0x19a2   : > { %10458 = vmatprep.subr.bf16.mxu1 %v11154_v0 }
0x19a4   : > { %10437 = vmatpush3.bf16.msra.mxu0 %v11155_v2 }
0x19a5   : > { %10459 = vmatpush3.bf16.msra.mxu1 %v11156_v5  ;;  %10466 = vmatprep.subr.bf16.mxu0 %v11157_v6 }
0x19a6   : > { %10488 = vmatprep.subr.bf16.mxu1 %v11158_v7 }
0x19a7   : > { %9240 = vmatmul.mubr.bf16.vlgmr.msra.gmra.mrb[116].mxu0 %v13103_v10  ;;  %v11165_v10 = vld [vmem:[%s13455_s12 + $0x350] sm:$0xff]  }
0x19a8   : > { %9281 = vmatmul.mubr.bf16.vlgmr.msra.gmra.mrb[120].mxu1 %v13105_v4  ;;  %10467 = vmatpush3.bf16.msra.mxu0 %v11159_v8  ;;  %v11166_v4 = vld [vmem:[%s13455_s12 + $0x3d0] sm:$0xff]  }
0x19a9   : > { %9321 = vmatprep.mubr.bf16.mxu0 %v13139_v31  ;;  %10489 = vmatpush3.bf16.msra.mxu1 %v11160_v17  ;;  %v11176_v31 = vld [vmem:[%s13455_s12 + $0x3a0] sm:$0xff]  }
0x19aa   : > { %9362 = vmatprep.mubr.bf16.mxu1 %v13141_v32  ;;  %10468 = vmatprep.subr.bf16.mxu0 %v11161_v22  ;;  %v11177_v32 = vld [vmem:[%s13455_s12 + $0x368] sm:$0xff]  }
0x19ab   : > { %10490 = vmatprep.subr.bf16.mxu1 %v11162_v19 }
0x19ac   : > { %10469 = vmatpush3.bf16.msra.mxu0 %v11163_v23 }
0x19ad   : > { %10491 = vmatpush3.bf16.msra.mxu1 %v11164_v15  ;;  %10470 = vmatprep.subr.bf16.mxu0 %v11165_v10 }
0x19ae   : > { %10492 = vmatprep.subr.bf16.mxu1 %v11166_v4 }
0x19b0   : > { %10471 = vmatpush3.bf16.msra.mxu0 %v11167_v13 }
0x19b1   : > { %10493 = vmatpush3.bf16.msra.mxu1 %v11168_v18  ;;  %10472 = vmatprep.subr.bf16.mxu0 %v11169_v20 }
0x19b2   : > { %10494 = vmatprep.subr.bf16.mxu1 %v11170_v21 }
0x19b4   : > { %10473 = vmatpush3.bf16.msra.mxu0 %v11171_v24 }
0x19b5   : > { %10495 = vmatpush3.bf16.msra.mxu1 %v11172_v25  ;;  %10474 = vmatprep.subr.bf16.mxu0 %v11173_v51 }
0x19b6   : > { %10496 = vmatprep.subr.bf16.mxu1 %v11174_v52 }
0x19b8   : > { %10475 = vmatpush3.bf16.msra.mxu0 %v11175_v27 }
0x19b9   : > { %10497 = vmatpush3.bf16.msra.mxu1 %v11176_v31  ;;  %10476 = vmatprep.subr.bf16.mxu0 %v11177_v32 }
0x19ba   : > { %10498 = vmatprep.subr.bf16.mxu1 %v11178_v34 }
0x19bc   : > { %10477 = vmatpush3.bf16.msra.mxu0 %v11179_v35 }
0x19bd   : > { %10499 = vmatpush3.bf16.msra.mxu1 %v11180_v36  ;;  %10478 = vmatprep.subr.bf16.mxu0 %v11181_v39 }
0x19be   : > { %10500 = vmatprep.subr.bf16.mxu1 %v11182_v14 }
0x19c0   : > { %10479 = vmatpush3.bf16.msra.mxu0 %v11183_v41 }
0x19c1   : > { %10501 = vmatpush3.bf16.msra.mxu1 %v11184_v16  ;;  %10480 = vmatprep.subr.bf16.mxu0 %v11185_v62 }
0x19c2   : > { %10502 = vmatprep.subr.bf16.mxu1 %v11186_v42 }
0x19c4   : > { %10481 = vmatpush3.bf16.msra.mxu0 %v11187_v48 }
0x19c5   : > { %10503 = vmatpush3.bf16.msra.mxu1 %v11188_v63  ;;  %10809 = vmatprep.subr.bf16.mxu0 %v11373_v1 }
0x19c7   : > { %9322 = vmatmul.mubr.bf16.vlgmr.msra.gmra.mrb[120].mxu0 %v13135_v29 }
0x19c8   : > { %9363 = vmatmul.mubr.bf16.vlgmr.msra.gmra.mrb[124].mxu1 %v13137_v30  ;;  %10813 = vmatprep.mubr.msk.bf16.mxu0 %vm11374_vm0, %v11373_v1 }
0x1a3a   : > { %v10350_v11 = vpop.f32.mrb[108].mxu0  ;;  %v10372_v45 = vpop.f32.mrb[112].mxu1 }
0x1a3b   : > { %v10351_v9 = vpop.f32.mrb[109].mxu0  ;;  %v10373_v57 = vpop.f32.mrb[113].mxu1 }
0x1a3c   : > { %v10352_v46 = vadd.f32 %v10351_v9, %v10350_v11  ;;  %v10374_v47 = vadd.f32 %v10373_v57, %v10372_v45  ;;  %v10353_v50 = vpop.f32.mrb[110].mxu0  ;;  %v10375_v38 = vpop.f32.mrb[114].mxu1 }
0x1a3d   : > { %v10354_v37 = vpop.f32.mrb[111].mxu0  ;;  %v10376_v26 = vpop.f32.mrb[115].mxu1 }
0x1a3e   : > { %v9078_v29 = vadd.f32 %v10352_v46, %v9900_v3  ;;  %v10355_v33 = vadd.f32 %v10354_v37, %v10353_v50  ;;  %v10377_v30 = vadd.f32 %v10376_v26, %v10375_v38 }
0x1a40   : > { %v9119_v40 = vadd.f32 %v10374_v47, %v9078_v29  ;;  %v9081_v44 = vadd.f32 %v10355_v33, %v9900_v3 }
0x1a42   : > { %v9122_v49 = vadd.f32 %v10377_v30, %v9081_v44 }
0x1a5a   : > { %v10394_v53 = vpop.f32.mrb[112].mxu0  ;;  %v10416_v58 = vpop.f32.mrb[116].mxu1 }
0x1a5b   : > { %v10395_v54 = vpop.f32.mrb[113].mxu0  ;;  %v10417_v55 = vpop.f32.mrb[117].mxu1 }
0x1a5c   : > { %v10396_v43 = vadd.f32 %v10395_v54, %v10394_v53  ;;  %v10418_v59 = vadd.f32 %v10417_v55, %v10416_v58  ;;  %v10397_v60 = vpop.f32.mrb[114].mxu0  ;;  %v10419_v61 = vpop.f32.mrb[118].mxu1  ;;  %v11190_v53 = vld [vmem:[%s13456_s13 + $0x8] sm:$0xff]  }
0x1a5d   : > { %v10398_v56 = vpop.f32.mrb[115].mxu0  ;;  %v10420_v0 = vpop.f32.mrb[119].mxu1 }
0x1a5e   : > { %v9160_v2 = vadd.f32 %v10396_v43, %v9119_v40  ;;  %v10399_v5 = vadd.f32 %v10398_v56, %v10397_v60  ;;  %v10421_v6 = vadd.f32 %v10420_v0, %v10419_v61  ;;  %v10029_v56 = vld [vmem:[%s13457_s14 + $0xe] ss:$0 sm:$0xff] }
0x1a60   : > { %v9201_v7 = vadd.f32 %v10418_v59, %v9160_v2  ;;  %v9163_v8 = vadd.f32 %v10399_v5, %v9122_v49 }
0x1a62   : > { %v9204_v17 = vadd.f32 %v10421_v6, %v9163_v8  ;;  %v10030_v6 = vld [vmem:[%s13457_s14 + $0xf] ss:$0 sm:$0xff] }
0x1a7a   : > { %v10438_v22 = vpop.f32.mrb[116].mxu0 }
0x1a7b   : > { %v10460_v19 = vpop.f32.mrb[120].mxu1  ;;  %v10439_v23 = vpop.f32.mrb[117].mxu0 }
0x1a7c   : > { %v10440_v15 = vadd.f32 %v10439_v23, %v10438_v22  ;;  %v10461_v10 = vpop.f32.mrb[121].mxu1  ;;  %v10441_v4 = vpop.f32.mrb[118].mxu0 }
0x1a7d   : > { %v10462_v13 = vadd.f32 %v10461_v10, %v10460_v19  ;;  %v10463_v18 = vpop.f32.mrb[122].mxu1  ;;  %v10442_v20 = vpop.f32.mrb[119].mxu0  ;;  %v10031_v19 = vld [vmem:[%s13461_s18] ss:$0 sm:$0xff] }
0x1a7e   : > { %v9242_v21 = vadd.f32 %v10440_v15, %v9201_v7  ;;  %v10443_v24 = vadd.f32 %v10442_v20, %v10441_v4  ;;  %v10464_v25 = vpop.f32.mrb[123].mxu1 }
0x1a7f   : > { %v10465_v51 = vadd.f32 %v10464_v25, %v10463_v18 }
0x1a80   : > { %v9283_v52 = vadd.f32 %v10462_v13, %v9242_v21  ;;  %v9245_v27 = vadd.f32 %v10443_v24, %v9204_v17 }
0x1a82   : > { %v9286_v31 = vadd.f32 %v10465_v51, %v9245_v27 }
0x1a9a   : > { %v10482_v32 = vpop.f32.mrb[120].mxu0 }
0x1a9b   : > { %v10504_v34 = vpop.f32.mrb[124].mxu1  ;;  %v10483_v35 = vpop.f32.mrb[121].mxu0 }
0x1a9c   : > { %v10484_v36 = vadd.f32 %v10483_v35, %v10482_v32  ;;  %v10505_v39 = vpop.f32.mrb[125].mxu1  ;;  %v10485_v14 = vpop.f32.mrb[122].mxu0 }
0x1a9d   : > { %v10506_v41 = vadd.f32 %v10505_v39, %v10504_v34  ;;  %v10507_v16 = vpop.f32.mrb[126].mxu1  ;;  %v10486_v62 = vpop.f32.mrb[123].mxu0 }
0x1a9e   : > { %v9324_v42 = vadd.f32 %v10484_v36, %v9283_v52  ;;  %v10487_v48 = vadd.f32 %v10486_v62, %v10485_v14  ;;  %v10508_v63 = vpop.f32.mrb[127].mxu1 }
0x1a9f   : > { %v10509_v11 = vadd.f32 %v10508_v63, %v10507_v16 }
0x1aa0   : > { %v9365_v45 = vadd.f32 %v10506_v41, %v9324_v42  ;;  %v9327_v3 = vadd.f32 %v10487_v48, %v9286_v31 }
0x1aa2   : > { %v9368_v9 = vadd.f32 %v10509_v11, %v9327_v3  ;;  %v9371_v57 = vadd.f32 %v9365_v45, %v12839_v28 }
0x1aa4   : > { %v9373_v46 = vsel %vm651_vm1, %v9371_v57, 0.0  ;;  %v9372_v47 = vadd.f32 %v9368_v9, %v12841_v12  ;;  %v11189_v12 = vld [vmem:[%s13456_s13] sm:$0xff]  }
0x1aa5   : > { %9374 = vadd.xlane.f32.xlu0 %v9373_v46  ;;  %10810 = vmatpush3.bf16.msra.mxu0 %v11189_v12 }
0x1aa6   : > { %v9376_v50 = vsel %vm651_vm1, %v9372_v47, 0.0  ;;  %10811 = vmatprep.subr.bf16.mxu0 %v11373_v1 }
0x1aa7   : > { %9377 = vadd.xlane.f32.xlu1 %v9376_v50 }
0x1aa9   : > { %10812 = vmatpush3.bf16.msra.mxu0 %v11190_v53 }
0x1b32   : > { %v9375_v38 = vpop.xlane.xlu0 %9374 }
0x1b33   : > { %v9379_v37 = vmul.f32 0.03125, %v9375_v38 }
0x1b34   : > { %v9378_v26 = vpop.xlane.xlu1 %9377 }
0x1b35   : > { %v9381_v29 = vsub.f32 %v9371_v57, %v9379_v37  ;;  %v9380_v33 = vmul.f32 0.03125, %v9378_v26 }
0x1b37   : > { %v9382_v30 = vsub.f32 %v9372_v47, %v9380_v33  ;;  %v9383_v40 = vmul.f32 %v9381_v29, %v9381_v29 }
0x1b39   : > { %v9385_v44 = vsel %vm651_vm1, %v9383_v40, 0.0  ;;  %v9384_v49 = vmul.f32 %v9382_v30, %v9382_v30 }
0x1b3a   : > { %9386 = vadd.xlane.f32.xlu0 %v9385_v44 }
0x1b3b   : > { %v9388_v28 = vsel %vm651_vm1, %v9384_v49, 0.0 }
0x1b3c   : > { %9389 = vadd.xlane.f32.xlu1 %v9388_v28 }
0x1bc7   : > { %v9387_v58 = vpop.xlane.xlu0 %9386 }
0x1bc8   : > { %v9391_v54 = vmul.f32 0.03125, %v9387_v58 }
0x1bc9   : > { %v9390_v55 = vpop.xlane.xlu1 %9389 }
0x1bca   : > { %v9393_v43 = vadd.f32 1e-05, %v9391_v54  ;;  %v9392_v59 = vmul.f32 0.03125, %v9390_v55 }
0x1bcc   : > { %11303 = vrsqrt.f32 %v9393_v43  ;;  %v9394_v60 = vadd.f32 1e-05, %v9392_v59 }
0x1bce   : > { %11305 = vrsqrt.f32 %v9394_v60 }
0x1bd6   : > { %v11304_v61 = vpop.eup %11303 }
0x1bd7   : > { %v9397_v0 = vmul.f32 %v11304_v61, %v9381_v29 }
0x1bd8   : > { %v11306_v2 = vpop.eup %11305 }
0x1bd9   : > { %v9404_v5 = vmul.f32 %v10029_v56, %v9397_v0  ;;  %v9398_v1 = vmul.f32 %v11306_v2, %v9382_v30 }
0x1bdb   : > { %v9405_v7 = vmul.f32 %v10029_v56, %v9398_v1  ;;  %v9411_v8 = vadd.f32 %v10030_v6, %v9404_v5 }
0x1bdd   : > { %v9412_v17 = vadd.f32 %v10030_v6, %v9405_v7 }
0x1bdf   : > { %v9417_v22 = vpack.c.bf16 %v9412_v17, %v9411_v8 }
0x1be1   : > { %10814 = vmatmul.mubr.msk.bf16.vlgmr.msra.gmra.mrb[124].mxu0 %vm651_vm1, %v9417_v22 }
0x1cb4   : > { %v9474_v23 = vpop.f32.mrb[124].mxu0 }
0x1cb5   : > { %v9475_v15 = vadd.f32 %v10031_v19, %v9474_v23  ;;  %v10815_v10 = vpop.f32.mrb[125].mxu0 }
0x1cb6   : > { %v9477_v4 = vpop.f32.mrb[126].mxu0 }
0x1cb7   : > { %9481 = vst [vmem:[%s612_s19] sm:$0xff] %v9475_v15  ;;  %v9478_v13 = vadd.f32 %v10031_v19, %v9477_v4  ;;  %v10816_v18 = vpop.f32.mrb[127].mxu0 }
0x1cb9   : > { %9482 = vst [vmem:[%s612_s19 + $0x8] sm:$0xff] %v9478_v13 }
0x1cba   : > { %11322 = shalt.err (!%p11319_p3)
}
0x1cbb   : > { %s11323_s6 = scalar_lea.hbm %s13399_s22, 256  ;;  %s11327_s26 = scalar_lea.hbm %s13541_s4, 512 }
0x1cbc   : > { %p11324_p4 = scmp.ne.s32.totalorder %s13399_s22, %s11323_s6  ;;  %p11328_p9 = scmp.lt.u32.totalorder %s13399_s22, %s13541_s4 }
0x1cbd   : > { %p11329_p10 = scmp.lt.u32.totalorder %s11327_s26, %s11323_s6  ;;  %p11331_p12 = scmp.lt.u32.totalorder %s11323_s6, %s13399_s22 }
0x1cbe   : > { %p11325_p7 = pnand %p11324_p4, %p11530_p5 }
0x1cbf   : > { %p11330_p11 = por %p11329_p10, %p11328_p9 }
0x1cc0   : > { %p11326_p8 = pneg %p11325_p7 }
0x1cc1   : > { %p11332_p13 = por %p11331_p12, %p11330_p11 }
0x1cc3   : > { %p11333_p0 = pnand %p11332_p13, %p11326_p8 }
0x1cc5   : > { %11336 = shalt.err (!%p11333_p0)
}
0x1cc6   : > { %s11391_s28 = smov 128  }
0x1cc7   : > { %10817 = dma.vmem_to_hbm [thread:$0]  (%p11530_p5), %s13394_s20, 256, %s13399_s22, %s13401_s2, %s11391_s28, %s11391_s28, %s13538_s29  }
0x1cc8 PF: > { %s13542_s24 = sld [smem:[#allocation7_spill]]  ;;  %s13543_s1 = sld [smem:[#allocation5_spill]] }
0x1cce   : > { %p10823_p1 = scmp.ge.s32.totalorder %s13542_s24, 2  ;;  %s9512_s23 = sand.u32 1, %s13543_s1  }
0x1ccf   : > { %s9513_s5 = scalar_lea.sflag [#allocation3], %s9512_s23 }
0x1cd0   : > { %p10820_p2 = pnand %p10823_p1, %p11534_p6 }
0x1cd2   : > { %11354 = dma.done.wait (!%p10820_p2), %s9513_s5, 256  }
0x1cd3   : > { %11356 = vsyncadd (!%p10820_p2), %s9513_s5, 4294967040  ;;  %s13545_s21 = sld [smem:[#allocation8_spill]]  ;;  %s13546_s6 = sld [smem:[#allocation6_spill]] }
0x1cd4   : > { %s13547_s20 = sld [smem:[#allocation9_spill]]  ;;  %s13548_s0 = smov %s11363_s30 }
0x1cd9   : > { %p29_p3 = scmp.ge.s32.totalorder %s13545_s21, 4   ;;  %s13549_s30 = smov %s13546_s6 }
0x1cdb   :  { %31 = sbr.rel (!%p29_p3) target bundleno = 12 (0xc), region = 137 }
0x1ce2   :  { %9518 = vsyncpa [#allocation3], 1 }
0x1ce3   :  { %9520 = vsyncpa [#allocation3 + $0x1], 1 }

</bundles_post_ra>
